<compile_context>
chip_gen: v7x
topology: tpu7x:2x2x1
jax: 0.10.0
libtpu: 0.0.40
codegen_flags: <defaults>
</compile_context>

<pallas_src>
import math

import jax
import jax.numpy as jnp
from jax.experimental import pallas as pl
from jax.experimental.pallas import tpu as pltpu


def _round_up(x, m):
    return (x + m - 1) // m * m


def _vmem_cap_bytes():
    """Physical VMEM per TensorCore (hardware-aware cap; v7x only has 64 MiB)."""
    try:
        cap = getattr(pltpu.get_tpu_info(), "vmem_capacity_bytes", None)
        if cap:
            return int(cap)
    except Exception:
        pass
    return 64 << 20  # conservative fallback = v7x per-core VMEM


def _default_batch_tiles(Bp):
    """Use 2 batch tiles on v7x (2 TensorCores) when the batch is large enough, else 1.

    On single-TC chips (v5e/v6e) a batch split only serializes extra recurrent matmul
    steps (the per-step cost is weight-streaming dominated), so keep 1 there.
    """
    try:
        kind = jax.devices()[0].device_kind.lower()
    except Exception:
        return 1
    if "v7" in kind and Bp >= 32 and Bp % 32 == 0:
        return 2
    return 1


# ----------------------------- Pallas kernel -------------------------------- #
def lstm_classifier_kernel(
    x_ref,      # (TC, BT, Dp)   bf16  time-major input chunk
    wih0_ref,   # (Dp, 4Hp)      bf16  layer-0 input weight^T
    whh0_ref,   # (Hp, 4Hp)      bf16  layer-0 recurrent weight^T
    b0_ref,     # (1, 4Hp)       f32   layer-0 bias (b_ih + b_hh)
    wih1_ref,   # (Hp, 4Hp)      bf16  layer-1 input weight^T
    whh1_ref,   # (Hp, 4Hp)      bf16  layer-1 recurrent weight^T
    b1_ref,     # (1, 4Hp)       f32   layer-1 bias
    wfc_ref,    # (Hp, Op)       bf16  final linear weight^T
    bfc_ref,    # (1, Op)        f32   final linear bias
    out_ref,    # (BT, Op)       f32   logits for this batch tile
    h0_s, c0_s, h1_s, c1_s,      # (BT, Hp)      f32   recurrent state (persists over chunks)
    hseq_s,                      # (TC*BT, Hp)   bf16  layer-0 hidden states for the chunk
    gx_s,                        # (TC*BT, 4Hp)  f32   batched input-projection gates
):
    TC, BT, Dp = x_ref.shape
    Hp = h0_s.shape[1]
    chunk = pl.program_id(1)

    # PyTorch default zero initial state, re-zeroed at the first chunk of each batch tile.
    @pl.when(chunk == 0)
    def _():
        for r in (h0_s, c0_s, h1_s, c1_s):
            r[...] = jnp.zeros_like(r)

    def sigmoid(v):
        # sigmoid(x) = 0.5 * tanh(0.5 x) + 0.5: one EUP op per gate.
        return 0.5 * jnp.tanh(0.5 * v) + 0.5

    def recurrence(whh_ref, h_s, c_s, seq_out_ref):
        # Serial per-step work is only (BT, Hp) @ (Hp, 4Hp) + elementwise: the input
        # projection (bias included) was already batched into gx_s for the whole chunk.
        whh = whh_ref[...]
        h = h_s[...]
        c = c_s[...]
        for t in range(TC):
            gates = gx_s[pl.ds(t * BT, BT), :] + jnp.dot(
                h.astype(jnp.bfloat16), whh, preferred_element_type=jnp.float32)
            i = sigmoid(gates[:, 0 * Hp:1 * Hp])
            f = sigmoid(gates[:, 1 * Hp:2 * Hp])
            g = jnp.tanh(gates[:, 2 * Hp:3 * Hp])
            o = sigmoid(gates[:, 3 * Hp:4 * Hp])
            c = f * c + i * g
            h = o * jnp.tanh(c)
            if seq_out_ref is not None:
                seq_out_ref[pl.ds(t * BT, BT), :] = h.astype(jnp.bfloat16)
        # One scratch round-trip per chunk (not per timestep).
        h_s[...] = h
        c_s[...] = c
        return h

    # ---- layer 0: one batched input projection for the whole chunk (M = TC*BT rows). ----
    xm = x_ref[...].reshape(TC * BT, Dp)       # tile-aligned collapse (BT is a mult of 16)
    gx_s[...] = jnp.dot(xm, wih0_ref[...],
                        preferred_element_type=jnp.float32) + b0_ref[...]
    recurrence(whh0_ref, h0_s, c0_s, hseq_s)

    # ---- layer 1 (inter-layer LSTM dropout = identity in eval): batched projection of the
    # stored layer-0 outputs (gx_s is reused), then its recurrence. ----
    gx_s[...] = jnp.dot(hseq_s[...], wih1_ref[...],
                        preferred_element_type=jnp.float32) + b1_ref[...]
    h1 = recurrence(whh1_ref, h1_s, c1_s, None)

    # self.dropout(hn[-1]) is identity in eval; fc only on this batch tile's last chunk.
    @pl.when(chunk == pl.num_programs(1) - 1)
    def _():
        out_ref[...] = jnp.dot(h1.astype(jnp.bfloat16), wfc_ref[...],
                               preferred_element_type=jnp.float32) + bfc_ref[...]


# ------------------------------- wrapper ------------------------------------ #
def text_classifier_forward(x, params, time_chunk=32, batch_tiles=None):
    """x: (B, T, D) float32, batch_first — same as the PyTorch module."""
    B, T, D = x.shape
    H = params["w_hh_l0"].shape[1]
    O = params["fc_w"].shape[0]

    # Hardware-tile padding (semantics-preserving; see header). B is padded to a multiple
    # of 16 so bf16 blocks and the (TC*BT, .) reshapes are sublane-tile aligned.
    Bp = _round_up(B, 16)
    Dp = _round_up(D, 128)
    Hp = _round_up(H, 128)
    Op = _round_up(O, 128)

    if batch_tiles is None:
        batch_tiles = _default_batch_tiles(Bp)
    n_btiles = batch_tiles if (batch_tiles > 0 and Bp % (16 * batch_tiles) == 0) else 1
    BT = Bp // n_btiles

    # Largest time chunk that divides T (padding T would change LSTM semantics).
    TC = T
    for cand in range(min(time_chunk, T), 0, -1):
        if T % cand == 0:
            TC = cand
            break
    n_chunks = T // TC

    f32, bf16 = jnp.float32, jnp.bfloat16

    def pad_gate_w(w, in_dim, in_p):
        # (4H, in_dim) -> (in_p, 4Hp): each gate block (i,f,g,o) padded separately, then
        # transposed so the kernel does x @ W^T as a plain row-major matmul.
        w4 = w.reshape(4, H, in_dim)
        w4 = jnp.pad(w4, ((0, 0), (0, Hp - H), (0, in_p - in_dim)))
        return w4.reshape(4 * Hp, in_p).T.astype(bf16)

    def pad_gate_b(b):
        return jnp.pad(b.reshape(4, H), ((0, 0), (0, Hp - H))).reshape(4 * Hp)

    wih0 = pad_gate_w(params["w_ih_l0"], D, Dp)                               # (Dp, 4Hp)
    whh0 = pad_gate_w(params["w_hh_l0"], H, Hp)                               # (Hp, 4Hp)
    b0 = (pad_gate_b(params["b_ih_l0"]) + pad_gate_b(params["b_hh_l0"])
          ).reshape(1, 4 * Hp).astype(f32)
    wih1 = pad_gate_w(params["w_ih_l1"], H, Hp)                               # (Hp, 4Hp)
    whh1 = pad_gate_w(params["w_hh_l1"], H, Hp)                               # (Hp, 4Hp)
    b1 = (pad_gate_b(params["b_ih_l1"]) + pad_gate_b(params["b_hh_l1"])
          ).reshape(1, 4 * Hp).astype(f32)
    wfc = jnp.pad(params["fc_w"], ((0, Op - O), (0, Hp - H))).T.astype(bf16)  # (Hp, Op)
    bfc = jnp.pad(params["fc_b"], (0, Op - O)).reshape(1, Op).astype(f32)     # (1, Op)

    # Time-major, bf16 input (one XLA HBM transpose; halves the recurring x DMA).
    x_tm = jnp.transpose(jnp.pad(x, ((0, Bp - B), (0, 0), (0, Dp - D))),
                         (1, 0, 2)).astype(bf16)                              # (T, Bp, Dp)

    # Explicit VMEM budget (double-buffered blocks + scratch), hardware-aware cap.
    def nbytes(shape, dt):
        return math.prod(shape) * jnp.dtype(dt).itemsize

    needed = (
        2 * nbytes((TC, BT, Dp), bf16)                                        # x block
        + 2 * (nbytes((Dp, 4 * Hp), bf16) + 3 * nbytes((Hp, 4 * Hp), bf16)
               + nbytes((Hp, Op), bf16)
               + 2 * nbytes((1, 4 * Hp), f32) + nbytes((1, Op), f32))         # resident weights
        + 2 * nbytes((BT, Op), f32)                                           # out block
        + 4 * nbytes((BT, Hp), f32)                                           # h/c state
        + nbytes((TC * BT, Hp), bf16)                                         # hseq scratch
        + nbytes((TC * BT, 4 * Hp), f32)                                      # gate scratch
    )
    # NOTE: weights have constant index_maps (DMA'd once); single-buffering them
    # (pipeline_mode=pl.Buffered(1)) would halve their footprint — left default here since
    # the budget above fits comfortably on every generation at the module's spec shapes.
    vmem_limit = int(min(_vmem_cap_bytes() * 3 // 4,
                         max(needed + (8 << 20), 32 << 20)))

    const = lambda b, t: (0, 0)
    out = pl.pallas_call(
        lstm_classifier_kernel,
        out_shape=jax.ShapeDtypeStruct((Bp, Op), f32),
        grid_spec=pltpu.PrefetchScalarGridSpec(
            num_scalar_prefetch=0,
            grid=(n_btiles, n_chunks),
            in_specs=[
                pl.BlockSpec((TC, BT, Dp), lambda b, t: (t, b, 0)),   # streamed x chunk
                pl.BlockSpec((Dp, 4 * Hp), const),                    # resident weights
                pl.BlockSpec((Hp, 4 * Hp), const),
                pl.BlockSpec((1, 4 * Hp), const),
                pl.BlockSpec((Hp, 4 * Hp), const),
                pl.BlockSpec((Hp, 4 * Hp), const),
                pl.BlockSpec((1, 4 * Hp), const),
                pl.BlockSpec((Hp, Op), const),
                pl.BlockSpec((1, Op), const),
            ],
            out_specs=pl.BlockSpec((BT, Op), lambda b, t: (b, 0)),
            scratch_shapes=[pltpu.VMEM((BT, Hp), f32) for _ in range(4)]
            + [pltpu.VMEM((TC * BT, Hp), bf16),
               pltpu.VMEM((TC * BT, 4 * Hp), f32)],
        ),
        compiler_params=pltpu.CompilerParams(
            # batch tiles are independent (megacore on v7x); the time axis carries state.
            dimension_semantics=("parallel", "arbitrary"),
            vmem_limit_bytes=vmem_limit,
        ),
    )(x_tm, wih0, whh0, b0, wih1, whh1, b1, wfc, bfc)

    return out[:B, :O]


# --------------------------- pure-JAX reference ------------------------------ #
def reference_forward(x, params):
    B, T, D = x.shape
    H = params["w_hh_l0"].shape[1]

    def run_layer(inp, wih, whh, bih, bhh):
        h = jnp.zeros((B, H), jnp.float32)
        c = jnp.zeros((B, H), jnp.float32)
        outs = []
        for t in range(T):
            gates = inp[:, t] @ wih.T + h @ whh.T + bih + bhh
            i, f, g, o = jnp.split(gates, 4, axis=-1)
            i, f, o = jax.nn.sigmoid(i), jax.nn.sigmoid(f), jax.nn.sigmoid(o)
            g = jnp.tanh(g)
            c = f * c + i * g
            h = o * jnp.tanh(c)
            outs.append(h)
        return jnp.stack(outs, axis=1), h

    out0, _ = run_layer(x, params["w_ih_l0"], params["w_hh_l0"],
                        params["b_ih_l0"], params["b_hh_l0"])
    _, h1 = run_layer(out0, params["w_ih_l1"], params["w_hh_l1"],
                      params["b_ih_l1"], params["b_hh_l1"])
    return h1 @ params["fc_w"].T + params["fc_b"]


# ------------------------------ param init ----------------------------------- #
def init_params(key, input_dim, hidden_dim, output_dim):
    """Deterministic init mimicking PyTorch's U(-1/sqrt(H), 1/sqrt(H))."""
    H, D, O = hidden_dim, input_dim, output_dim
    k = 1.0 / jnp.sqrt(H)
    names_shapes = [
        ("w_ih_l0", (4 * H, D)), ("w_hh_l0", (4 * H, H)),
        ("b_ih_l0", (4 * H,)),   ("b_hh_l0", (4 * H,)),
        ("w_ih_l1", (4 * H, H)), ("w_hh_l1", (4 * H, H)),
        ("b_ih_l1", (4 * H,)),   ("b_hh_l1", (4 * H,)),
        ("fc_w", (O, H)),        ("fc_b", (O,)),
    ]
    params = {}
    keys = jax.random.split(key, len(names_shapes))
    for (name, shape), kk in zip(names_shapes, keys):
        params[name] = jax.random.uniform(kk, shape, jnp.float32, -k, k)
    return params


# --------------------------------- main -------------------------------------- #
if __name__ == "__main__":
    # Small shapes consistent with the module (module defaults: D=768, H=512).
    # T=16 with time_chunk=8 exercises the cross-chunk recurrent-state carry.
    B, T, D, H, O = 2, 16, 64, 32, 4

    key = jax.random.PRNGKey(0)
    k_x, k_p = jax.random.split(key)
    x = jax.random.normal(k_x, (B, T, D), jnp.float32)
    params = init_params(k_p, D, H, O)

    out = jax.block_until_ready(text_classifier_forward(x, params, time_chunk=8))
    ref = jax.block_until_ready(reference_forward(x, params))

    assert out.shape == (B, O)
    # bf16 inputs/weights on the MXU (f32 accumulation) trade a little precision for
    # throughput -> compare against the f32 reference loosely.
    assert jnp.allclose(out, ref, atol=5e-2, rtol=5e-2), (out, ref)
    print("KERNEL_OK")
</pallas_src>

<mosaic_0001>
module attributes {stable_mosaic.version = 11 : i64} {
  func.func @lstm_classifier_kernel(%arg0: i32, %arg1: i32, %arg2: memref<8x16x128xbf16, #tpu.memory_space<vmem>>, %arg3: memref<128x512xbf16, #tpu.memory_space<vmem>>, %arg4: memref<128x512xbf16, #tpu.memory_space<vmem>>, %arg5: memref<1x512xf32, #tpu.memory_space<vmem>>, %arg6: memref<128x512xbf16, #tpu.memory_space<vmem>>, %arg7: memref<128x512xbf16, #tpu.memory_space<vmem>>, %arg8: memref<1x512xf32, #tpu.memory_space<vmem>>, %arg9: memref<128x128xbf16, #tpu.memory_space<vmem>>, %arg10: memref<1x128xf32, #tpu.memory_space<vmem>>, %arg11: memref<16x128xf32, #tpu.memory_space<vmem>>, %arg12: memref<16x128xf32, #tpu.memory_space<vmem>>, %arg13: memref<16x128xf32, #tpu.memory_space<vmem>>, %arg14: memref<16x128xf32, #tpu.memory_space<vmem>>, %arg15: memref<16x128xf32, #tpu.memory_space<vmem>>, %arg16: memref<128x128xbf16, #tpu.memory_space<vmem>>, %arg17: memref<128x512xf32, #tpu.memory_space<vmem>>) attributes {dimension_semantics = [#tpu.dimension_semantics<parallel>, #tpu.dimension_semantics<arbitrary>], iteration_bounds = array<i64: 1, 2>, scalar_prefetch = 0 : i64, scratch_operands = 6 : i64, tpu.core_type = #tpu.core_type<tc>, window_params = [{transform_indices = @transform_0, window_bounds = array<i64: 8, 16, 128>}, {pipeline_mode = #tpu.pipeline_mode<synchronous>, transform_indices = @transform_1, window_bounds = array<i64: 128, 512>}, {pipeline_mode = #tpu.pipeline_mode<synchronous>, transform_indices = @transform_2, window_bounds = array<i64: 128, 512>}, {pipeline_mode = #tpu.pipeline_mode<synchronous>, transform_indices = @transform_3, window_bounds = array<i64: 1, 512>}, {pipeline_mode = #tpu.pipeline_mode<synchronous>, transform_indices = @transform_4, window_bounds = array<i64: 128, 512>}, {pipeline_mode = #tpu.pipeline_mode<synchronous>, transform_indices = @transform_5, window_bounds = array<i64: 128, 512>}, {pipeline_mode = #tpu.pipeline_mode<synchronous>, transform_indices = @transform_6, window_bounds = array<i64: 1, 512>}, {pipeline_mode = #tpu.pipeline_mode<synchronous>, transform_indices = @transform_7, window_bounds = array<i64: 128, 128>}, {pipeline_mode = #tpu.pipeline_mode<synchronous>, transform_indices = @transform_8, window_bounds = array<i64: 1, 128>}, {transform_indices = @transform_9, window_bounds = array<i64: 16, 128>}]} {
    %c0_i32 = arith.constant 0 : i32
    %0 = arith.cmpi eq, %arg1, %c0_i32 : i32
    %1 = arith.extui %0 : i1 to i32
    %c0_i32_0 = arith.constant 0 : i32
    %2 = arith.cmpi ne, %1, %c0_i32_0 : i32
    scf.if %2 {
      %cst_240 = arith.constant 0.000000e+00 : f32
      %607 = vector.broadcast %cst_240 : f32 to vector<16x128xf32>
      %c0_241 = arith.constant 0 : index
      %c0_242 = arith.constant 0 : index
      %608 = vector.load %arg12[%c0_241, %c0_242] : memref<16x128xf32, #tpu.memory_space<vmem>>, vector<16x128xf32>
      tpu.vector_store %arg12[%c0_241, %c0_242], %607 {strides = array<i32>} : memref<16x128xf32, #tpu.memory_space<vmem>>, vector<16x128xf32>,
      %cst_243 = arith.constant 0.000000e+00 : f32
      %609 = vector.broadcast %cst_243 : f32 to vector<16x128xf32>
      %c0_244 = arith.constant 0 : index
      %c0_245 = arith.constant 0 : index
      %610 = vector.load %arg13[%c0_244, %c0_245] : memref<16x128xf32, #tpu.memory_space<vmem>>, vector<16x128xf32>
      tpu.vector_store %arg13[%c0_244, %c0_245], %609 {strides = array<i32>} : memref<16x128xf32, #tpu.memory_space<vmem>>, vector<16x128xf32>,
      %cst_246 = arith.constant 0.000000e+00 : f32
      %611 = vector.broadcast %cst_246 : f32 to vector<16x128xf32>
      %c0_247 = arith.constant 0 : index
      %c0_248 = arith.constant 0 : index
      %612 = vector.load %arg14[%c0_247, %c0_248] : memref<16x128xf32, #tpu.memory_space<vmem>>, vector<16x128xf32>
      tpu.vector_store %arg14[%c0_247, %c0_248], %611 {strides = array<i32>} : memref<16x128xf32, #tpu.memory_space<vmem>>, vector<16x128xf32>,
      %cst_249 = arith.constant 0.000000e+00 : f32
      %613 = vector.broadcast %cst_249 : f32 to vector<16x128xf32>
      %c0_250 = arith.constant 0 : index
      %c0_251 = arith.constant 0 : index
      %614 = vector.load %arg15[%c0_250, %c0_251] : memref<16x128xf32, #tpu.memory_space<vmem>>, vector<16x128xf32>
      tpu.vector_store %arg15[%c0_250, %c0_251], %613 {strides = array<i32>} : memref<16x128xf32, #tpu.memory_space<vmem>>, vector<16x128xf32>,
    } else {
    }
    %c0 = arith.constant 0 : index
    %c0_1 = arith.constant 0 : index
    %c0_2 = arith.constant 0 : index
    %3 = vector.load %arg2[%c0, %c0_1, %c0_2] : memref<8x16x128xbf16, #tpu.memory_space<vmem>>, vector<8x16x128xbf16>
    %4 = vector.shape_cast %3 : vector<8x16x128xbf16> to vector<128x128xbf16>
    %c0_3 = arith.constant 0 : index
    %c0_4 = arith.constant 0 : index
    %5 = vector.load %arg3[%c0_3, %c0_4] : memref<128x512xbf16, #tpu.memory_space<vmem>>, vector<128x512xbf16>
    %cst = arith.constant dense<0.000000e+00> : vector<128x512xf32>
    %6 = tpu.matmul %4, %5, %cst {dimension_numbers = #tpu.dot_dimension_numbers<[1], [0], [0], [1], [0, 0, 1, 1], [], []>} : vector<128x128xbf16>, vector<128x512xbf16>, vector<128x512xf32> -> vector<128x512xf32>
    %c0_5 = arith.constant 0 : index
    %c0_6 = arith.constant 0 : index
    %7 = vector.load %arg5[%c0_5, %c0_6] : memref<1x512xf32, #tpu.memory_space<vmem>>, vector<1x512xf32>
    %8 = vector.broadcast %7 : vector<1x512xf32> to vector<128x512xf32>
    %9 = arith.addf %6, %8 : vector<128x512xf32>
    %c0_7 = arith.constant 0 : index
    %c0_8 = arith.constant 0 : index
    %10 = vector.load %arg17[%c0_7, %c0_8] : memref<128x512xf32, #tpu.memory_space<vmem>>, vector<128x512xf32>
    tpu.vector_store %arg17[%c0_7, %c0_8], %9 {strides = array<i32>} : memref<128x512xf32, #tpu.memory_space<vmem>>, vector<128x512xf32>,
    %c0_9 = arith.constant 0 : index
    %c0_10 = arith.constant 0 : index
    %11 = vector.load %arg4[%c0_9, %c0_10] : memref<128x512xbf16, #tpu.memory_space<vmem>>, vector<128x512xbf16>
    %c0_11 = arith.constant 0 : index
    %c0_12 = arith.constant 0 : index
    %12 = vector.load %arg12[%c0_11, %c0_12] : memref<16x128xf32, #tpu.memory_space<vmem>>, vector<16x128xf32>
    %c0_13 = arith.constant 0 : index
    %c0_14 = arith.constant 0 : index
    %13 = vector.load %arg13[%c0_13, %c0_14] : memref<16x128xf32, #tpu.memory_space<vmem>>, vector<16x128xf32>
    %c0_15 = arith.constant 0 : index
    %c0_16 = arith.constant 0 : index
    %14 = vector.load %arg17[%c0_15, %c0_16] : memref<128x512xf32, #tpu.memory_space<vmem>>, vector<16x512xf32>
    %15 = arith.truncf %12 : vector<16x128xf32> to vector<16x128xbf16>
    %cst_17 = arith.constant dense<0.000000e+00> : vector<16x512xf32>
    %16 = tpu.matmul %15, %11, %cst_17 {dimension_numbers = #tpu.dot_dimension_numbers<[1], [0], [0], [1], [0, 0, 1, 1], [], []>} : vector<16x128xbf16>, vector<128x512xbf16>, vector<16x512xf32> -> vector<16x512xf32>
    %17 = arith.addf %14, %16 : vector<16x512xf32>
    %18 = vector.extract_strided_slice %17 {offsets = [0, 0], sizes = [16, 128], strides = [1, 1]} : vector<16x512xf32> to vector<16x128xf32>
    %cst_18 = arith.constant 5.000000e-01 : f32
    %19 = vector.broadcast %cst_18 : f32 to vector<16x128xf32>
    %20 = arith.mulf %19, %18 : vector<16x128xf32>
    %21 = math.tanh %20 : vector<16x128xf32>
    %cst_19 = arith.constant 5.000000e-01 : f32
    %22 = vector.broadcast %cst_19 : f32 to vector<16x128xf32>
    %23 = arith.mulf %22, %21 : vector<16x128xf32>
    %cst_20 = arith.constant 5.000000e-01 : f32
    %24 = vector.broadcast %cst_20 : f32 to vector<16x128xf32>
    %25 = arith.addf %23, %24 : vector<16x128xf32>
    %26 = vector.extract_strided_slice %17 {offsets = [0, 128], sizes = [16, 128], strides = [1, 1]} : vector<16x512xf32> to vector<16x128xf32>
    %cst_21 = arith.constant 5.000000e-01 : f32
    %27 = vector.broadcast %cst_21 : f32 to vector<16x128xf32>
    %28 = arith.mulf %27, %26 : vector<16x128xf32>
    %29 = math.tanh %28 : vector<16x128xf32>
    %cst_22 = arith.constant 5.000000e-01 : f32
    %30 = vector.broadcast %cst_22 : f32 to vector<16x128xf32>
    %31 = arith.mulf %30, %29 : vector<16x128xf32>
    %cst_23 = arith.constant 5.000000e-01 : f32
    %32 = vector.broadcast %cst_23 : f32 to vector<16x128xf32>
    %33 = arith.addf %31, %32 : vector<16x128xf32>
    %34 = vector.extract_strided_slice %17 {offsets = [0, 256], sizes = [16, 128], strides = [1, 1]} : vector<16x512xf32> to vector<16x128xf32>
    %35 = math.tanh %34 : vector<16x128xf32>
    %36 = vector.extract_strided_slice %17 {offsets = [0, 384], sizes = [16, 128], strides = [1, 1]} : vector<16x512xf32> to vector<16x128xf32>
    %cst_24 = arith.constant 5.000000e-01 : f32
    %37 = vector.broadcast %cst_24 : f32 to vector<16x128xf32>
    %38 = arith.mulf %37, %36 : vector<16x128xf32>
    %39 = math.tanh %38 : vector<16x128xf32>
    %cst_25 = arith.constant 5.000000e-01 : f32
    %40 = vector.broadcast %cst_25 : f32 to vector<16x128xf32>
    %41 = arith.mulf %40, %39 : vector<16x128xf32>
    %cst_26 = arith.constant 5.000000e-01 : f32
    %42 = vector.broadcast %cst_26 : f32 to vector<16x128xf32>
    %43 = arith.addf %41, %42 : vector<16x128xf32>
    %44 = arith.mulf %33, %13 : vector<16x128xf32>
    %45 = arith.mulf %25, %35 : vector<16x128xf32>
    %46 = arith.addf %44, %45 : vector<16x128xf32>
    %47 = math.tanh %46 : vector<16x128xf32>
    %48 = arith.mulf %43, %47 : vector<16x128xf32>
    %49 = arith.truncf %48 : vector<16x128xf32> to vector<16x128xbf16>
    %c0_27 = arith.constant 0 : index
    %c0_28 = arith.constant 0 : index
    %50 = vector.load %arg16[%c0_27, %c0_28] : memref<128x128xbf16, #tpu.memory_space<vmem>>, vector<16x128xbf16>
    tpu.vector_store %arg16[%c0_27, %c0_28], %49 {strides = array<i32>} : memref<128x128xbf16, #tpu.memory_space<vmem>>, vector<16x128xbf16>,
    %c16 = arith.constant 16 : index
    %c0_29 = arith.constant 0 : index
    %51 = vector.load %arg17[%c16, %c0_29] : memref<128x512xf32, #tpu.memory_space<vmem>>, vector<16x512xf32>
    %52 = arith.truncf %48 : vector<16x128xf32> to vector<16x128xbf16>
    %cst_30 = arith.constant dense<0.000000e+00> : vector<16x512xf32>
    %53 = tpu.matmul %52, %11, %cst_30 {dimension_numbers = #tpu.dot_dimension_numbers<[1], [0], [0], [1], [0, 0, 1, 1], [], []>} : vector<16x128xbf16>, vector<128x512xbf16>, vector<16x512xf32> -> vector<16x512xf32>
    %54 = arith.addf %51, %53 : vector<16x512xf32>
    %55 = vector.extract_strided_slice %54 {offsets = [0, 0], sizes = [16, 128], strides = [1, 1]} : vector<16x512xf32> to vector<16x128xf32>
    %cst_31 = arith.constant 5.000000e-01 : f32
    %56 = vector.broadcast %cst_31 : f32 to vector<16x128xf32>
    %57 = arith.mulf %56, %55 : vector<16x128xf32>
    %58 = math.tanh %57 : vector<16x128xf32>
    %cst_32 = arith.constant 5.000000e-01 : f32
    %59 = vector.broadcast %cst_32 : f32 to vector<16x128xf32>
    %60 = arith.mulf %59, %58 : vector<16x128xf32>
    %cst_33 = arith.constant 5.000000e-01 : f32
    %61 = vector.broadcast %cst_33 : f32 to vector<16x128xf32>
    %62 = arith.addf %60, %61 : vector<16x128xf32>
    %63 = vector.extract_strided_slice %54 {offsets = [0, 128], sizes = [16, 128], strides = [1, 1]} : vector<16x512xf32> to vector<16x128xf32>
    %cst_34 = arith.constant 5.000000e-01 : f32
    %64 = vector.broadcast %cst_34 : f32 to vector<16x128xf32>
    %65 = arith.mulf %64, %63 : vector<16x128xf32>
    %66 = math.tanh %65 : vector<16x128xf32>
    %cst_35 = arith.constant 5.000000e-01 : f32
    %67 = vector.broadcast %cst_35 : f32 to vector<16x128xf32>
    %68 = arith.mulf %67, %66 : vector<16x128xf32>
    %cst_36 = arith.constant 5.000000e-01 : f32
    %69 = vector.broadcast %cst_36 : f32 to vector<16x128xf32>
    %70 = arith.addf %68, %69 : vector<16x128xf32>
    %71 = vector.extract_strided_slice %54 {offsets = [0, 256], sizes = [16, 128], strides = [1, 1]} : vector<16x512xf32> to vector<16x128xf32>
    %72 = math.tanh %71 : vector<16x128xf32>
    %73 = vector.extract_strided_slice %54 {offsets = [0, 384], sizes = [16, 128], strides = [1, 1]} : vector<16x512xf32> to vector<16x128xf32>
    %cst_37 = arith.constant 5.000000e-01 : f32
    %74 = vector.broadcast %cst_37 : f32 to vector<16x128xf32>
    %75 = arith.mulf %74, %73 : vector<16x128xf32>
    %76 = math.tanh %75 : vector<16x128xf32>
    %cst_38 = arith.constant 5.000000e-01 : f32
    %77 = vector.broadcast %cst_38 : f32 to vector<16x128xf32>
    %78 = arith.mulf %77, %76 : vector<16x128xf32>
    %cst_39 = arith.constant 5.000000e-01 : f32
    %79 = vector.broadcast %cst_39 : f32 to vector<16x128xf32>
    %80 = arith.addf %78, %79 : vector<16x128xf32>
    %81 = arith.mulf %70, %46 : vector<16x128xf32>
    %82 = arith.mulf %62, %72 : vector<16x128xf32>
    %83 = arith.addf %81, %82 : vector<16x128xf32>
    %84 = math.tanh %83 : vector<16x128xf32>
    %85 = arith.mulf %80, %84 : vector<16x128xf32>
    %86 = arith.truncf %85 : vector<16x128xf32> to vector<16x128xbf16>
    %c16_40 = arith.constant 16 : index
    %c0_41 = arith.constant 0 : index
    %87 = vector.load %arg16[%c16_40, %c0_41] : memref<128x128xbf16, #tpu.memory_space<vmem>>, vector<16x128xbf16>
    tpu.vector_store %arg16[%c16_40, %c0_41], %86 {strides = array<i32>} : memref<128x128xbf16, #tpu.memory_space<vmem>>, vector<16x128xbf16>,
    %c32 = arith.constant 32 : index
    %c0_42 = arith.constant 0 : index
    %88 = vector.load %arg17[%c32, %c0_42] : memref<128x512xf32, #tpu.memory_space<vmem>>, vector<16x512xf32>
    %89 = arith.truncf %85 : vector<16x128xf32> to vector<16x128xbf16>
    %cst_43 = arith.constant dense<0.000000e+00> : vector<16x512xf32>
    %90 = tpu.matmul %89, %11, %cst_43 {dimension_numbers = #tpu.dot_dimension_numbers<[1], [0], [0], [1], [0, 0, 1, 1], [], []>} : vector<16x128xbf16>, vector<128x512xbf16>, vector<16x512xf32> -> vector<16x512xf32>
    %91 = arith.addf %88, %90 : vector<16x512xf32>
    %92 = vector.extract_strided_slice %91 {offsets = [0, 0], sizes = [16, 128], strides = [1, 1]} : vector<16x512xf32> to vector<16x128xf32>
    %cst_44 = arith.constant 5.000000e-01 : f32
    %93 = vector.broadcast %cst_44 : f32 to vector<16x128xf32>
    %94 = arith.mulf %93, %92 : vector<16x128xf32>
    %95 = math.tanh %94 : vector<16x128xf32>
    %cst_45 = arith.constant 5.000000e-01 : f32
    %96 = vector.broadcast %cst_45 : f32 to vector<16x128xf32>
    %97 = arith.mulf %96, %95 : vector<16x128xf32>
    %cst_46 = arith.constant 5.000000e-01 : f32
    %98 = vector.broadcast %cst_46 : f32 to vector<16x128xf32>
    %99 = arith.addf %97, %98 : vector<16x128xf32>
    %100 = vector.extract_strided_slice %91 {offsets = [0, 128], sizes = [16, 128], strides = [1, 1]} : vector<16x512xf32> to vector<16x128xf32>
    %cst_47 = arith.constant 5.000000e-01 : f32
    %101 = vector.broadcast %cst_47 : f32 to vector<16x128xf32>
    %102 = arith.mulf %101, %100 : vector<16x128xf32>
    %103 = math.tanh %102 : vector<16x128xf32>
    %cst_48 = arith.constant 5.000000e-01 : f32
    %104 = vector.broadcast %cst_48 : f32 to vector<16x128xf32>
    %105 = arith.mulf %104, %103 : vector<16x128xf32>
    %cst_49 = arith.constant 5.000000e-01 : f32
    %106 = vector.broadcast %cst_49 : f32 to vector<16x128xf32>
    %107 = arith.addf %105, %106 : vector<16x128xf32>
    %108 = vector.extract_strided_slice %91 {offsets = [0, 256], sizes = [16, 128], strides = [1, 1]} : vector<16x512xf32> to vector<16x128xf32>
    %109 = math.tanh %108 : vector<16x128xf32>
    %110 = vector.extract_strided_slice %91 {offsets = [0, 384], sizes = [16, 128], strides = [1, 1]} : vector<16x512xf32> to vector<16x128xf32>
    %cst_50 = arith.constant 5.000000e-01 : f32
    %111 = vector.broadcast %cst_50 : f32 to vector<16x128xf32>
    %112 = arith.mulf %111, %110 : vector<16x128xf32>
    %113 = math.tanh %112 : vector<16x128xf32>
    %cst_51 = arith.constant 5.000000e-01 : f32
    %114 = vector.broadcast %cst_51 : f32 to vector<16x128xf32>
    %115 = arith.mulf %114, %113 : vector<16x128xf32>
    %cst_52 = arith.constant 5.000000e-01 : f32
    %116 = vector.broadcast %cst_52 : f32 to vector<16x128xf32>
    %117 = arith.addf %115, %116 : vector<16x128xf32>
    %118 = arith.mulf %107, %83 : vector<16x128xf32>
    %119 = arith.mulf %99, %109 : vector<16x128xf32>
    %120 = arith.addf %118, %119 : vector<16x128xf32>
    %121 = math.tanh %120 : vector<16x128xf32>
    %122 = arith.mulf %117, %121 : vector<16x128xf32>
    %123 = arith.truncf %122 : vector<16x128xf32> to vector<16x128xbf16>
    %c32_53 = arith.constant 32 : index
    %c0_54 = arith.constant 0 : index
    %124 = vector.load %arg16[%c32_53, %c0_54] : memref<128x128xbf16, #tpu.memory_space<vmem>>, vector<16x128xbf16>
    tpu.vector_store %arg16[%c32_53, %c0_54], %123 {strides = array<i32>} : memref<128x128xbf16, #tpu.memory_space<vmem>>, vector<16x128xbf16>,
    %c48 = arith.constant 48 : index
    %c0_55 = arith.constant 0 : index
    %125 = vector.load %arg17[%c48, %c0_55] : memref<128x512xf32, #tpu.memory_space<vmem>>, vector<16x512xf32>
    %126 = arith.truncf %122 : vector<16x128xf32> to vector<16x128xbf16>
    %cst_56 = arith.constant dense<0.000000e+00> : vector<16x512xf32>
    %127 = tpu.matmul %126, %11, %cst_56 {dimension_numbers = #tpu.dot_dimension_numbers<[1], [0], [0], [1], [0, 0, 1, 1], [], []>} : vector<16x128xbf16>, vector<128x512xbf16>, vector<16x512xf32> -> vector<16x512xf32>
    %128 = arith.addf %125, %127 : vector<16x512xf32>
    %129 = vector.extract_strided_slice %128 {offsets = [0, 0], sizes = [16, 128], strides = [1, 1]} : vector<16x512xf32> to vector<16x128xf32>
    %cst_57 = arith.constant 5.000000e-01 : f32
    %130 = vector.broadcast %cst_57 : f32 to vector<16x128xf32>
    %131 = arith.mulf %130, %129 : vector<16x128xf32>
    %132 = math.tanh %131 : vector<16x128xf32>
    %cst_58 = arith.constant 5.000000e-01 : f32
    %133 = vector.broadcast %cst_58 : f32 to vector<16x128xf32>
    %134 = arith.mulf %133, %132 : vector<16x128xf32>
    %cst_59 = arith.constant 5.000000e-01 : f32
    %135 = vector.broadcast %cst_59 : f32 to vector<16x128xf32>
    %136 = arith.addf %134, %135 : vector<16x128xf32>
    %137 = vector.extract_strided_slice %128 {offsets = [0, 128], sizes = [16, 128], strides = [1, 1]} : vector<16x512xf32> to vector<16x128xf32>
    %cst_60 = arith.constant 5.000000e-01 : f32
    %138 = vector.broadcast %cst_60 : f32 to vector<16x128xf32>
    %139 = arith.mulf %138, %137 : vector<16x128xf32>
    %140 = math.tanh %139 : vector<16x128xf32>
    %cst_61 = arith.constant 5.000000e-01 : f32
    %141 = vector.broadcast %cst_61 : f32 to vector<16x128xf32>
    %142 = arith.mulf %141, %140 : vector<16x128xf32>
    %cst_62 = arith.constant 5.000000e-01 : f32
    %143 = vector.broadcast %cst_62 : f32 to vector<16x128xf32>
    %144 = arith.addf %142, %143 : vector<16x128xf32>
    %145 = vector.extract_strided_slice %128 {offsets = [0, 256], sizes = [16, 128], strides = [1, 1]} : vector<16x512xf32> to vector<16x128xf32>
    %146 = math.tanh %145 : vector<16x128xf32>
    %147 = vector.extract_strided_slice %128 {offsets = [0, 384], sizes = [16, 128], strides = [1, 1]} : vector<16x512xf32> to vector<16x128xf32>
    %cst_63 = arith.constant 5.000000e-01 : f32
    %148 = vector.broadcast %cst_63 : f32 to vector<16x128xf32>
    %149 = arith.mulf %148, %147 : vector<16x128xf32>
    %150 = math.tanh %149 : vector<16x128xf32>
    %cst_64 = arith.constant 5.000000e-01 : f32
    %151 = vector.broadcast %cst_64 : f32 to vector<16x128xf32>
    %152 = arith.mulf %151, %150 : vector<16x128xf32>
    %cst_65 = arith.constant 5.000000e-01 : f32
    %153 = vector.broadcast %cst_65 : f32 to vector<16x128xf32>
    %154 = arith.addf %152, %153 : vector<16x128xf32>
    %155 = arith.mulf %144, %120 : vector<16x128xf32>
    %156 = arith.mulf %136, %146 : vector<16x128xf32>
    %157 = arith.addf %155, %156 : vector<16x128xf32>
    %158 = math.tanh %157 : vector<16x128xf32>
    %159 = arith.mulf %154, %158 : vector<16x128xf32>
    %160 = arith.truncf %159 : vector<16x128xf32> to vector<16x128xbf16>
    %c48_66 = arith.constant 48 : index
    %c0_67 = arith.constant 0 : index
    %161 = vector.load %arg16[%c48_66, %c0_67] : memref<128x128xbf16, #tpu.memory_space<vmem>>, vector<16x128xbf16>
    tpu.vector_store %arg16[%c48_66, %c0_67], %160 {strides = array<i32>} : memref<128x128xbf16, #tpu.memory_space<vmem>>, vector<16x128xbf16>,
    %c64 = arith.constant 64 : index
    %c0_68 = arith.constant 0 : index
    %162 = vector.load %arg17[%c64, %c0_68] : memref<128x512xf32, #tpu.memory_space<vmem>>, vector<16x512xf32>
    %163 = arith.truncf %159 : vector<16x128xf32> to vector<16x128xbf16>
    %cst_69 = arith.constant dense<0.000000e+00> : vector<16x512xf32>
    %164 = tpu.matmul %163, %11, %cst_69 {dimension_numbers = #tpu.dot_dimension_numbers<[1], [0], [0], [1], [0, 0, 1, 1], [], []>} : vector<16x128xbf16>, vector<128x512xbf16>, vector<16x512xf32> -> vector<16x512xf32>
    %165 = arith.addf %162, %164 : vector<16x512xf32>
    %166 = vector.extract_strided_slice %165 {offsets = [0, 0], sizes = [16, 128], strides = [1, 1]} : vector<16x512xf32> to vector<16x128xf32>
    %cst_70 = arith.constant 5.000000e-01 : f32
    %167 = vector.broadcast %cst_70 : f32 to vector<16x128xf32>
    %168 = arith.mulf %167, %166 : vector<16x128xf32>
    %169 = math.tanh %168 : vector<16x128xf32>
    %cst_71 = arith.constant 5.000000e-01 : f32
    %170 = vector.broadcast %cst_71 : f32 to vector<16x128xf32>
    %171 = arith.mulf %170, %169 : vector<16x128xf32>
    %cst_72 = arith.constant 5.000000e-01 : f32
    %172 = vector.broadcast %cst_72 : f32 to vector<16x128xf32>
    %173 = arith.addf %171, %172 : vector<16x128xf32>
    %174 = vector.extract_strided_slice %165 {offsets = [0, 128], sizes = [16, 128], strides = [1, 1]} : vector<16x512xf32> to vector<16x128xf32>
    %cst_73 = arith.constant 5.000000e-01 : f32
    %175 = vector.broadcast %cst_73 : f32 to vector<16x128xf32>
    %176 = arith.mulf %175, %174 : vector<16x128xf32>
    %177 = math.tanh %176 : vector<16x128xf32>
    %cst_74 = arith.constant 5.000000e-01 : f32
    %178 = vector.broadcast %cst_74 : f32 to vector<16x128xf32>
    %179 = arith.mulf %178, %177 : vector<16x128xf32>
    %cst_75 = arith.constant 5.000000e-01 : f32
    %180 = vector.broadcast %cst_75 : f32 to vector<16x128xf32>
    %181 = arith.addf %179, %180 : vector<16x128xf32>
    %182 = vector.extract_strided_slice %165 {offsets = [0, 256], sizes = [16, 128], strides = [1, 1]} : vector<16x512xf32> to vector<16x128xf32>
    %183 = math.tanh %182 : vector<16x128xf32>
    %184 = vector.extract_strided_slice %165 {offsets = [0, 384], sizes = [16, 128], strides = [1, 1]} : vector<16x512xf32> to vector<16x128xf32>
    %cst_76 = arith.constant 5.000000e-01 : f32
    %185 = vector.broadcast %cst_76 : f32 to vector<16x128xf32>
    %186 = arith.mulf %185, %184 : vector<16x128xf32>
    %187 = math.tanh %186 : vector<16x128xf32>
    %cst_77 = arith.constant 5.000000e-01 : f32
    %188 = vector.broadcast %cst_77 : f32 to vector<16x128xf32>
    %189 = arith.mulf %188, %187 : vector<16x128xf32>
    %cst_78 = arith.constant 5.000000e-01 : f32
    %190 = vector.broadcast %cst_78 : f32 to vector<16x128xf32>
    %191 = arith.addf %189, %190 : vector<16x128xf32>
    %192 = arith.mulf %181, %157 : vector<16x128xf32>
    %193 = arith.mulf %173, %183 : vector<16x128xf32>
    %194 = arith.addf %192, %193 : vector<16x128xf32>
    %195 = math.tanh %194 : vector<16x128xf32>
    %196 = arith.mulf %191, %195 : vector<16x128xf32>
    %197 = arith.truncf %196 : vector<16x128xf32> to vector<16x128xbf16>
    %c64_79 = arith.constant 64 : index
    %c0_80 = arith.constant 0 : index
    %198 = vector.load %arg16[%c64_79, %c0_80] : memref<128x128xbf16, #tpu.memory_space<vmem>>, vector<16x128xbf16>
    tpu.vector_store %arg16[%c64_79, %c0_80], %197 {strides = array<i32>} : memref<128x128xbf16, #tpu.memory_space<vmem>>, vector<16x128xbf16>,
    %c80 = arith.constant 80 : index
    %c0_81 = arith.constant 0 : index
    %199 = vector.load %arg17[%c80, %c0_81] : memref<128x512xf32, #tpu.memory_space<vmem>>, vector<16x512xf32>
    %200 = arith.truncf %196 : vector<16x128xf32> to vector<16x128xbf16>
    %cst_82 = arith.constant dense<0.000000e+00> : vector<16x512xf32>
    %201 = tpu.matmul %200, %11, %cst_82 {dimension_numbers = #tpu.dot_dimension_numbers<[1], [0], [0], [1], [0, 0, 1, 1], [], []>} : vector<16x128xbf16>, vector<128x512xbf16>, vector<16x512xf32> -> vector<16x512xf32>
    %202 = arith.addf %199, %201 : vector<16x512xf32>
    %203 = vector.extract_strided_slice %202 {offsets = [0, 0], sizes = [16, 128], strides = [1, 1]} : vector<16x512xf32> to vector<16x128xf32>
    %cst_83 = arith.constant 5.000000e-01 : f32
    %204 = vector.broadcast %cst_83 : f32 to vector<16x128xf32>
    %205 = arith.mulf %204, %203 : vector<16x128xf32>
    %206 = math.tanh %205 : vector<16x128xf32>
    %cst_84 = arith.constant 5.000000e-01 : f32
    %207 = vector.broadcast %cst_84 : f32 to vector<16x128xf32>
    %208 = arith.mulf %207, %206 : vector<16x128xf32>
    %cst_85 = arith.constant 5.000000e-01 : f32
    %209 = vector.broadcast %cst_85 : f32 to vector<16x128xf32>
    %210 = arith.addf %208, %209 : vector<16x128xf32>
    %211 = vector.extract_strided_slice %202 {offsets = [0, 128], sizes = [16, 128], strides = [1, 1]} : vector<16x512xf32> to vector<16x128xf32>
    %cst_86 = arith.constant 5.000000e-01 : f32
    %212 = vector.broadcast %cst_86 : f32 to vector<16x128xf32>
    %213 = arith.mulf %212, %211 : vector<16x128xf32>
    %214 = math.tanh %213 : vector<16x128xf32>
    %cst_87 = arith.constant 5.000000e-01 : f32
    %215 = vector.broadcast %cst_87 : f32 to vector<16x128xf32>
    %216 = arith.mulf %215, %214 : vector<16x128xf32>
    %cst_88 = arith.constant 5.000000e-01 : f32
    %217 = vector.broadcast %cst_88 : f32 to vector<16x128xf32>
    %218 = arith.addf %216, %217 : vector<16x128xf32>
    %219 = vector.extract_strided_slice %202 {offsets = [0, 256], sizes = [16, 128], strides = [1, 1]} : vector<16x512xf32> to vector<16x128xf32>
    %220 = math.tanh %219 : vector<16x128xf32>
    %221 = vector.extract_strided_slice %202 {offsets = [0, 384], sizes = [16, 128], strides = [1, 1]} : vector<16x512xf32> to vector<16x128xf32>
    %cst_89 = arith.constant 5.000000e-01 : f32
    %222 = vector.broadcast %cst_89 : f32 to vector<16x128xf32>
    %223 = arith.mulf %222, %221 : vector<16x128xf32>
    %224 = math.tanh %223 : vector<16x128xf32>
    %cst_90 = arith.constant 5.000000e-01 : f32
    %225 = vector.broadcast %cst_90 : f32 to vector<16x128xf32>
    %226 = arith.mulf %225, %224 : vector<16x128xf32>
    %cst_91 = arith.constant 5.000000e-01 : f32
    %227 = vector.broadcast %cst_91 : f32 to vector<16x128xf32>
    %228 = arith.addf %226, %227 : vector<16x128xf32>
    %229 = arith.mulf %218, %194 : vector<16x128xf32>
    %230 = arith.mulf %210, %220 : vector<16x128xf32>
    %231 = arith.addf %229, %230 : vector<16x128xf32>
    %232 = math.tanh %231 : vector<16x128xf32>
    %233 = arith.mulf %228, %232 : vector<16x128xf32>
    %234 = arith.truncf %233 : vector<16x128xf32> to vector<16x128xbf16>
    %c80_92 = arith.constant 80 : index
    %c0_93 = arith.constant 0 : index
    %235 = vector.load %arg16[%c80_92, %c0_93] : memref<128x128xbf16, #tpu.memory_space<vmem>>, vector<16x128xbf16>
    tpu.vector_store %arg16[%c80_92, %c0_93], %234 {strides = array<i32>} : memref<128x128xbf16, #tpu.memory_space<vmem>>, vector<16x128xbf16>,
    %c96 = arith.constant 96 : index
    %c0_94 = arith.constant 0 : index
    %236 = vector.load %arg17[%c96, %c0_94] : memref<128x512xf32, #tpu.memory_space<vmem>>, vector<16x512xf32>
    %237 = arith.truncf %233 : vector<16x128xf32> to vector<16x128xbf16>
    %cst_95 = arith.constant dense<0.000000e+00> : vector<16x512xf32>
    %238 = tpu.matmul %237, %11, %cst_95 {dimension_numbers = #tpu.dot_dimension_numbers<[1], [0], [0], [1], [0, 0, 1, 1], [], []>} : vector<16x128xbf16>, vector<128x512xbf16>, vector<16x512xf32> -> vector<16x512xf32>
    %239 = arith.addf %236, %238 : vector<16x512xf32>
    %240 = vector.extract_strided_slice %239 {offsets = [0, 0], sizes = [16, 128], strides = [1, 1]} : vector<16x512xf32> to vector<16x128xf32>
    %cst_96 = arith.constant 5.000000e-01 : f32
    %241 = vector.broadcast %cst_96 : f32 to vector<16x128xf32>
    %242 = arith.mulf %241, %240 : vector<16x128xf32>
    %243 = math.tanh %242 : vector<16x128xf32>
    %cst_97 = arith.constant 5.000000e-01 : f32
    %244 = vector.broadcast %cst_97 : f32 to vector<16x128xf32>
    %245 = arith.mulf %244, %243 : vector<16x128xf32>
    %cst_98 = arith.constant 5.000000e-01 : f32
    %246 = vector.broadcast %cst_98 : f32 to vector<16x128xf32>
    %247 = arith.addf %245, %246 : vector<16x128xf32>
    %248 = vector.extract_strided_slice %239 {offsets = [0, 128], sizes = [16, 128], strides = [1, 1]} : vector<16x512xf32> to vector<16x128xf32>
    %cst_99 = arith.constant 5.000000e-01 : f32
    %249 = vector.broadcast %cst_99 : f32 to vector<16x128xf32>
    %250 = arith.mulf %249, %248 : vector<16x128xf32>
    %251 = math.tanh %250 : vector<16x128xf32>
    %cst_100 = arith.constant 5.000000e-01 : f32
    %252 = vector.broadcast %cst_100 : f32 to vector<16x128xf32>
    %253 = arith.mulf %252, %251 : vector<16x128xf32>
    %cst_101 = arith.constant 5.000000e-01 : f32
    %254 = vector.broadcast %cst_101 : f32 to vector<16x128xf32>
    %255 = arith.addf %253, %254 : vector<16x128xf32>
    %256 = vector.extract_strided_slice %239 {offsets = [0, 256], sizes = [16, 128], strides = [1, 1]} : vector<16x512xf32> to vector<16x128xf32>
    %257 = math.tanh %256 : vector<16x128xf32>
    %258 = vector.extract_strided_slice %239 {offsets = [0, 384], sizes = [16, 128], strides = [1, 1]} : vector<16x512xf32> to vector<16x128xf32>
    %cst_102 = arith.constant 5.000000e-01 : f32
    %259 = vector.broadcast %cst_102 : f32 to vector<16x128xf32>
    %260 = arith.mulf %259, %258 : vector<16x128xf32>
    %261 = math.tanh %260 : vector<16x128xf32>
    %cst_103 = arith.constant 5.000000e-01 : f32
    %262 = vector.broadcast %cst_103 : f32 to vector<16x128xf32>
    %263 = arith.mulf %262, %261 : vector<16x128xf32>
    %cst_104 = arith.constant 5.000000e-01 : f32
    %264 = vector.broadcast %cst_104 : f32 to vector<16x128xf32>
    %265 = arith.addf %263, %264 : vector<16x128xf32>
    %266 = arith.mulf %255, %231 : vector<16x128xf32>
    %267 = arith.mulf %247, %257 : vector<16x128xf32>
    %268 = arith.addf %266, %267 : vector<16x128xf32>
    %269 = math.tanh %268 : vector<16x128xf32>
    %270 = arith.mulf %265, %269 : vector<16x128xf32>
    %271 = arith.truncf %270 : vector<16x128xf32> to vector<16x128xbf16>
    %c96_105 = arith.constant 96 : index
    %c0_106 = arith.constant 0 : index
    %272 = vector.load %arg16[%c96_105, %c0_106] : memref<128x128xbf16, #tpu.memory_space<vmem>>, vector<16x128xbf16>
    tpu.vector_store %arg16[%c96_105, %c0_106], %271 {strides = array<i32>} : memref<128x128xbf16, #tpu.memory_space<vmem>>, vector<16x128xbf16>,
    %c112 = arith.constant 112 : index
    %c0_107 = arith.constant 0 : index
    %273 = vector.load %arg17[%c112, %c0_107] : memref<128x512xf32, #tpu.memory_space<vmem>>, vector<16x512xf32>
    %274 = arith.truncf %270 : vector<16x128xf32> to vector<16x128xbf16>
    %cst_108 = arith.constant dense<0.000000e+00> : vector<16x512xf32>
    %275 = tpu.matmul %274, %11, %cst_108 {dimension_numbers = #tpu.dot_dimension_numbers<[1], [0], [0], [1], [0, 0, 1, 1], [], []>} : vector<16x128xbf16>, vector<128x512xbf16>, vector<16x512xf32> -> vector<16x512xf32>
    %276 = arith.addf %273, %275 : vector<16x512xf32>
    %277 = vector.extract_strided_slice %276 {offsets = [0, 0], sizes = [16, 128], strides = [1, 1]} : vector<16x512xf32> to vector<16x128xf32>
    %cst_109 = arith.constant 5.000000e-01 : f32
    %278 = vector.broadcast %cst_109 : f32 to vector<16x128xf32>
    %279 = arith.mulf %278, %277 : vector<16x128xf32>
    %280 = math.tanh %279 : vector<16x128xf32>
    %cst_110 = arith.constant 5.000000e-01 : f32
    %281 = vector.broadcast %cst_110 : f32 to vector<16x128xf32>
    %282 = arith.mulf %281, %280 : vector<16x128xf32>
    %cst_111 = arith.constant 5.000000e-01 : f32
    %283 = vector.broadcast %cst_111 : f32 to vector<16x128xf32>
    %284 = arith.addf %282, %283 : vector<16x128xf32>
    %285 = vector.extract_strided_slice %276 {offsets = [0, 128], sizes = [16, 128], strides = [1, 1]} : vector<16x512xf32> to vector<16x128xf32>
    %cst_112 = arith.constant 5.000000e-01 : f32
    %286 = vector.broadcast %cst_112 : f32 to vector<16x128xf32>
    %287 = arith.mulf %286, %285 : vector<16x128xf32>
    %288 = math.tanh %287 : vector<16x128xf32>
    %cst_113 = arith.constant 5.000000e-01 : f32
    %289 = vector.broadcast %cst_113 : f32 to vector<16x128xf32>
    %290 = arith.mulf %289, %288 : vector<16x128xf32>
    %cst_114 = arith.constant 5.000000e-01 : f32
    %291 = vector.broadcast %cst_114 : f32 to vector<16x128xf32>
    %292 = arith.addf %290, %291 : vector<16x128xf32>
    %293 = vector.extract_strided_slice %276 {offsets = [0, 256], sizes = [16, 128], strides = [1, 1]} : vector<16x512xf32> to vector<16x128xf32>
    %294 = math.tanh %293 : vector<16x128xf32>
    %295 = vector.extract_strided_slice %276 {offsets = [0, 384], sizes = [16, 128], strides = [1, 1]} : vector<16x512xf32> to vector<16x128xf32>
    %cst_115 = arith.constant 5.000000e-01 : f32
    %296 = vector.broadcast %cst_115 : f32 to vector<16x128xf32>
    %297 = arith.mulf %296, %295 : vector<16x128xf32>
    %298 = math.tanh %297 : vector<16x128xf32>
    %cst_116 = arith.constant 5.000000e-01 : f32
    %299 = vector.broadcast %cst_116 : f32 to vector<16x128xf32>
    %300 = arith.mulf %299, %298 : vector<16x128xf32>
    %cst_117 = arith.constant 5.000000e-01 : f32
    %301 = vector.broadcast %cst_117 : f32 to vector<16x128xf32>
    %302 = arith.addf %300, %301 : vector<16x128xf32>
    %303 = arith.mulf %292, %268 : vector<16x128xf32>
    %304 = arith.mulf %284, %294 : vector<16x128xf32>
    %305 = arith.addf %303, %304 : vector<16x128xf32>
    %306 = math.tanh %305 : vector<16x128xf32>
    %307 = arith.mulf %302, %306 : vector<16x128xf32>
    %308 = arith.truncf %307 : vector<16x128xf32> to vector<16x128xbf16>
    %c112_118 = arith.constant 112 : index
    %c0_119 = arith.constant 0 : index
    %309 = vector.load %arg16[%c112_118, %c0_119] : memref<128x128xbf16, #tpu.memory_space<vmem>>, vector<16x128xbf16>
    tpu.vector_store %arg16[%c112_118, %c0_119], %308 {strides = array<i32>} : memref<128x128xbf16, #tpu.memory_space<vmem>>, vector<16x128xbf16>,
    %c0_120 = arith.constant 0 : index
    %c0_121 = arith.constant 0 : index
    %310 = vector.load %arg12[%c0_120, %c0_121] : memref<16x128xf32, #tpu.memory_space<vmem>>, vector<16x128xf32>
    tpu.vector_store %arg12[%c0_120, %c0_121], %307 {strides = array<i32>} : memref<16x128xf32, #tpu.memory_space<vmem>>, vector<16x128xf32>,
    %c0_122 = arith.constant 0 : index
    %c0_123 = arith.constant 0 : index
    %311 = vector.load %arg13[%c0_122, %c0_123] : memref<16x128xf32, #tpu.memory_space<vmem>>, vector<16x128xf32>
    tpu.vector_store %arg13[%c0_122, %c0_123], %305 {strides = array<i32>} : memref<16x128xf32, #tpu.memory_space<vmem>>, vector<16x128xf32>,
    %c0_124 = arith.constant 0 : index
    %c0_125 = arith.constant 0 : index
    %312 = vector.load %arg16[%c0_124, %c0_125] : memref<128x128xbf16, #tpu.memory_space<vmem>>, vector<128x128xbf16>
    %c0_126 = arith.constant 0 : index
    %c0_127 = arith.constant 0 : index
    %313 = vector.load %arg6[%c0_126, %c0_127] : memref<128x512xbf16, #tpu.memory_space<vmem>>, vector<128x512xbf16>
    %cst_128 = arith.constant dense<0.000000e+00> : vector<128x512xf32>
    %314 = tpu.matmul %312, %313, %cst_128 {dimension_numbers = #tpu.dot_dimension_numbers<[1], [0], [0], [1], [0, 0, 1, 1], [], []>} : vector<128x128xbf16>, vector<128x512xbf16>, vector<128x512xf32> -> vector<128x512xf32>
    %c0_129 = arith.constant 0 : index
    %c0_130 = arith.constant 0 : index
    %315 = vector.load %arg8[%c0_129, %c0_130] : memref<1x512xf32, #tpu.memory_space<vmem>>, vector<1x512xf32>
    %316 = vector.broadcast %315 : vector<1x512xf32> to vector<128x512xf32>
    %317 = arith.addf %314, %316 : vector<128x512xf32>
    %c0_131 = arith.constant 0 : index
    %c0_132 = arith.constant 0 : index
    %318 = vector.load %arg17[%c0_131, %c0_132] : memref<128x512xf32, #tpu.memory_space<vmem>>, vector<128x512xf32>
    tpu.vector_store %arg17[%c0_131, %c0_132], %317 {strides = array<i32>} : memref<128x512xf32, #tpu.memory_space<vmem>>, vector<128x512xf32>,
    %c0_133 = arith.constant 0 : index
    %c0_134 = arith.constant 0 : index
    %319 = vector.load %arg7[%c0_133, %c0_134] : memref<128x512xbf16, #tpu.memory_space<vmem>>, vector<128x512xbf16>
    %c0_135 = arith.constant 0 : index
    %c0_136 = arith.constant 0 : index
    %320 = vector.load %arg14[%c0_135, %c0_136] : memref<16x128xf32, #tpu.memory_space<vmem>>, vector<16x128xf32>
    %c0_137 = arith.constant 0 : index
    %c0_138 = arith.constant 0 : index
    %321 = vector.load %arg15[%c0_137, %c0_138] : memref<16x128xf32, #tpu.memory_space<vmem>>, vector<16x128xf32>
    %c0_139 = arith.constant 0 : index
    %c0_140 = arith.constant 0 : index
    %322 = vector.load %arg17[%c0_139, %c0_140] : memref<128x512xf32, #tpu.memory_space<vmem>>, vector<16x512xf32>
    %323 = arith.truncf %320 : vector<16x128xf32> to vector<16x128xbf16>
    %cst_141 = arith.constant dense<0.000000e+00> : vector<16x512xf32>
    %324 = tpu.matmul %323, %319, %cst_141 {dimension_numbers = #tpu.dot_dimension_numbers<[1], [0], [0], [1], [0, 0, 1, 1], [], []>} : vector<16x128xbf16>, vector<128x512xbf16>, vector<16x512xf32> -> vector<16x512xf32>
    %325 = arith.addf %322, %324 : vector<16x512xf32>
    %326 = vector.extract_strided_slice %325 {offsets = [0, 0], sizes = [16, 128], strides = [1, 1]} : vector<16x512xf32> to vector<16x128xf32>
    %cst_142 = arith.constant 5.000000e-01 : f32
    %327 = vector.broadcast %cst_142 : f32 to vector<16x128xf32>
    %328 = arith.mulf %327, %326 : vector<16x128xf32>
    %329 = math.tanh %328 : vector<16x128xf32>
    %cst_143 = arith.constant 5.000000e-01 : f32
    %330 = vector.broadcast %cst_143 : f32 to vector<16x128xf32>
    %331 = arith.mulf %330, %329 : vector<16x128xf32>
    %cst_144 = arith.constant 5.000000e-01 : f32
    %332 = vector.broadcast %cst_144 : f32 to vector<16x128xf32>
    %333 = arith.addf %331, %332 : vector<16x128xf32>
    %334 = vector.extract_strided_slice %325 {offsets = [0, 128], sizes = [16, 128], strides = [1, 1]} : vector<16x512xf32> to vector<16x128xf32>
    %cst_145 = arith.constant 5.000000e-01 : f32
    %335 = vector.broadcast %cst_145 : f32 to vector<16x128xf32>
    %336 = arith.mulf %335, %334 : vector<16x128xf32>
    %337 = math.tanh %336 : vector<16x128xf32>
    %cst_146 = arith.constant 5.000000e-01 : f32
    %338 = vector.broadcast %cst_146 : f32 to vector<16x128xf32>
    %339 = arith.mulf %338, %337 : vector<16x128xf32>
    %cst_147 = arith.constant 5.000000e-01 : f32
    %340 = vector.broadcast %cst_147 : f32 to vector<16x128xf32>
    %341 = arith.addf %339, %340 : vector<16x128xf32>
    %342 = vector.extract_strided_slice %325 {offsets = [0, 256], sizes = [16, 128], strides = [1, 1]} : vector<16x512xf32> to vector<16x128xf32>
    %343 = math.tanh %342 : vector<16x128xf32>
    %344 = vector.extract_strided_slice %325 {offsets = [0, 384], sizes = [16, 128], strides = [1, 1]} : vector<16x512xf32> to vector<16x128xf32>
    %cst_148 = arith.constant 5.000000e-01 : f32
    %345 = vector.broadcast %cst_148 : f32 to vector<16x128xf32>
    %346 = arith.mulf %345, %344 : vector<16x128xf32>
    %347 = math.tanh %346 : vector<16x128xf32>
    %cst_149 = arith.constant 5.000000e-01 : f32
    %348 = vector.broadcast %cst_149 : f32 to vector<16x128xf32>
    %349 = arith.mulf %348, %347 : vector<16x128xf32>
    %cst_150 = arith.constant 5.000000e-01 : f32
    %350 = vector.broadcast %cst_150 : f32 to vector<16x128xf32>
    %351 = arith.addf %349, %350 : vector<16x128xf32>
    %352 = arith.mulf %341, %321 : vector<16x128xf32>
    %353 = arith.mulf %333, %343 : vector<16x128xf32>
    %354 = arith.addf %352, %353 : vector<16x128xf32>
    %355 = math.tanh %354 : vector<16x128xf32>
    %356 = arith.mulf %351, %355 : vector<16x128xf32>
    %c16_151 = arith.constant 16 : index
    %c0_152 = arith.constant 0 : index
    %357 = vector.load %arg17[%c16_151, %c0_152] : memref<128x512xf32, #tpu.memory_space<vmem>>, vector<16x512xf32>
    %358 = arith.truncf %356 : vector<16x128xf32> to vector<16x128xbf16>
    %cst_153 = arith.constant dense<0.000000e+00> : vector<16x512xf32>
    %359 = tpu.matmul %358, %319, %cst_153 {dimension_numbers = #tpu.dot_dimension_numbers<[1], [0], [0], [1], [0, 0, 1, 1], [], []>} : vector<16x128xbf16>, vector<128x512xbf16>, vector<16x512xf32> -> vector<16x512xf32>
    %360 = arith.addf %357, %359 : vector<16x512xf32>
    %361 = vector.extract_strided_slice %360 {offsets = [0, 0], sizes = [16, 128], strides = [1, 1]} : vector<16x512xf32> to vector<16x128xf32>
    %cst_154 = arith.constant 5.000000e-01 : f32
    %362 = vector.broadcast %cst_154 : f32 to vector<16x128xf32>
    %363 = arith.mulf %362, %361 : vector<16x128xf32>
    %364 = math.tanh %363 : vector<16x128xf32>
    %cst_155 = arith.constant 5.000000e-01 : f32
    %365 = vector.broadcast %cst_155 : f32 to vector<16x128xf32>
    %366 = arith.mulf %365, %364 : vector<16x128xf32>
    %cst_156 = arith.constant 5.000000e-01 : f32
    %367 = vector.broadcast %cst_156 : f32 to vector<16x128xf32>
    %368 = arith.addf %366, %367 : vector<16x128xf32>
    %369 = vector.extract_strided_slice %360 {offsets = [0, 128], sizes = [16, 128], strides = [1, 1]} : vector<16x512xf32> to vector<16x128xf32>
    %cst_157 = arith.constant 5.000000e-01 : f32
    %370 = vector.broadcast %cst_157 : f32 to vector<16x128xf32>
    %371 = arith.mulf %370, %369 : vector<16x128xf32>
    %372 = math.tanh %371 : vector<16x128xf32>
    %cst_158 = arith.constant 5.000000e-01 : f32
    %373 = vector.broadcast %cst_158 : f32 to vector<16x128xf32>
    %374 = arith.mulf %373, %372 : vector<16x128xf32>
    %cst_159 = arith.constant 5.000000e-01 : f32
    %375 = vector.broadcast %cst_159 : f32 to vector<16x128xf32>
    %376 = arith.addf %374, %375 : vector<16x128xf32>
    %377 = vector.extract_strided_slice %360 {offsets = [0, 256], sizes = [16, 128], strides = [1, 1]} : vector<16x512xf32> to vector<16x128xf32>
    %378 = math.tanh %377 : vector<16x128xf32>
    %379 = vector.extract_strided_slice %360 {offsets = [0, 384], sizes = [16, 128], strides = [1, 1]} : vector<16x512xf32> to vector<16x128xf32>
    %cst_160 = arith.constant 5.000000e-01 : f32
    %380 = vector.broadcast %cst_160 : f32 to vector<16x128xf32>
    %381 = arith.mulf %380, %379 : vector<16x128xf32>
    %382 = math.tanh %381 : vector<16x128xf32>
    %cst_161 = arith.constant 5.000000e-01 : f32
    %383 = vector.broadcast %cst_161 : f32 to vector<16x128xf32>
    %384 = arith.mulf %383, %382 : vector<16x128xf32>
    %cst_162 = arith.constant 5.000000e-01 : f32
    %385 = vector.broadcast %cst_162 : f32 to vector<16x128xf32>
    %386 = arith.addf %384, %385 : vector<16x128xf32>
    %387 = arith.mulf %376, %354 : vector<16x128xf32>
    %388 = arith.mulf %368, %378 : vector<16x128xf32>
    %389 = arith.addf %387, %388 : vector<16x128xf32>
    %390 = math.tanh %389 : vector<16x128xf32>
    %391 = arith.mulf %386, %390 : vector<16x128xf32>
    %c32_163 = arith.constant 32 : index
    %c0_164 = arith.constant 0 : index
    %392 = vector.load %arg17[%c32_163, %c0_164] : memref<128x512xf32, #tpu.memory_space<vmem>>, vector<16x512xf32>
    %393 = arith.truncf %391 : vector<16x128xf32> to vector<16x128xbf16>
    %cst_165 = arith.constant dense<0.000000e+00> : vector<16x512xf32>
    %394 = tpu.matmul %393, %319, %cst_165 {dimension_numbers = #tpu.dot_dimension_numbers<[1], [0], [0], [1], [0, 0, 1, 1], [], []>} : vector<16x128xbf16>, vector<128x512xbf16>, vector<16x512xf32> -> vector<16x512xf32>
    %395 = arith.addf %392, %394 : vector<16x512xf32>
    %396 = vector.extract_strided_slice %395 {offsets = [0, 0], sizes = [16, 128], strides = [1, 1]} : vector<16x512xf32> to vector<16x128xf32>
    %cst_166 = arith.constant 5.000000e-01 : f32
    %397 = vector.broadcast %cst_166 : f32 to vector<16x128xf32>
    %398 = arith.mulf %397, %396 : vector<16x128xf32>
    %399 = math.tanh %398 : vector<16x128xf32>
    %cst_167 = arith.constant 5.000000e-01 : f32
    %400 = vector.broadcast %cst_167 : f32 to vector<16x128xf32>
    %401 = arith.mulf %400, %399 : vector<16x128xf32>
    %cst_168 = arith.constant 5.000000e-01 : f32
    %402 = vector.broadcast %cst_168 : f32 to vector<16x128xf32>
    %403 = arith.addf %401, %402 : vector<16x128xf32>
    %404 = vector.extract_strided_slice %395 {offsets = [0, 128], sizes = [16, 128], strides = [1, 1]} : vector<16x512xf32> to vector<16x128xf32>
    %cst_169 = arith.constant 5.000000e-01 : f32
    %405 = vector.broadcast %cst_169 : f32 to vector<16x128xf32>
    %406 = arith.mulf %405, %404 : vector<16x128xf32>
    %407 = math.tanh %406 : vector<16x128xf32>
    %cst_170 = arith.constant 5.000000e-01 : f32
    %408 = vector.broadcast %cst_170 : f32 to vector<16x128xf32>
    %409 = arith.mulf %408, %407 : vector<16x128xf32>
    %cst_171 = arith.constant 5.000000e-01 : f32
    %410 = vector.broadcast %cst_171 : f32 to vector<16x128xf32>
    %411 = arith.addf %409, %410 : vector<16x128xf32>
    %412 = vector.extract_strided_slice %395 {offsets = [0, 256], sizes = [16, 128], strides = [1, 1]} : vector<16x512xf32> to vector<16x128xf32>
    %413 = math.tanh %412 : vector<16x128xf32>
    %414 = vector.extract_strided_slice %395 {offsets = [0, 384], sizes = [16, 128], strides = [1, 1]} : vector<16x512xf32> to vector<16x128xf32>
    %cst_172 = arith.constant 5.000000e-01 : f32
    %415 = vector.broadcast %cst_172 : f32 to vector<16x128xf32>
    %416 = arith.mulf %415, %414 : vector<16x128xf32>
    %417 = math.tanh %416 : vector<16x128xf32>
    %cst_173 = arith.constant 5.000000e-01 : f32
    %418 = vector.broadcast %cst_173 : f32 to vector<16x128xf32>
    %419 = arith.mulf %418, %417 : vector<16x128xf32>
    %cst_174 = arith.constant 5.000000e-01 : f32
    %420 = vector.broadcast %cst_174 : f32 to vector<16x128xf32>
    %421 = arith.addf %419, %420 : vector<16x128xf32>
    %422 = arith.mulf %411, %389 : vector<16x128xf32>
    %423 = arith.mulf %403, %413 : vector<16x128xf32>
    %424 = arith.addf %422, %423 : vector<16x128xf32>
    %425 = math.tanh %424 : vector<16x128xf32>
    %426 = arith.mulf %421, %425 : vector<16x128xf32>
    %c48_175 = arith.constant 48 : index
    %c0_176 = arith.constant 0 : index
    %427 = vector.load %arg17[%c48_175, %c0_176] : memref<128x512xf32, #tpu.memory_space<vmem>>, vector<16x512xf32>
    %428 = arith.truncf %426 : vector<16x128xf32> to vector<16x128xbf16>
    %cst_177 = arith.constant dense<0.000000e+00> : vector<16x512xf32>
    %429 = tpu.matmul %428, %319, %cst_177 {dimension_numbers = #tpu.dot_dimension_numbers<[1], [0], [0], [1], [0, 0, 1, 1], [], []>} : vector<16x128xbf16>, vector<128x512xbf16>, vector<16x512xf32> -> vector<16x512xf32>
    %430 = arith.addf %427, %429 : vector<16x512xf32>
    %431 = vector.extract_strided_slice %430 {offsets = [0, 0], sizes = [16, 128], strides = [1, 1]} : vector<16x512xf32> to vector<16x128xf32>
    %cst_178 = arith.constant 5.000000e-01 : f32
    %432 = vector.broadcast %cst_178 : f32 to vector<16x128xf32>
    %433 = arith.mulf %432, %431 : vector<16x128xf32>
    %434 = math.tanh %433 : vector<16x128xf32>
    %cst_179 = arith.constant 5.000000e-01 : f32
    %435 = vector.broadcast %cst_179 : f32 to vector<16x128xf32>
    %436 = arith.mulf %435, %434 : vector<16x128xf32>
    %cst_180 = arith.constant 5.000000e-01 : f32
    %437 = vector.broadcast %cst_180 : f32 to vector<16x128xf32>
    %438 = arith.addf %436, %437 : vector<16x128xf32>
    %439 = vector.extract_strided_slice %430 {offsets = [0, 128], sizes = [16, 128], strides = [1, 1]} : vector<16x512xf32> to vector<16x128xf32>
    %cst_181 = arith.constant 5.000000e-01 : f32
    %440 = vector.broadcast %cst_181 : f32 to vector<16x128xf32>
    %441 = arith.mulf %440, %439 : vector<16x128xf32>
    %442 = math.tanh %441 : vector<16x128xf32>
    %cst_182 = arith.constant 5.000000e-01 : f32
    %443 = vector.broadcast %cst_182 : f32 to vector<16x128xf32>
    %444 = arith.mulf %443, %442 : vector<16x128xf32>
    %cst_183 = arith.constant 5.000000e-01 : f32
    %445 = vector.broadcast %cst_183 : f32 to vector<16x128xf32>
    %446 = arith.addf %444, %445 : vector<16x128xf32>
    %447 = vector.extract_strided_slice %430 {offsets = [0, 256], sizes = [16, 128], strides = [1, 1]} : vector<16x512xf32> to vector<16x128xf32>
    %448 = math.tanh %447 : vector<16x128xf32>
    %449 = vector.extract_strided_slice %430 {offsets = [0, 384], sizes = [16, 128], strides = [1, 1]} : vector<16x512xf32> to vector<16x128xf32>
    %cst_184 = arith.constant 5.000000e-01 : f32
    %450 = vector.broadcast %cst_184 : f32 to vector<16x128xf32>
    %451 = arith.mulf %450, %449 : vector<16x128xf32>
    %452 = math.tanh %451 : vector<16x128xf32>
    %cst_185 = arith.constant 5.000000e-01 : f32
    %453 = vector.broadcast %cst_185 : f32 to vector<16x128xf32>
    %454 = arith.mulf %453, %452 : vector<16x128xf32>
    %cst_186 = arith.constant 5.000000e-01 : f32
    %455 = vector.broadcast %cst_186 : f32 to vector<16x128xf32>
    %456 = arith.addf %454, %455 : vector<16x128xf32>
    %457 = arith.mulf %446, %424 : vector<16x128xf32>
    %458 = arith.mulf %438, %448 : vector<16x128xf32>
    %459 = arith.addf %457, %458 : vector<16x128xf32>
    %460 = math.tanh %459 : vector<16x128xf32>
    %461 = arith.mulf %456, %460 : vector<16x128xf32>
    %c64_187 = arith.constant 64 : index
    %c0_188 = arith.constant 0 : index
    %462 = vector.load %arg17[%c64_187, %c0_188] : memref<128x512xf32, #tpu.memory_space<vmem>>, vector<16x512xf32>
    %463 = arith.truncf %461 : vector<16x128xf32> to vector<16x128xbf16>
    %cst_189 = arith.constant dense<0.000000e+00> : vector<16x512xf32>
    %464 = tpu.matmul %463, %319, %cst_189 {dimension_numbers = #tpu.dot_dimension_numbers<[1], [0], [0], [1], [0, 0, 1, 1], [], []>} : vector<16x128xbf16>, vector<128x512xbf16>, vector<16x512xf32> -> vector<16x512xf32>
    %465 = arith.addf %462, %464 : vector<16x512xf32>
    %466 = vector.extract_strided_slice %465 {offsets = [0, 0], sizes = [16, 128], strides = [1, 1]} : vector<16x512xf32> to vector<16x128xf32>
    %cst_190 = arith.constant 5.000000e-01 : f32
    %467 = vector.broadcast %cst_190 : f32 to vector<16x128xf32>
    %468 = arith.mulf %467, %466 : vector<16x128xf32>
    %469 = math.tanh %468 : vector<16x128xf32>
    %cst_191 = arith.constant 5.000000e-01 : f32
    %470 = vector.broadcast %cst_191 : f32 to vector<16x128xf32>
    %471 = arith.mulf %470, %469 : vector<16x128xf32>
    %cst_192 = arith.constant 5.000000e-01 : f32
    %472 = vector.broadcast %cst_192 : f32 to vector<16x128xf32>
    %473 = arith.addf %471, %472 : vector<16x128xf32>
    %474 = vector.extract_strided_slice %465 {offsets = [0, 128], sizes = [16, 128], strides = [1, 1]} : vector<16x512xf32> to vector<16x128xf32>
    %cst_193 = arith.constant 5.000000e-01 : f32
    %475 = vector.broadcast %cst_193 : f32 to vector<16x128xf32>
    %476 = arith.mulf %475, %474 : vector<16x128xf32>
    %477 = math.tanh %476 : vector<16x128xf32>
    %cst_194 = arith.constant 5.000000e-01 : f32
    %478 = vector.broadcast %cst_194 : f32 to vector<16x128xf32>
    %479 = arith.mulf %478, %477 : vector<16x128xf32>
    %cst_195 = arith.constant 5.000000e-01 : f32
    %480 = vector.broadcast %cst_195 : f32 to vector<16x128xf32>
    %481 = arith.addf %479, %480 : vector<16x128xf32>
    %482 = vector.extract_strided_slice %465 {offsets = [0, 256], sizes = [16, 128], strides = [1, 1]} : vector<16x512xf32> to vector<16x128xf32>
    %483 = math.tanh %482 : vector<16x128xf32>
    %484 = vector.extract_strided_slice %465 {offsets = [0, 384], sizes = [16, 128], strides = [1, 1]} : vector<16x512xf32> to vector<16x128xf32>
    %cst_196 = arith.constant 5.000000e-01 : f32
    %485 = vector.broadcast %cst_196 : f32 to vector<16x128xf32>
    %486 = arith.mulf %485, %484 : vector<16x128xf32>
    %487 = math.tanh %486 : vector<16x128xf32>
    %cst_197 = arith.constant 5.000000e-01 : f32
    %488 = vector.broadcast %cst_197 : f32 to vector<16x128xf32>
    %489 = arith.mulf %488, %487 : vector<16x128xf32>
    %cst_198 = arith.constant 5.000000e-01 : f32
    %490 = vector.broadcast %cst_198 : f32 to vector<16x128xf32>
    %491 = arith.addf %489, %490 : vector<16x128xf32>
    %492 = arith.mulf %481, %459 : vector<16x128xf32>
    %493 = arith.mulf %473, %483 : vector<16x128xf32>
    %494 = arith.addf %492, %493 : vector<16x128xf32>
    %495 = math.tanh %494 : vector<16x128xf32>
    %496 = arith.mulf %491, %495 : vector<16x128xf32>
    %c80_199 = arith.constant 80 : index
    %c0_200 = arith.constant 0 : index
    %497 = vector.load %arg17[%c80_199, %c0_200] : memref<128x512xf32, #tpu.memory_space<vmem>>, vector<16x512xf32>
    %498 = arith.truncf %496 : vector<16x128xf32> to vector<16x128xbf16>
    %cst_201 = arith.constant dense<0.000000e+00> : vector<16x512xf32>
    %499 = tpu.matmul %498, %319, %cst_201 {dimension_numbers = #tpu.dot_dimension_numbers<[1], [0], [0], [1], [0, 0, 1, 1], [], []>} : vector<16x128xbf16>, vector<128x512xbf16>, vector<16x512xf32> -> vector<16x512xf32>
    %500 = arith.addf %497, %499 : vector<16x512xf32>
    %501 = vector.extract_strided_slice %500 {offsets = [0, 0], sizes = [16, 128], strides = [1, 1]} : vector<16x512xf32> to vector<16x128xf32>
    %cst_202 = arith.constant 5.000000e-01 : f32
    %502 = vector.broadcast %cst_202 : f32 to vector<16x128xf32>
    %503 = arith.mulf %502, %501 : vector<16x128xf32>
    %504 = math.tanh %503 : vector<16x128xf32>
    %cst_203 = arith.constant 5.000000e-01 : f32
    %505 = vector.broadcast %cst_203 : f32 to vector<16x128xf32>
    %506 = arith.mulf %505, %504 : vector<16x128xf32>
    %cst_204 = arith.constant 5.000000e-01 : f32
    %507 = vector.broadcast %cst_204 : f32 to vector<16x128xf32>
    %508 = arith.addf %506, %507 : vector<16x128xf32>
    %509 = vector.extract_strided_slice %500 {offsets = [0, 128], sizes = [16, 128], strides = [1, 1]} : vector<16x512xf32> to vector<16x128xf32>
    %cst_205 = arith.constant 5.000000e-01 : f32
    %510 = vector.broadcast %cst_205 : f32 to vector<16x128xf32>
    %511 = arith.mulf %510, %509 : vector<16x128xf32>
    %512 = math.tanh %511 : vector<16x128xf32>
    %cst_206 = arith.constant 5.000000e-01 : f32
    %513 = vector.broadcast %cst_206 : f32 to vector<16x128xf32>
    %514 = arith.mulf %513, %512 : vector<16x128xf32>
    %cst_207 = arith.constant 5.000000e-01 : f32
    %515 = vector.broadcast %cst_207 : f32 to vector<16x128xf32>
    %516 = arith.addf %514, %515 : vector<16x128xf32>
    %517 = vector.extract_strided_slice %500 {offsets = [0, 256], sizes = [16, 128], strides = [1, 1]} : vector<16x512xf32> to vector<16x128xf32>
    %518 = math.tanh %517 : vector<16x128xf32>
    %519 = vector.extract_strided_slice %500 {offsets = [0, 384], sizes = [16, 128], strides = [1, 1]} : vector<16x512xf32> to vector<16x128xf32>
    %cst_208 = arith.constant 5.000000e-01 : f32
    %520 = vector.broadcast %cst_208 : f32 to vector<16x128xf32>
    %521 = arith.mulf %520, %519 : vector<16x128xf32>
    %522 = math.tanh %521 : vector<16x128xf32>
    %cst_209 = arith.constant 5.000000e-01 : f32
    %523 = vector.broadcast %cst_209 : f32 to vector<16x128xf32>
    %524 = arith.mulf %523, %522 : vector<16x128xf32>
    %cst_210 = arith.constant 5.000000e-01 : f32
    %525 = vector.broadcast %cst_210 : f32 to vector<16x128xf32>
    %526 = arith.addf %524, %525 : vector<16x128xf32>
    %527 = arith.mulf %516, %494 : vector<16x128xf32>
    %528 = arith.mulf %508, %518 : vector<16x128xf32>
    %529 = arith.addf %527, %528 : vector<16x128xf32>
    %530 = math.tanh %529 : vector<16x128xf32>
    %531 = arith.mulf %526, %530 : vector<16x128xf32>
    %c96_211 = arith.constant 96 : index
    %c0_212 = arith.constant 0 : index
    %532 = vector.load %arg17[%c96_211, %c0_212] : memref<128x512xf32, #tpu.memory_space<vmem>>, vector<16x512xf32>
    %533 = arith.truncf %531 : vector<16x128xf32> to vector<16x128xbf16>
    %cst_213 = arith.constant dense<0.000000e+00> : vector<16x512xf32>
    %534 = tpu.matmul %533, %319, %cst_213 {dimension_numbers = #tpu.dot_dimension_numbers<[1], [0], [0], [1], [0, 0, 1, 1], [], []>} : vector<16x128xbf16>, vector<128x512xbf16>, vector<16x512xf32> -> vector<16x512xf32>
    %535 = arith.addf %532, %534 : vector<16x512xf32>
    %536 = vector.extract_strided_slice %535 {offsets = [0, 0], sizes = [16, 128], strides = [1, 1]} : vector<16x512xf32> to vector<16x128xf32>
    %cst_214 = arith.constant 5.000000e-01 : f32
    %537 = vector.broadcast %cst_214 : f32 to vector<16x128xf32>
    %538 = arith.mulf %537, %536 : vector<16x128xf32>
    %539 = math.tanh %538 : vector<16x128xf32>
    %cst_215 = arith.constant 5.000000e-01 : f32
    %540 = vector.broadcast %cst_215 : f32 to vector<16x128xf32>
    %541 = arith.mulf %540, %539 : vector<16x128xf32>
    %cst_216 = arith.constant 5.000000e-01 : f32
    %542 = vector.broadcast %cst_216 : f32 to vector<16x128xf32>
    %543 = arith.addf %541, %542 : vector<16x128xf32>
    %544 = vector.extract_strided_slice %535 {offsets = [0, 128], sizes = [16, 128], strides = [1, 1]} : vector<16x512xf32> to vector<16x128xf32>
    %cst_217 = arith.constant 5.000000e-01 : f32
    %545 = vector.broadcast %cst_217 : f32 to vector<16x128xf32>
    %546 = arith.mulf %545, %544 : vector<16x128xf32>
    %547 = math.tanh %546 : vector<16x128xf32>
    %cst_218 = arith.constant 5.000000e-01 : f32
    %548 = vector.broadcast %cst_218 : f32 to vector<16x128xf32>
    %549 = arith.mulf %548, %547 : vector<16x128xf32>
    %cst_219 = arith.constant 5.000000e-01 : f32
    %550 = vector.broadcast %cst_219 : f32 to vector<16x128xf32>
    %551 = arith.addf %549, %550 : vector<16x128xf32>
    %552 = vector.extract_strided_slice %535 {offsets = [0, 256], sizes = [16, 128], strides = [1, 1]} : vector<16x512xf32> to vector<16x128xf32>
    %553 = math.tanh %552 : vector<16x128xf32>
    %554 = vector.extract_strided_slice %535 {offsets = [0, 384], sizes = [16, 128], strides = [1, 1]} : vector<16x512xf32> to vector<16x128xf32>
    %cst_220 = arith.constant 5.000000e-01 : f32
    %555 = vector.broadcast %cst_220 : f32 to vector<16x128xf32>
    %556 = arith.mulf %555, %554 : vector<16x128xf32>
    %557 = math.tanh %556 : vector<16x128xf32>
    %cst_221 = arith.constant 5.000000e-01 : f32
    %558 = vector.broadcast %cst_221 : f32 to vector<16x128xf32>
    %559 = arith.mulf %558, %557 : vector<16x128xf32>
    %cst_222 = arith.constant 5.000000e-01 : f32
    %560 = vector.broadcast %cst_222 : f32 to vector<16x128xf32>
    %561 = arith.addf %559, %560 : vector<16x128xf32>
    %562 = arith.mulf %551, %529 : vector<16x128xf32>
    %563 = arith.mulf %543, %553 : vector<16x128xf32>
    %564 = arith.addf %562, %563 : vector<16x128xf32>
    %565 = math.tanh %564 : vector<16x128xf32>
    %566 = arith.mulf %561, %565 : vector<16x128xf32>
    %c112_223 = arith.constant 112 : index
    %c0_224 = arith.constant 0 : index
    %567 = vector.load %arg17[%c112_223, %c0_224] : memref<128x512xf32, #tpu.memory_space<vmem>>, vector<16x512xf32>
    %568 = arith.truncf %566 : vector<16x128xf32> to vector<16x128xbf16>
    %cst_225 = arith.constant dense<0.000000e+00> : vector<16x512xf32>
    %569 = tpu.matmul %568, %319, %cst_225 {dimension_numbers = #tpu.dot_dimension_numbers<[1], [0], [0], [1], [0, 0, 1, 1], [], []>} : vector<16x128xbf16>, vector<128x512xbf16>, vector<16x512xf32> -> vector<16x512xf32>
    %570 = arith.addf %567, %569 : vector<16x512xf32>
    %571 = vector.extract_strided_slice %570 {offsets = [0, 0], sizes = [16, 128], strides = [1, 1]} : vector<16x512xf32> to vector<16x128xf32>
    %cst_226 = arith.constant 5.000000e-01 : f32
    %572 = vector.broadcast %cst_226 : f32 to vector<16x128xf32>
    %573 = arith.mulf %572, %571 : vector<16x128xf32>
    %574 = math.tanh %573 : vector<16x128xf32>
    %cst_227 = arith.constant 5.000000e-01 : f32
    %575 = vector.broadcast %cst_227 : f32 to vector<16x128xf32>
    %576 = arith.mulf %575, %574 : vector<16x128xf32>
    %cst_228 = arith.constant 5.000000e-01 : f32
    %577 = vector.broadcast %cst_228 : f32 to vector<16x128xf32>
    %578 = arith.addf %576, %577 : vector<16x128xf32>
    %579 = vector.extract_strided_slice %570 {offsets = [0, 128], sizes = [16, 128], strides = [1, 1]} : vector<16x512xf32> to vector<16x128xf32>
    %cst_229 = arith.constant 5.000000e-01 : f32
    %580 = vector.broadcast %cst_229 : f32 to vector<16x128xf32>
    %581 = arith.mulf %580, %579 : vector<16x128xf32>
    %582 = math.tanh %581 : vector<16x128xf32>
    %cst_230 = arith.constant 5.000000e-01 : f32
    %583 = vector.broadcast %cst_230 : f32 to vector<16x128xf32>
    %584 = arith.mulf %583, %582 : vector<16x128xf32>
    %cst_231 = arith.constant 5.000000e-01 : f32
    %585 = vector.broadcast %cst_231 : f32 to vector<16x128xf32>
    %586 = arith.addf %584, %585 : vector<16x128xf32>
    %587 = vector.extract_strided_slice %570 {offsets = [0, 256], sizes = [16, 128], strides = [1, 1]} : vector<16x512xf32> to vector<16x128xf32>
    %588 = math.tanh %587 : vector<16x128xf32>
    %589 = vector.extract_strided_slice %570 {offsets = [0, 384], sizes = [16, 128], strides = [1, 1]} : vector<16x512xf32> to vector<16x128xf32>
    %cst_232 = arith.constant 5.000000e-01 : f32
    %590 = vector.broadcast %cst_232 : f32 to vector<16x128xf32>
    %591 = arith.mulf %590, %589 : vector<16x128xf32>
    %592 = math.tanh %591 : vector<16x128xf32>
    %cst_233 = arith.constant 5.000000e-01 : f32
    %593 = vector.broadcast %cst_233 : f32 to vector<16x128xf32>
    %594 = arith.mulf %593, %592 : vector<16x128xf32>
    %cst_234 = arith.constant 5.000000e-01 : f32
    %595 = vector.broadcast %cst_234 : f32 to vector<16x128xf32>
    %596 = arith.addf %594, %595 : vector<16x128xf32>
    %597 = arith.mulf %586, %564 : vector<16x128xf32>
    %598 = arith.mulf %578, %588 : vector<16x128xf32>
    %599 = arith.addf %597, %598 : vector<16x128xf32>
    %600 = math.tanh %599 : vector<16x128xf32>
    %601 = arith.mulf %596, %600 : vector<16x128xf32>
    %c0_235 = arith.constant 0 : index
    %c0_236 = arith.constant 0 : index
    %602 = vector.load %arg14[%c0_235, %c0_236] : memref<16x128xf32, #tpu.memory_space<vmem>>, vector<16x128xf32>
    tpu.vector_store %arg14[%c0_235, %c0_236], %601 {strides = array<i32>} : memref<16x128xf32, #tpu.memory_space<vmem>>, vector<16x128xf32>,
    %c0_237 = arith.constant 0 : index
    %c0_238 = arith.constant 0 : index
    %603 = vector.load %arg15[%c0_237, %c0_238] : memref<16x128xf32, #tpu.memory_space<vmem>>, vector<16x128xf32>
    tpu.vector_store %arg15[%c0_237, %c0_238], %599 {strides = array<i32>} : memref<16x128xf32, #tpu.memory_space<vmem>>, vector<16x128xf32>,
    %c1_i32 = arith.constant 1 : i32
    %604 = arith.cmpi eq, %arg1, %c1_i32 : i32
    %605 = arith.extui %604 : i1 to i32
    %c0_i32_239 = arith.constant 0 : i32
    %606 = arith.cmpi ne, %605, %c0_i32_239 : i32
    scf.if %606 {
      %607 = arith.truncf %601 : vector<16x128xf32> to vector<16x128xbf16>
      %c0_240 = arith.constant 0 : index
      %c0_241 = arith.constant 0 : index
      %608 = vector.load %arg9[%c0_240, %c0_241] : memref<128x128xbf16, #tpu.memory_space<vmem>>, vector<128x128xbf16>
      %cst_242 = arith.constant dense<0.000000e+00> : vector<16x128xf32>
      %609 = tpu.matmul %607, %608, %cst_242 {dimension_numbers = #tpu.dot_dimension_numbers<[1], [0], [0], [1], [0, 0, 1, 1], [], []>} : vector<16x128xbf16>, vector<128x128xbf16>, vector<16x128xf32> -> vector<16x128xf32>
      %c0_243 = arith.constant 0 : index
      %c0_244 = arith.constant 0 : index
      %610 = vector.load %arg10[%c0_243, %c0_244] : memref<1x128xf32, #tpu.memory_space<vmem>>, vector<1x128xf32>
      %611 = vector.broadcast %610 : vector<1x128xf32> to vector<16x128xf32>
      %612 = arith.addf %609, %611 : vector<16x128xf32>
      %c0_245 = arith.constant 0 : index
      %c0_246 = arith.constant 0 : index
      %613 = vector.load %arg11[%c0_245, %c0_246] : memref<16x128xf32, #tpu.memory_space<vmem>>, vector<16x128xf32>
      tpu.vector_store %arg11[%c0_245, %c0_246], %612 {strides = array<i32>} : memref<16x128xf32, #tpu.memory_space<vmem>>, vector<16x128xf32>,
    } else {
    }
    return
  }
  func.func @transform_0(%arg0: i32, %arg1: i32) -> (i32, i32, i32) {
    %c0_i32 = arith.constant 0 : i32
    %c0_i32_0 = arith.constant 0 : i32
    return %arg1, %arg0, %c0_i32 : i32, i32, i32
  }
  func.func @transform_1(%arg0: i32, %arg1: i32) -> (i32, i32) {
    %c0_i32 = arith.constant 0 : i32
    %c0_i32_0 = arith.constant 0 : i32
    %c0_i32_1 = arith.constant 0 : i32
    return %c0_i32, %c0_i32_0 : i32, i32
  }
  func.func @transform_2(%arg0: i32, %arg1: i32) -> (i32, i32) {
    %c0_i32 = arith.constant 0 : i32
    %c0_i32_0 = arith.constant 0 : i32
    %c0_i32_1 = arith.constant 0 : i32
    return %c0_i32, %c0_i32_0 : i32, i32
  }
  func.func @transform_3(%arg0: i32, %arg1: i32) -> (i32, i32) {
    %c0_i32 = arith.constant 0 : i32
    %c0_i32_0 = arith.constant 0 : i32
    %c0_i32_1 = arith.constant 0 : i32
    return %c0_i32, %c0_i32_0 : i32, i32
  }
  func.func @transform_4(%arg0: i32, %arg1: i32) -> (i32, i32) {
    %c0_i32 = arith.constant 0 : i32
    %c0_i32_0 = arith.constant 0 : i32
    %c0_i32_1 = arith.constant 0 : i32
    return %c0_i32, %c0_i32_0 : i32, i32
  }
  func.func @transform_5(%arg0: i32, %arg1: i32) -> (i32, i32) {
    %c0_i32 = arith.constant 0 : i32
    %c0_i32_0 = arith.constant 0 : i32
    %c0_i32_1 = arith.constant 0 : i32
    return %c0_i32, %c0_i32_0 : i32, i32
  }
  func.func @transform_6(%arg0: i32, %arg1: i32) -> (i32, i32) {
    %c0_i32 = arith.constant 0 : i32
    %c0_i32_0 = arith.constant 0 : i32
    %c0_i32_1 = arith.constant 0 : i32
    return %c0_i32, %c0_i32_0 : i32, i32
  }
  func.func @transform_7(%arg0: i32, %arg1: i32) -> (i32, i32) {
    %c0_i32 = arith.constant 0 : i32
    %c0_i32_0 = arith.constant 0 : i32
    %c0_i32_1 = arith.constant 0 : i32
    return %c0_i32, %c0_i32_0 : i32, i32
  }
  func.func @transform_8(%arg0: i32, %arg1: i32) -> (i32, i32) {
    %c0_i32 = arith.constant 0 : i32
    %c0_i32_0 = arith.constant 0 : i32
    %c0_i32_1 = arith.constant 0 : i32
    return %c0_i32, %c0_i32_0 : i32, i32
  }
  func.func @transform_9(%arg0: i32, %arg1: i32) -> (i32, i32) {
    %c0_i32 = arith.constant 0 : i32
    %c0_i32_0 = arith.constant 0 : i32
    return %arg0, %c0_i32 : i32, i32
  }
}

</mosaic_0001>

<bundles_post_ra>
// kernel: tpu_custom_call.1
= control target key start
LH: loop header
LB: loop body
LE: loop exit
PB: predicated region body
PF: predicated region fallthrough
CT: control target
= control target key end

     0   :  { %s7393_s0 = inlined_call_operand.hbm [shape: bf16[16,16,128], index: 0, kind: input, shape index: {}]   ;;  %s7394_s1 = inlined_call_operand.hbm [shape: bf16[128,512], index: 1, kind: input, shape index: {}]   ;;  %s7395_s2 = inlined_call_operand.hbm [shape: bf16[128,512], index: 2, kind: input, shape index: {}]   ;;  %s7396_s3 = inlined_call_operand.vmem [shape: f32[1,512], index: 3, kind: input, shape index: {}]   ;;  %s7397_s4 = inlined_call_operand.hbm [shape: bf16[128,512], index: 4, kind: input, shape index: {}]   ;;  %s7398_s5 = inlined_call_operand.hbm [shape: bf16[128,512], index: 5, kind: input, shape index: {}]   ;;  %s7399_s6 = inlined_call_operand.vmem [shape: f32[1,512], index: 6, kind: input, shape index: {}]   ;;  %s7400_s7 = inlined_call_operand.hbm [shape: bf16[128,128], index: 7, kind: input, shape index: {}]   ;;  %s7401_s8 = inlined_call_operand.vmem [shape: f32[1,128], index: 8, kind: input, shape index: {}]   ;;  %s7402_s9 = inlined_call_operand.hbm [shape: f32[16,128], index: 9, kind: output, shape index: {}]  }
   0x1   :  { %7412 = sst [smem:[#allocation25_spill]] %s7394_s1 }
   0x2   :  { %7413 = sst [smem:[#allocation26_spill]] %s7399_s6 }
   0x3   :  { %7414 = sst [smem:[#allocation27_spill]] %s7401_s8 }
   0x4   :  { %7415 = sst [smem:[#allocation28_spill]] %s7402_s9 }
   0x5   :  { %14 = vsyncpa [#allocation9], 0 }
   0x6   :  { %16 = vsyncpa [#allocation9 + $0x1], 0 }
   0x7   :  { %17 = vsyncpa [#allocation12], 0 }
   0x8   :  { %18 = vsyncpa [#allocation15], 0 }
   0x9   :  { %19 = vsyncpa [#allocation18], 0 }
   0xa   :  { %20 = vsyncpa [#allocation10], 0  ;;  %s5909_s30 = smov 0   ;;  %s5911_s10 = smov 0  }
   0xb   :  { %s5913_s11 = smov 0   ;;  %s5915_s12 = smov 0  }
   0xc   :  { %s5917_s13 = smov 0   ;;  %s5919_s14 = smov 0  }
   0xd LB: > { %s7403_s15 = sadd.s32 4294967295, %s5840_s14   ;;  %p4407_p0 = scmp.ge.s32.totalorder %s5840_s14, 1  ;;  %s5840_s14 = sphi %s5919_s14, %s26_s14   ;;  %s5836_s13 = sphi %s5917_s13, %s7440_s13   ;;  %s5832_s12 = sphi %s5915_s12, %s7439_s12   ;;  %s5828_s11 = sphi %s5913_s11, %s7438_s11   ;;  %s5824_s10 = sphi %s5911_s10, %s7437_s10   ;;  %s5820_s30 = sphi %s5909_s30, %s7436_s30  }
   0xe   : > { %p5943_p1 = scmp.eq.s32.totalorder %s7403_s15, 0  ;;  %p265_p2 = scmp.lt.s32.totalorder %s5840_s14, 3 }
   0xf   : > { %s5842_s18 = smov [#allocation11]   ;;  %s5843_s21 = smov [#allocation14]  }
  0x10   : > { %s7416_s16 = scalar_select %p5943_p1, 1, 0 }
  0x11   : > { %p5948_p3 = pnand %p4407_p0, %p265_p2  ;;  %s277_s19 = sshll.u32 %s5842_s18, 4  ;;  %s5952_s19 = int_to_ptr.vmem [resolvable:$true] %s277_s19 }
  0x12   : > { %s306_s22 = sshll.u32 %s5843_s21, 4  ;;  %s5844_s23 = smov [#allocation13]   ;;  %s5962_s22 = int_to_ptr.vmem [resolvable:$true] %s306_s22 }
  0x13   : > { %s7417_s17 = scalar_select %p5948_p3, 1, 0 }
  0x14   : > { %p4889_p4 = pneg %p5948_p3  ;;  %s5964_s24 = sshll.u32 %s5844_s23, 4  ;;  %s291_s24 = int_to_ptr.vmem [resolvable:$true] %s5964_s24 }
  0x15   : > { %s7419_s1 = sld [smem:[#allocation25_spill]] }
  0x16   : > { %p5958_p5 = pnand %p4889_p4, %p5943_p1 }
  0x18   : > { %p5974_p7 = pneg %p5958_p5 }
  0x1b   : > { %s5578_s27 = scalar_lea.hbm %s7419_s1, 4096 }
  0x1c   : > { %p5579_p6 = scmp.ne.s32.totalorder %s7419_s1, %s5578_s27  ;;  %p5585_p10 = scmp.lt.u32.totalorder %s5578_s27, %s7419_s1 }
  0x1e   : > { %p5581_p8 = pnand %p5974_p7, %p5579_p6 }
  0x20   : > { %p5582_p9 = pneg %p5581_p8 }
  0x22   : > { %p5587_p11 = pnand %p5585_p10, %p5582_p9 }
  0x24   : > { %5590 = shalt.err (!%p5587_p11)
}
  0x25   : > { %s5591_s25 = scalar_lea.vmem %s5952_s19, 4096  ;;  %p5599_p2 = scmp.lt.s32.totalorder %s5952_s19, %s5952_s19 }
  0x26   : > { %p5592_p12 = scmp.ne.s32.totalorder %s5952_s19, %s5591_s25  ;;  %p5600_p4 = scmp.lt.s32.totalorder %s5591_s25, %s5591_s25 }
  0x28   : > { %p5594_p13 = pnand %p5592_p12, %p5974_p7  ;;  %p5601_p6 = por %p5600_p4, %p5599_p2 }
  0x2a   : > { %p5595_p0 = pneg %p5594_p13 }
  0x2c   : > { %p5602_p8 = pnand %p5601_p6, %p5595_p0 }
  0x2e   : > { %5605 = shalt.err (!%p5602_p8)
}
  0x2f   : > { %s5845_s26 = smov 256   ;;  %s5846_s27 = smov 16  }
  0x30   : > { %4892 = dma.hbm_to_vmem [thread:$0]  (!%p5958_p5), %s7419_s1, 4096, %s5952_s19, [#allocation12], %s5845_s26, %s5845_s26, %s5846_s27  }
  0x31   : > { %s5606_s25 = scalar_lea.hbm %s7397_s4, 4096 }
  0x32   : > { %p5607_p9 = scmp.ne.s32.totalorder %s7397_s4, %s5606_s25  ;;  %p5613_p12 = scmp.lt.u32.totalorder %s5606_s25, %s7397_s4 }
  0x34   : > { %p5609_p10 = pnand %p5607_p9, %p5974_p7 }
  0x36   : > { %p5610_p11 = pneg %p5609_p10 }
  0x38   : > { %p5615_p13 = pnand %p5613_p12, %p5610_p11 }
  0x3a   : > { %5618 = shalt.err (!%p5615_p13)
}
  0x3b   : > { %s5619_s19 = scalar_lea.vmem %s5962_s22, 4096  ;;  %p5627_p6 = scmp.lt.s32.totalorder %s5962_s22, %s5962_s22 }
  0x3c   : > { %p5620_p0 = scmp.ne.s32.totalorder %s5962_s22, %s5619_s19  ;;  %p5628_p8 = scmp.lt.s32.totalorder %s5619_s19, %s5619_s19 }
  0x3e   : > { %p5622_p2 = pnand %p5620_p0, %p5974_p7  ;;  %p5629_p9 = por %p5628_p8, %p5627_p6 }
  0x40   : > { %p5623_p4 = pneg %p5622_p2 }
  0x42   : > { %p5630_p10 = pnand %p5629_p9, %p5623_p4 }
  0x44   : > { %5633 = shalt.err (!%p5630_p10)
}
  0x45   : > { %4898 = dma.hbm_to_vmem [thread:$0]  (!%p5958_p5), %s7397_s4, 4096, %s5962_s22, [#allocation15], %s5845_s26, %s5845_s26, %s5846_s27  }
  0x46   : > { %s5634_s28 = scalar_lea.hbm %s7395_s2, 4096 }
  0x47   : > { %p5635_p11 = scmp.ne.s32.totalorder %s7395_s2, %s5634_s28  ;;  %p5641_p0 = scmp.lt.u32.totalorder %s5634_s28, %s7395_s2 }
  0x49   : > { %p5637_p12 = pnand %p5635_p11, %p5974_p7 }
  0x4b   : > { %p5638_p13 = pneg %p5637_p12 }
  0x4d   : > { %p5643_p2 = pnand %p5641_p0, %p5638_p13 }
  0x4f   : > { %5646 = shalt.err (!%p5643_p2)
}
  0x50   : > { %s5647_s19 = scalar_lea.vmem %s291_s24, 4096  ;;  %p5655_p9 = scmp.lt.s32.totalorder %s291_s24, %s291_s24 }
  0x51   : > { %p5648_p4 = scmp.ne.s32.totalorder %s291_s24, %s5647_s19  ;;  %p5656_p10 = scmp.lt.s32.totalorder %s5647_s19, %s5647_s19 }
  0x53   : > { %p5650_p6 = pnand %p5648_p4, %p5974_p7  ;;  %p5657_p3 = por %p5656_p10, %p5655_p9 }
  0x55   : > { %p5651_p8 = pneg %p5650_p6 }
  0x57   : > { %p5658_p1 = pnand %p5657_p3, %p5651_p8 }
  0x59   : > { %5661 = shalt.err (!%p5658_p1)
}
  0x5a   : > { %4895 = dma.hbm_to_vmem [thread:$0]  (!%p5958_p5), %s7395_s2, 4096, %s291_s24, [#allocation12], %s5845_s26, %s5845_s26, %s5846_s27  }
  0x5b   : > { %s5847_s8 = smov [#allocation16]   ;;  %s5848_s15 = smov [#allocation17]  }
  0x5c   : > { %s319_s9 = sshll.u32 %s5847_s8, 4  ;;  %s335_s28 = sshll.u32 %s5848_s15, 4  ;;  %s320_s9 = int_to_ptr.vmem [resolvable:$true] %s319_s9  ;;  %s336_s28 = int_to_ptr.vmem [resolvable:$true] %s335_s28 }
  0x5d   : > { %s5662_s23 = scalar_lea.hbm %s7398_s5, 4096 }
  0x5e   : > { %p5663_p1 = scmp.ne.s32.totalorder %s7398_s5, %s5662_s23  ;;  %p5669_p12 = scmp.lt.u32.totalorder %s5662_s23, %s7398_s5 }
  0x60   : > { %p5665_p3 = pnand %p5663_p1, %p5974_p7 }
  0x62   : > { %p5666_p11 = pneg %p5665_p3 }
  0x64   : > { %p5671_p13 = pnand %p5669_p12, %p5666_p11 }
  0x66   : > { %5674 = shalt.err (!%p5671_p13)
}
  0x67   : > { %s5675_s24 = scalar_lea.vmem %s320_s9, 4096  ;;  %p5683_p6 = scmp.lt.s32.totalorder %s320_s9, %s320_s9 }
  0x68   : > { %p5676_p0 = scmp.ne.s32.totalorder %s320_s9, %s5675_s24  ;;  %p5684_p8 = scmp.lt.s32.totalorder %s5675_s24, %s5675_s24 }
  0x6a   : > { %p5678_p2 = pnand %p5676_p0, %p5974_p7  ;;  %p5685_p9 = por %p5684_p8, %p5683_p6 }
  0x6c   : > { %p5679_p4 = pneg %p5678_p2 }
  0x6e   : > { %p5686_p10 = pnand %p5685_p9, %p5679_p4 }
  0x70   : > { %5689 = shalt.err (!%p5686_p10)
}
  0x71   : > { %4901 = dma.hbm_to_vmem [thread:$0]  (!%p5958_p5), %s7398_s5, 4096, %s320_s9, [#allocation15], %s5845_s26, %s5845_s26, %s5846_s27  }
  0x72   : > { %s5690_s29 = scalar_lea.hbm %s7400_s7, 1024 }
  0x73   : > { %p5691_p1 = scmp.ne.s32.totalorder %s7400_s7, %s5690_s29  ;;  %p5697_p12 = scmp.lt.u32.totalorder %s5690_s29, %s7400_s7 }
  0x75   : > { %p5693_p3 = pnand %p5691_p1, %p5974_p7 }
  0x77   : > { %p5694_p11 = pneg %p5693_p3 }
  0x79   : > { %p5699_p13 = pnand %p5697_p12, %p5694_p11 }
  0x7b   : > { %5702 = shalt.err (!%p5699_p13)
}
  0x7c   : > { %s5703_s22 = scalar_lea.vmem %s336_s28, 1024  ;;  %p5711_p6 = scmp.lt.s32.totalorder %s336_s28, %s336_s28 }
  0x7d   : > { %p5704_p0 = scmp.ne.s32.totalorder %s336_s28, %s5703_s22  ;;  %p5712_p8 = scmp.lt.s32.totalorder %s5703_s22, %s5703_s22 }
  0x7f   : > { %p5706_p2 = pnand %p5704_p0, %p5974_p7  ;;  %p5713_p9 = por %p5712_p8, %p5711_p6 }
  0x81   : > { %p5707_p4 = pneg %p5706_p2 }
  0x83   : > { %p5714_p10 = pnand %p5713_p9, %p5707_p4 }
  0x85   : > { %5717 = shalt.err (!%p5714_p10)
}
  0x86   : > { %s5849_s26 = smov 64   ;;  %s5850_s18 = smov 4  }
  0x87   : > { %4904 = dma.hbm_to_vmem [thread:$0]  (!%p5958_p5), %s7400_s7, 1024, %s336_s28, [#allocation18], %s5849_s26, %s5849_s26, %s5850_s18  }
  0x88   : > { %s35_s24 = sadd.s32 1, %s5836_s13  ;;  %s47_s1 = sadd.s32 1, %s5828_s11 }
  0x89   : > { %p36_p7 = scmp.ge.s32.totalorder %s35_s24, 2  ;;  %p54_p1 = scmp.ne.s32.totalorder %s5828_s11, %s5824_s10 }
  0x8a   : > { %p55_p3 = scmp.eq.s32.totalorder %s5840_s14, 0  ;;  %p60_p12 = scmp.ne.s32.totalorder %s5824_s10, %s5820_s30 }
  0x8b   : > { %s7442_s24 = smov (%p36_p7, %s35_s24), 0  ;;  %p4914_p13 = scmp.lt.s32.totalorder %s5840_s14, 2 }
  0x8c   : > { %p6095_p11 = por %p55_p3, %p54_p1  ;;  %s42_s20 = ssub.s32 %s5836_s13, %s7442_s24 }
  0x8d   : > { %p45_p0 = scmp.eq.s32.totalorder %s42_s20, 0  ;;  %p7422_p2 = scmp.ne.s32.totalorder %s7416_s16, 0 }
  0x8e   : > { %s352_s8 = sand.u32 1, %s5828_s11   ;;  %s4577_s15 = sshll.u32 %s5836_s13, 10 }
  0x8f   : > { %p6106_p4 = por %p7422_p2, %p60_p12  ;;  %s4414_s21 = sshll.u32 %s352_s8, 6 }
  0x90   : > { %s6113_s29 = scalar_select %p45_p0, %s5828_s11, %s47_s1  }
  0x91   : > { %s6118_s19 = scalar_lea.hbm %s7393_s0, %s4577_s15  ;;  %s356_s30 = scalar_lea.vmem [#allocation8], %s4414_s21 }
  0x92   : > { %s366_s22 = sshll.u32 %s356_s30, 4  ;;  %p6122_p5 = pnand %p4914_p13, %p6095_p11  ;;  %s6126_s22 = int_to_ptr.vmem [resolvable:$true] %s366_s22 }
  0x93   : > { %s6128_s9 = scalar_lea.sflag [#allocation9], %s352_s8  ;;  %s5718_s1 = scalar_lea.hbm %s6118_s19, 1024 }
  0x94   : > { %p5719_p6 = scmp.ne.s32.totalorder %s6118_s19, %s5718_s1  ;;  %p5720_p8 = pneg %p6122_p5 }
  0x95   : > { %s5723_s15 = scalar_lea.hbm %s7393_s0, 2048  ;;  %p5724_p7 = scmp.lt.u32.totalorder %s6118_s19, %s7393_s0 }
  0x96   : > { %p5721_p9 = pnand %p5720_p8, %p5719_p6  ;;  %p5725_p1 = scmp.lt.u32.totalorder %s5723_s15, %s5718_s1 }
  0x97   : > { %p5727_p11 = scmp.lt.u32.totalorder %s5718_s1, %s6118_s19 }
  0x98   : > { %p5722_p10 = pneg %p5721_p9  ;;  %p5726_p3 = por %p5725_p1, %p5724_p7 }
  0x9a   : > { %p5728_p12 = por %p5727_p11, %p5726_p3 }
  0x9c   : > { %p5729_p13 = pnand %p5728_p12, %p5722_p10 }
  0x9e   : > { %5732 = shalt.err (!%p5729_p13)
}
  0x9f   : > { %s5733_s8 = scalar_lea.vmem %s6126_s22, 1024  ;;  %s5851_s25 = smov [#allocation8]  }
  0xa0   : > { %p5734_p0 = scmp.ne.s32.totalorder %s6126_s22, %s5733_s8  ;;  %s5738_s30 = sshll.u32 %s5851_s25, 4  ;;  %s5739_s30 = int_to_ptr.vmem [resolvable:$false] %s5738_s30 }
  0xa1   : > { %s5740_s20 = scalar_lea.vmem %s5739_s30, 2048  ;;  %p5741_p9 = scmp.lt.s32.totalorder %s6126_s22, %s5739_s30 }
  0xa2   : > { %p5736_p2 = pnand %p5734_p0, %p5720_p8  ;;  %p5742_p7 = scmp.lt.s32.totalorder %s5740_s20, %s5733_s8 }
  0xa4   : > { %p5737_p6 = pneg %p5736_p2  ;;  %p5743_p1 = por %p5742_p7, %p5741_p9 }
  0xa6   : > { %p5744_p3 = pnand %p5743_p1, %p5737_p6 }
  0xa8   : > { %5747 = shalt.err (!%p5744_p3)
}
  0xa9   : > { %4908 = dma.hbm_to_vmem [thread:$0]  (!%p6122_p5), %s6118_s19, 1024, %s6126_s22, %s6128_s9, %s5849_s26, %s5849_s26, %s5850_s18  }
  0xaa   : > { %p7425_p8 = scmp.ne.s32.totalorder %s7417_s17, 0 }
  0xab   : > { %s380_s1 = sand.u32 (!%p7425_p8), 1, %s5824_s10  }
  0xac   : > { %378 = sbr.rel (%p7425_p8) target bundleno = 4629 (0x1215), region = 56  ;;  %s4419_s6 = sshll.u32 (!%p7425_p8), %s380_s1, 6 }
  0xad   : > { %s381_s15 = scalar_lea.sflag (!%p7425_p8), [#allocation9], %s380_s1  ;;  %s6162_s21 = scalar_lea.vmem (!%p7425_p8), [#allocation8], %s4419_s6 }
  0xb3   : > { %5799 = dma.done.wait (%p6106_p4), %s381_s15, 1024  }
  0xb4   : > { %5801 = vsyncadd (%p6106_p4), %s381_s15, 4294966272  ;;  %p7426_p10 = scmp.ne.s32.totalorder %s7416_s16, 0 }
  0xb6   : > { %5803 = dma.done.wait (%p7426_p10), [#allocation12], 8192  }
  0xb7   : > { %5805 = vsyncadd (%p7426_p10), [#allocation12], 4294959104 }
  0xb8   : > { %5807 = dma.done.wait (%p7426_p10), [#allocation15], 8192  }
  0xb9   : > { %5809 = vsyncadd (%p7426_p10), [#allocation15], 4294959104 }
  0xba   : > { %5811 = dma.done.wait (%p7426_p10), [#allocation18], 1024  }
  0xbb   : > { %5813 = vsyncadd (%p7426_p10), [#allocation18], 4294966272  ;;  %p4425_p4 = scmp.ne.s32.totalorder %s5832_s12, 0 }
  0xbc   : > { %v5852_v0 = vmov (!%p4425_p4), 0.0  }
  0xbd   : > { %441 = sbr.rel (%p4425_p4) target bundleno = 196 (0xc4), region = 84  ;;  %442 = vst [vmem:[#allocation2] sm:$0xff] (!%p4425_p4), %v5852_v0  ;;  %443 = vst [vmem:[#allocation2 + $0x8] sm:$0xff] (!%p4425_p4), %v5852_v0 }
  0xbe   : > { %444 = vst [vmem:[#allocation3] sm:$0xff] (!%p4425_p4), %v5852_v0  ;;  %445 = vst [vmem:[#allocation3 + $0x8] sm:$0xff] (!%p4425_p4), %v5852_v0 }
  0xbf   : > { %446 = vst [vmem:[#allocation4] sm:$0xff] (!%p4425_p4), %v5852_v0  ;;  %447 = vst [vmem:[#allocation4 + $0x8] sm:$0xff] (!%p4425_p4), %v5852_v0 }
  0xc0   : > { %448 = vst [vmem:[#allocation5] sm:$0xff] (!%p4425_p4), %v5852_v0  ;;  %449 = vst [vmem:[#allocation5 + $0x8] sm:$0xff] (!%p4425_p4), %v5852_v0 }
  0xc4 PF: > { %v4986_v1 = vld [vmem:[#allocation11 + $0x4] ss:$16 sps:$4 sm:$0xff]   ;;  %v4988_v2 = vld [vmem:[#allocation11 + $0xc] ss:$16 sps:$4 sm:$0xff]   ;;  %v5853_v3 = vmov 0   ;;  %s7427_s28 = sld [smem:[#allocation26_spill]] }
  0xc5   : > { %760 = vmatprep.mubr.bf16.mxu0 %v5853_v3  ;;  %873 = vmatprep.mubr.bf16.mxu1 %v5853_v3  ;;  %v4990_v4 = vld [vmem:[#allocation11] ss:$16 sps:$4 sm:$0xff]   ;;  %v4991_v5 = vld [vmem:[#allocation11 + $0x8] ss:$16 sps:$4 sm:$0xff]   ;;  %v4992_v6 = vld [vmem:[#allocation11 + $0x24] ss:$16 sps:$4 sm:$0xff]  }
  0xc6   : > { %728 = vmatprep.subr.bf16.mxu0 %v4986_v1  ;;  %841 = vmatprep.subr.bf16.mxu1 %v4988_v2  ;;  %v4994_v7 = vld [vmem:[#allocation11 + $0x2c] ss:$16 sps:$4 sm:$0xff]   ;;  %v4996_v8 = vld [vmem:[#allocation11 + $0x20] ss:$16 sps:$4 sm:$0xff]   ;;  %v4997_v9 = vld [vmem:[#allocation11 + $0x28] ss:$16 sps:$4 sm:$0xff]  }
  0xc7   : > { %729 = vmatpush1.bf16.msra.mxu0 %v4990_v4  ;;  %842 = vmatpush1.bf16.msra.mxu1 %v4991_v5  ;;  %v4998_v10 = vld [vmem:[#allocation11 + $0x44] ss:$16 sps:$4 sm:$0xff]   ;;  %v5000_v11 = vld [vmem:[#allocation11 + $0x4c] ss:$16 sps:$4 sm:$0xff]   ;;  %v5002_v12 = vld [vmem:[#allocation11 + $0x40] ss:$16 sps:$4 sm:$0xff]  }
  0xc8   : > { %730 = vmatprep.subr.bf16.mxu0 %v4992_v6  ;;  %843 = vmatprep.subr.bf16.mxu1 %v4994_v7  ;;  %v5003_v13 = vld [vmem:[#allocation11 + $0x48] ss:$16 sps:$4 sm:$0xff]   ;;  %v5004_v14 = vld [vmem:[#allocation11 + $0x64] ss:$16 sps:$4 sm:$0xff]   ;;  %v5006_v15 = vld [vmem:[#allocation11 + $0x6c] ss:$16 sps:$4 sm:$0xff]  }
  0xc9   : > { %v5008_v16 = vld [vmem:[#allocation11 + $0x60] ss:$16 sps:$4 sm:$0xff]   ;;  %v5009_v17 = vld [vmem:[#allocation11 + $0x68] ss:$16 sps:$4 sm:$0xff]   ;;  %v5010_v18 = vld [vmem:[#allocation11 + $0x84] ss:$16 sps:$4 sm:$0xff]  }
  0xca   : > { %v5012_v19 = vld [vmem:[#allocation11 + $0x8c] ss:$16 sps:$4 sm:$0xff]   ;;  %v5014_v20 = vld [vmem:[#allocation11 + $0x80] ss:$16 sps:$4 sm:$0xff]   ;;  %v5015_v21 = vld [vmem:[#allocation11 + $0x88] ss:$16 sps:$4 sm:$0xff]  }
  0xcb   : > { %731 = vmatpush1.bf16.msra.mxu0 %v4996_v8  ;;  %844 = vmatpush1.bf16.msra.mxu1 %v4997_v9  ;;  %v5016_v22 = vld [vmem:[#allocation11 + $0xa4] ss:$16 sps:$4 sm:$0xff]   ;;  %v5018_v23 = vld [vmem:[#allocation11 + $0xac] ss:$16 sps:$4 sm:$0xff]   ;;  %v5020_v24 = vld [vmem:[#allocation11 + $0xa0] ss:$16 sps:$4 sm:$0xff]  }
  0xcc   : > { %732 = vmatprep.subr.bf16.mxu0 %v4998_v10  ;;  %845 = vmatprep.subr.bf16.mxu1 %v5000_v11  ;;  %v5021_v25 = vld [vmem:[#allocation11 + $0xa8] ss:$16 sps:$4 sm:$0xff]   ;;  %v5022_v26 = vld [vmem:[#allocation11 + $0xc4] ss:$16 sps:$4 sm:$0xff]   ;;  %v5024_v27 = vld [vmem:[#allocation11 + $0xcc] ss:$16 sps:$4 sm:$0xff]  }
  0xcd   : > { %v5026_v28 = vld [vmem:[#allocation11 + $0xc0] ss:$16 sps:$4 sm:$0xff]   ;;  %v5027_v29 = vld [vmem:[#allocation11 + $0xc8] ss:$16 sps:$4 sm:$0xff]   ;;  %v5028_v30 = vld [vmem:[#allocation11 + $0xe4] ss:$16 sps:$4 sm:$0xff]  }
  0xce   : > { %v5030_v31 = vld [vmem:[#allocation11 + $0xec] ss:$16 sps:$4 sm:$0xff]   ;;  %v5032_v32 = vld [vmem:[#allocation11 + $0xe0] ss:$16 sps:$4 sm:$0xff]   ;;  %v5033_v33 = vld [vmem:[#allocation11 + $0xe8] ss:$16 sps:$4 sm:$0xff]  }
  0xcf   : > { %733 = vmatpush1.bf16.msra.mxu0 %v5002_v12  ;;  %846 = vmatpush1.bf16.msra.mxu1 %v5003_v13  ;;  %v6183_v34 = vld [vmem:[#allocation13 + $0x4] ss:$16 sps:$4 sm:$0xff]   ;;  %v6185_v35 = vld [vmem:[#allocation13 + $0xc] ss:$16 sps:$4 sm:$0xff]   ;;  %v6188_v37 = vld [vmem:[#allocation13] ss:$16 sps:$4 sm:$0xff]  }
  0xd0   : > { %734 = vmatprep.subr.bf16.mxu0 %v5004_v14  ;;  %847 = vmatprep.subr.bf16.mxu1 %v5006_v15  ;;  %v5034_v36 = vld [vmem:[%s6162_s21] sm:$0xff]   ;;  %v6194_v39 = vld [vmem:[#allocation13 + $0x8] ss:$16 sps:$4 sm:$0xff]   ;;  %v6196_v40 = vld [vmem:[#allocation13 + $0x2c] ss:$16 sps:$4 sm:$0xff]   ;;  %v500_v14 = vlaneseq  ;;  %p4562_p5 = scmp.ne.s32.totalorder %s5832_s12, 1 }
  0xd1   : > { %v6192_v38 = vld [vmem:[#allocation13 + $0x24] ss:$16 sps:$4 sm:$0xff]   ;;  %v6200_v41 = vld [vmem:[#allocation13 + $0x20] ss:$16 sps:$4 sm:$0xff]   ;;  %v6207_v43 = vld [vmem:[#allocation13 + $0x28] ss:$16 sps:$4 sm:$0xff]  }
  0xd2   : > { %v6204_v42 = vld [vmem:[#allocation13 + $0x44] ss:$16 sps:$4 sm:$0xff]   ;;  %v5040_v44 = vld [vmem:[%s6162_s21 + $0x8] sm:$0xff]   ;;  %v6213_v45 = vld [vmem:[#allocation13 + $0x40] ss:$16 sps:$4 sm:$0xff]   ;;  %v6339_v15 = vshrl.u32 %v500_v14, 7 }
  0xd3   : > { %735 = vmatpush1.bf16.msra.mxu0 %v5008_v16  ;;  %848 = vmatpush1.bf16.msra.mxu1 %v5009_v17  ;;  %v6215_v46 = vld [vmem:[#allocation13 + $0x4c] ss:$16 sps:$4 sm:$0xff]   ;;  %v6217_v47 = vld [vmem:[#allocation13 + $0x64] ss:$16 sps:$4 sm:$0xff]   ;;  %v6220_v48 = vld [vmem:[#allocation13 + $0x48] ss:$16 sps:$4 sm:$0xff]  }
  0xd4   : > { %736 = vmatprep.subr.bf16.mxu0 %v5010_v18  ;;  %849 = vmatprep.subr.bf16.mxu1 %v5012_v19  ;;  %v6222_v49 = vld [vmem:[#allocation13 + $0x6c] ss:$16 sps:$4 sm:$0xff]   ;;  %v6228_v50 = vld [vmem:[#allocation13 + $0x60] ss:$16 sps:$4 sm:$0xff]   ;;  %v6230_v51 = vld [vmem:[#allocation13 + $0x84] ss:$16 sps:$4 sm:$0xff]  }
  0xd5   : > { %v6234_v52 = vld [vmem:[#allocation13 + $0x68] ss:$16 sps:$4 sm:$0xff]   ;;  %v5047_v53 = vld [vmem:[%s6162_s21 + $0x10] sm:$0xff]   ;;  %v6241_v55 = vld [vmem:[#allocation13 + $0x8c] ss:$16 sps:$4 sm:$0xff]   ;;  %v7411_v16 = vsub.s32 0, %v6339_v15 }
  0xd6   : > { %v6238_v54 = vld [vmem:[#allocation13 + $0x80] ss:$16 sps:$4 sm:$0xff]   ;;  %v6245_v56 = vld [vmem:[#allocation13 + $0xa4] ss:$16 sps:$4 sm:$0xff]   ;;  %v6247_v57 = vld [vmem:[#allocation13 + $0x88] ss:$16 sps:$4 sm:$0xff]  }
  0xd7   : > { %737 = vmatpush1.bf16.msra.mxu0 %v5014_v20  ;;  %850 = vmatpush1.bf16.msra.mxu1 %v5015_v21  ;;  %v6249_v58 = vld [vmem:[#allocation13 + $0xa0] ss:$16 sps:$4 sm:$0xff]   ;;  %v6251_v59 = vld [vmem:[#allocation13 + $0xac] ss:$16 sps:$4 sm:$0xff]   ;;  %v6255_v60 = vld [vmem:[#allocation13 + $0xc4] ss:$16 sps:$4 sm:$0xff]  }
  0xd8   : > { %738 = vmatprep.subr.bf16.mxu0 %v5016_v22  ;;  %851 = vmatprep.subr.bf16.mxu1 %v5018_v23  ;;  %v6257_v61 = vld [vmem:[#allocation13 + $0xa8] ss:$16 sps:$4 sm:$0xff]   ;;  %v6265_v63 = vld [vmem:[#allocation13 + $0xc0] ss:$16 sps:$4 sm:$0xff]   ;;  %v6267_v0 = vld [vmem:[#allocation13 + $0xcc] ss:$16 sps:$4 sm:$0xff]  }
  0xd9   : > { %v5054_v62 = vld [vmem:[%s6162_s21 + $0x18] sm:$0xff]   ;;  %v6269_v1 = vld [vmem:[#allocation13 + $0xe4] ss:$16 sps:$4 sm:$0xff]   ;;  %v6278_v5 = vld [vmem:[#allocation13 + $0xe0] ss:$16 sps:$4 sm:$0xff]   ;;  %v7410_v18 = vsub.s32 1, %v6339_v15 }
  0xda   : > { %v6271_v2 = vld [vmem:[#allocation13 + $0xc8] ss:$16 sps:$4 sm:$0xff]   ;;  %v6274_v4 = vld [vmem:[#allocation13 + $0xec] ss:$16 sps:$4 sm:$0xff]   ;;  %v5061_v7 = vld [vmem:[%s6162_s21 + $0x20] sm:$0xff]   ;;  %v7409_v20 = vsub.s32 2, %v6339_v15 }
  0xdb   : > { %739 = vmatpush1.bf16.msra.mxu0 %v5020_v24  ;;  %852 = vmatpush1.bf16.msra.mxu1 %v5021_v25  ;;  %v6282_v6 = vld [vmem:[#allocation13 + $0xe8] ss:$16 sps:$4 sm:$0xff]   ;;  %v5075_v9 = vld [vmem:[%s6162_s21 + $0x30] sm:$0xff]   ;;  %v1050_v11 = vld [vmem:[#allocation2] sm:$0xff]  ;;  %vm5855_vm0 = vmmov (!%p4562_p5), 0   ;;  %s7432_s22 = sld [smem:[#allocation27_spill]] (!%p4562_p5) }
  0xdc   : > { %740 = vmatprep.subr.bf16.mxu0 %v5022_v26  ;;  %853 = vmatprep.subr.bf16.mxu1 %v5024_v27  ;;  %v5068_v8 = vld [vmem:[%s6162_s21 + $0x28] sm:$0xff]   ;;  %v5082_v10 = vld [vmem:[%s6162_s21 + $0x38] sm:$0xff]   ;;  %v498_v17 = vld [vmem:[%s7396_s3] sm:$0xf] }
  0xdd   : > { %v1051_v12 = vld [vmem:[#allocation2 + $0x8] sm:$0xff]  ;;  %v6348_v19 = vrot.slane %v498_v17, %v7411_v16  ;;  %v6353_v21 = vrot.slane %v498_v17, %v7410_v18  ;;  %v6358_v25 = vrot.slane %v498_v17, %v7409_v20 }
  0xde   : > { %v1062_v13 = vpack.c.bf16 %v1051_v12, %v1050_v11 }
  0xdf   : > { %741 = vmatpush1.bf16.msra.mxu0 %v5026_v28  ;;  %854 = vmatpush1.bf16.msra.mxu1 %v5027_v29 }
  0xe0   : > { %742 = vmatprep.subr.bf16.mxu0 %v5028_v30  ;;  %855 = vmatprep.subr.bf16.mxu1 %v5030_v31 }
  0xe3   : > { %743 = vmatpush1.bf16.msra.mxu0 %v5032_v32  ;;  %856 = vmatpush1.bf16.msra.mxu1 %v5033_v33 }
  0xe4   : > { %1223 = vmatprep.subr.bf16.mxu0 %v6183_v34  ;;  %1266 = vmatprep.subr.bf16.mxu1 %v6185_v35 }
  0xe6   : > { %761 = vmatmul.mubr.bf16.vlgmr.msra.gmra.mrb[0].mxu0 %v5034_v36  ;;  %874 = vmatmul.mubr.bf16.vlgmr.msra.gmra.mrb[0].mxu1 %v5034_v36 }
  0xe7   : > { %1224 = vmatpush1.bf16.msra.mxu0 %v6188_v37  ;;  %770 = vmatprep.mubr.bf16.mxu0 %v5853_v3 }
  0xe8   : > { %883 = vmatprep.mubr.bf16.mxu1 %v5853_v3  ;;  %1225 = vmatprep.subr.bf16.mxu0 %v6192_v38 }
  0xe9   : > { %1267 = vmatpush1.bf16.msra.mxu1 %v6194_v39 }
  0xea   : > { %1268 = vmatprep.subr.bf16.mxu1 %v6196_v40 }
  0xeb   : > { %1226 = vmatpush1.bf16.msra.mxu0 %v6200_v41 }
  0xec   : > { %1227 = vmatprep.subr.bf16.mxu0 %v6204_v42 }
  0xed   : > { %1269 = vmatpush1.bf16.msra.mxu1 %v6207_v43 }
  0xee   : > { %771 = vmatmul.mubr.bf16.gmra.mrb[4].mxu0 %v5040_v44  ;;  %884 = vmatmul.mubr.bf16.gmra.mrb[4].mxu1 %v5040_v44 }
  0xef   : > { %780 = vmatprep.mubr.bf16.mxu0 %v5853_v3  ;;  %893 = vmatprep.mubr.bf16.mxu1 %v5853_v3 }
  0xf0   : > { %1228 = vmatpush1.bf16.msra.mxu0 %v6213_v45  ;;  %1270 = vmatprep.subr.bf16.mxu1 %v6215_v46 }
  0xf1   : > { %1229 = vmatprep.subr.bf16.mxu0 %v6217_v47  ;;  %1271 = vmatpush1.bf16.msra.mxu1 %v6220_v48 }
  0xf2   : > { %1272 = vmatprep.subr.bf16.mxu1 %v6222_v49 }
  0xf4   : > { %1230 = vmatpush1.bf16.msra.mxu0 %v6228_v50 }
  0xf5   : > { %1231 = vmatprep.subr.bf16.mxu0 %v6230_v51  ;;  %1273 = vmatpush1.bf16.msra.mxu1 %v6234_v52 }
  0xf6   : > { %781 = vmatmul.mubr.bf16.gmra.mrb[8].mxu0 %v5047_v53  ;;  %894 = vmatmul.mubr.bf16.gmra.mrb[8].mxu1 %v5047_v53  ;;  %v7408_v53 = vsub.s32 3, %v6339_v15 }
  0xf7   : > { %790 = vmatprep.mubr.bf16.mxu0 %v5853_v3  ;;  %903 = vmatprep.mubr.bf16.mxu1 %v5853_v3 }
  0xf8   : > { %1232 = vmatpush1.bf16.msra.mxu0 %v6238_v54  ;;  %1274 = vmatprep.subr.bf16.mxu1 %v6241_v55 }
  0xf9   : > { %1233 = vmatprep.subr.bf16.mxu0 %v6245_v56  ;;  %1275 = vmatpush1.bf16.msra.mxu1 %v6247_v57 }
  0xfa   : > { %1276 = vmatprep.subr.bf16.mxu1 %v6251_v59 }
  0xfc   : > { %1234 = vmatpush1.bf16.msra.mxu0 %v6249_v58 }
  0xfd   : > { %1235 = vmatprep.subr.bf16.mxu0 %v6255_v60  ;;  %1277 = vmatpush1.bf16.msra.mxu1 %v6257_v61 }
  0xfe   : > { %791 = vmatmul.mubr.bf16.gmra.mrb[12].mxu0 %v5054_v62  ;;  %904 = vmatmul.mubr.bf16.gmra.mrb[12].mxu1 %v5054_v62 }
  0xff   : > { %800 = vmatprep.mubr.bf16.mxu0 %v5853_v3  ;;  %913 = vmatprep.mubr.bf16.mxu1 %v5853_v3 }
 0x100   : > { %1236 = vmatpush1.bf16.msra.mxu0 %v6265_v63  ;;  %1278 = vmatprep.subr.bf16.mxu1 %v6267_v0 }
 0x101   : > { %1237 = vmatprep.subr.bf16.mxu0 %v6269_v1  ;;  %1279 = vmatpush1.bf16.msra.mxu1 %v6271_v2 }
 0x102   : > { %1280 = vmatprep.subr.bf16.mxu1 %v6274_v4 }
 0x104   : > { %1238 = vmatpush1.bf16.msra.mxu0 %v6278_v5 }
 0x105   : > { %1281 = vmatpush1.bf16.msra.mxu1 %v6282_v6  ;;  %1363 = vmatprep.subr.bf16.mxu0 %v6183_v34 }
 0x106   : > { %801 = vmatmul.mubr.bf16.gmra.mrb[16].mxu0 %v5061_v7  ;;  %914 = vmatmul.mubr.bf16.gmra.mrb[16].mxu1 %v5061_v7 }
 0x107   : > { %810 = vmatprep.mubr.bf16.mxu0 %v5853_v3  ;;  %923 = vmatprep.mubr.bf16.mxu1 %v5853_v3 }
 0x108   : > { %1406 = vmatprep.subr.bf16.mxu1 %v6185_v35 }
 0x10e   : > { %811 = vmatmul.mubr.bf16.gmra.mrb[20].mxu0 %v5068_v8  ;;  %924 = vmatmul.mubr.bf16.gmra.mrb[20].mxu1 %v5068_v8 }
 0x10f   : > { %820 = vmatprep.mubr.bf16.mxu0 %v5853_v3  ;;  %933 = vmatprep.mubr.bf16.mxu1 %v5853_v3 }
 0x116   : > { %821 = vmatmul.mubr.bf16.gmra.mrb[24].mxu0 %v5075_v9  ;;  %934 = vmatmul.mubr.bf16.gmra.mrb[24].mxu1 %v5075_v9 }
 0x117   : > { %830 = vmatprep.mubr.bf16.mxu0 %v5853_v3  ;;  %943 = vmatprep.mubr.bf16.mxu1 %v5853_v3 }
 0x11e   : > { %831 = vmatmul.mubr.bf16.gmra.mrb[28].mxu0 %v5082_v10  ;;  %944 = vmatmul.mubr.bf16.gmra.mrb[28].mxu1 %v5082_v10  ;;  %v6367_v10 = vrot.slane %v498_v17, %v7408_v53  ;;  %v1052_v17 = vld [vmem:[#allocation3] sm:$0xff] }
 0x11f   : > { %1255 = vmatprep.mubr.bf16.mxu0 %v5853_v3  ;;  %1298 = vmatprep.mubr.bf16.mxu1 %v5853_v3 }
 0x126   : > { %1256 = vmatmul.mubr.bf16.vlgmr.msra.gmra.mrb[0].mxu0 %v1062_v13  ;;  %1299 = vmatmul.mubr.bf16.vlgmr.msra.gmra.mrb[0].mxu1 %v1062_v13 }
 0x127   : > { %1364 = vmatpush1.bf16.msra.mxu0 %v6188_v37  ;;  %1407 = vmatpush1.bf16.msra.mxu1 %v6194_v39 }
 0x128   : > { %1365 = vmatprep.subr.bf16.mxu0 %v6192_v38  ;;  %1408 = vmatprep.subr.bf16.mxu1 %v6196_v40 }
 0x129   : > { %1395 = vmatprep.mubr.bf16.mxu0 %v5853_v3  ;;  %1438 = vmatprep.mubr.bf16.mxu1 %v5853_v3 }
 0x12b   : > { %1366 = vmatpush1.bf16.msra.mxu0 %v6200_v41  ;;  %1409 = vmatpush1.bf16.msra.mxu1 %v6207_v43 }
 0x12c   : > { %1367 = vmatprep.subr.bf16.mxu0 %v6204_v42  ;;  %1410 = vmatprep.subr.bf16.mxu1 %v6215_v46 }
 0x12f   : > { %1368 = vmatpush1.bf16.msra.mxu0 %v6213_v45  ;;  %1411 = vmatpush1.bf16.msra.mxu1 %v6220_v48 }
 0x130   : > { %1369 = vmatprep.subr.bf16.mxu0 %v6217_v47  ;;  %1412 = vmatprep.subr.bf16.mxu1 %v6222_v49 }
 0x133   : > { %1370 = vmatpush1.bf16.msra.mxu0 %v6228_v50  ;;  %1413 = vmatpush1.bf16.msra.mxu1 %v6234_v52 }
 0x134   : > { %1371 = vmatprep.subr.bf16.mxu0 %v6230_v51  ;;  %1414 = vmatprep.subr.bf16.mxu1 %v6241_v55 }
 0x137   : > { %1372 = vmatpush1.bf16.msra.mxu0 %v6238_v54  ;;  %1415 = vmatpush1.bf16.msra.mxu1 %v6247_v57 }
 0x138   : > { %1373 = vmatprep.subr.bf16.mxu0 %v6245_v56  ;;  %1416 = vmatprep.subr.bf16.mxu1 %v6251_v59 }
 0x13b   : > { %1374 = vmatpush1.bf16.msra.mxu0 %v6249_v58  ;;  %1417 = vmatpush1.bf16.msra.mxu1 %v6257_v61 }
 0x13c   : > { %1375 = vmatprep.subr.bf16.mxu0 %v6255_v60  ;;  %1418 = vmatprep.subr.bf16.mxu1 %v6267_v0 }
 0x13f   : > { %1376 = vmatpush1.bf16.msra.mxu0 %v6265_v63  ;;  %1419 = vmatpush1.bf16.msra.mxu1 %v6271_v2 }
 0x140   : > { %1377 = vmatprep.subr.bf16.mxu0 %v6269_v1  ;;  %1420 = vmatprep.subr.bf16.mxu1 %v6274_v4 }
 0x143   : > { %1378 = vmatpush1.bf16.msra.mxu0 %v6278_v5  ;;  %1421 = vmatpush1.bf16.msra.mxu1 %v6282_v6 }
 0x144   : > { %1503 = vmatprep.subr.bf16.mxu0 %v6183_v34  ;;  %1546 = vmatprep.subr.bf16.mxu1 %v6185_v35 }
 0x1f9   : > { %v1257_v22 = vpop.f32.mrb[0].mxu0  ;;  %v1300_v23 = vpop.f32.mrb[0].mxu1 }
 0x1fa   : > { %v4607_v24 = vadd.f32 %v1257_v22, %v6348_v19  ;;  %v1259_v26 = vpop.f32.mrb[1].mxu0  ;;  %v1302_v27 = vpop.f32.mrb[1].mxu1  ;;  %v4639_v7 = vadd.f32 %v1300_v23, %v6358_v25 }
 0x1fb   : > { %v4608_v28 = vadd.f32 %v1259_v26, %v6353_v21  ;;  %v1261_v29 = vpop.f32.mrb[2].mxu0  ;;  %v1304_v30 = vpop.f32.mrb[2].mxu1  ;;  %v4640_v12 = vadd.f32 %v1302_v27, %v6367_v10 }
 0x1fc   : > { %v1317_v31 = vmul.f32 0.5, %v4607_v24  ;;  %v4609_v32 = vadd.f32 %v1261_v29, %v6348_v19  ;;  %v1263_v33 = vpop.f32.mrb[3].mxu0  ;;  %v1306_v36 = vpop.f32.mrb[3].mxu1  ;;  %v4641_v11 = vadd.f32 %v1304_v30, %v6358_v25 }
 0x1fd   : > { %v1325_v44 = vmul.f32 0.5, %v4608_v28  ;;  %v4610_v62 = vadd.f32 %v1263_v33, %v6353_v21  ;;  %v4642_v13 = vadd.f32 %v1306_v36, %v6367_v10  ;;  %v1335_v24 = vmul.f32 0.5, %v4640_v12 }
 0x1fe   : > { %5186 = vtanh.f32 %v1317_v31  ;;  %v1318_v8 = vmul.f32 0.5, %v4609_v32 }
 0x1ff   : > { %5188 = vtanh.f32 %v1325_v44  ;;  %v1326_v9 = vmul.f32 0.5, %v4610_v62  ;;  %v1336_v28 = vmul.f32 0.5, %v4642_v13 }
 0x200   : > { %5190 = vtanh.f32 %v1318_v8 }
 0x201   : > { %5192 = vtanh.f32 %v4639_v7 }
 0x202   : > { %5194 = vtanh.f32 %v1326_v9  ;;  %v1053_v9 = vld [vmem:[#allocation3 + $0x8] sm:$0xff] }
 0x203   : > { %5196 = vtanh.f32 %v4641_v11 }
 0x204   : > { %5198 = vtanh.f32 %v1335_v24 }
 0x205   : > { %5200 = vtanh.f32 %v1336_v28 }
 0x208   : > { %v5187_v14 = vpop.eup %5186 }
 0x209   : > { %v5189_v22 = vpop.eup %5188  ;;  %v1321_v23 = vmul.f32 0.5, %v5187_v14 }
 0x20a   : > { %v1329_v26 = vmul.f32 0.5, %v5189_v22  ;;  %v5191_v29 = vpop.eup %5190 }
 0x20b   : > { %v1323_v31 = vadd.f32 0.5, %v1321_v23  ;;  %v5193_v32 = vpop.eup %5192  ;;  %v1322_v44 = vmul.f32 0.5, %v5191_v29 }
 0x20c   : > { %v1331_v33 = vadd.f32 0.5, %v1329_v26  ;;  %v5195_v30 = vpop.eup %5194 }
 0x20d   : > { %v1345_v62 = vmul.f32 %v5193_v32, %v1323_v31  ;;  %v1324_v27 = vadd.f32 0.5, %v1322_v44  ;;  %v1330_v8 = vmul.f32 0.5, %v5195_v30  ;;  %v5197_v36 = vpop.eup %5196 }
 0x20e   : > { %v1343_v7 = vmul.f32 %v1331_v33, %v1052_v17  ;;  %v5199_v23 = vpop.eup %5198 }
 0x20f   : > { %v1332_v12 = vadd.f32 0.5, %v1330_v8  ;;  %v1346_v14 = vmul.f32 %v5197_v36, %v1324_v27  ;;  %v5201_v26 = vpop.eup %5200  ;;  %v1339_v24 = vmul.f32 0.5, %v5199_v23 }
 0x210   : > { %v6372_v11 = vadd.f32 %v1345_v62, %v1343_v7  ;;  %v1340_v29 = vmul.f32 0.5, %v5201_v26 }
 0x211   : > { %v1344_v13 = vmul.f32 %v1332_v12, %v1053_v9  ;;  %v1341_v17 = vadd.f32 0.5, %v1339_v24 }
 0x212   : > { %5202 = vtanh.f32 %v6372_v11  ;;  %v1342_v28 = vadd.f32 0.5, %v1340_v29 }
 0x213   : > { %v6375_v22 = vadd.f32 %v1346_v14, %v1344_v13 }
 0x215   : > { %5204 = vtanh.f32 %v6375_v22 }
 0x21c   : > { %v5203_v31 = vpop.eup %5202 }
 0x21d   : > { %v1351_v33 = vmul.f32 %v5203_v31, %v1341_v17 }
 0x21f   : > { %v5205_v32 = vpop.eup %5204 }
 0x220   : > { %v1352_v44 = vmul.f32 %v5205_v32, %v1342_v28 }
 0x222   : > { %v6378_v30 = vpack.c.bf16 %v1352_v44, %v1351_v33 }
 0x224   : > { %1396 = vmatmul.mubr.bf16.vlgmr.msra.gmra.mrb[4].mxu0 %v6378_v30  ;;  %1439 = vmatmul.mubr.bf16.vlgmr.msra.gmra.mrb[4].mxu1 %v6378_v30 }
 0x225   : > { %1504 = vmatpush1.bf16.msra.mxu0 %v6188_v37  ;;  %1547 = vmatpush1.bf16.msra.mxu1 %v6194_v39 }
 0x226   : > { %1505 = vmatprep.subr.bf16.mxu0 %v6192_v38  ;;  %1548 = vmatprep.subr.bf16.mxu1 %v6196_v40 }
 0x227   : > { %1535 = vmatprep.mubr.bf16.mxu0 %v5853_v3  ;;  %1578 = vmatprep.mubr.bf16.mxu1 %v5853_v3 }
 0x229   : > { %1506 = vmatpush1.bf16.msra.mxu0 %v6200_v41  ;;  %1549 = vmatpush1.bf16.msra.mxu1 %v6207_v43 }
 0x22a   : > { %1507 = vmatprep.subr.bf16.mxu0 %v6204_v42  ;;  %1550 = vmatprep.subr.bf16.mxu1 %v6215_v46 }
 0x22d   : > { %1508 = vmatpush1.bf16.msra.mxu0 %v6213_v45  ;;  %1551 = vmatpush1.bf16.msra.mxu1 %v6220_v48 }
 0x22e   : > { %1509 = vmatprep.subr.bf16.mxu0 %v6217_v47  ;;  %1552 = vmatprep.subr.bf16.mxu1 %v6222_v49 }
 0x231   : > { %1510 = vmatpush1.bf16.msra.mxu0 %v6228_v50  ;;  %1553 = vmatpush1.bf16.msra.mxu1 %v6234_v52 }
 0x232   : > { %1511 = vmatprep.subr.bf16.mxu0 %v6230_v51  ;;  %1554 = vmatprep.subr.bf16.mxu1 %v6241_v55 }
 0x235   : > { %1512 = vmatpush1.bf16.msra.mxu0 %v6238_v54  ;;  %1555 = vmatpush1.bf16.msra.mxu1 %v6247_v57 }
 0x236   : > { %1513 = vmatprep.subr.bf16.mxu0 %v6245_v56  ;;  %1556 = vmatprep.subr.bf16.mxu1 %v6251_v59 }
 0x239   : > { %1514 = vmatpush1.bf16.msra.mxu0 %v6249_v58  ;;  %1557 = vmatpush1.bf16.msra.mxu1 %v6257_v61 }
 0x23a   : > { %1515 = vmatprep.subr.bf16.mxu0 %v6255_v60  ;;  %1558 = vmatprep.subr.bf16.mxu1 %v6267_v0 }
 0x23d   : > { %1516 = vmatpush1.bf16.msra.mxu0 %v6265_v63  ;;  %1559 = vmatpush1.bf16.msra.mxu1 %v6271_v2 }
 0x23e   : > { %1517 = vmatprep.subr.bf16.mxu0 %v6269_v1  ;;  %1560 = vmatprep.subr.bf16.mxu1 %v6274_v4 }
 0x241   : > { %1518 = vmatpush1.bf16.msra.mxu0 %v6278_v5  ;;  %1561 = vmatpush1.bf16.msra.mxu1 %v6282_v6 }
 0x242   : > { %1643 = vmatprep.subr.bf16.mxu0 %v6183_v34  ;;  %1686 = vmatprep.subr.bf16.mxu1 %v6185_v35 }
 0x2f7   : > { %v1397_v62 = vpop.f32.mrb[4].mxu0  ;;  %v1440_v7 = vpop.f32.mrb[4].mxu1 }
 0x2f8   : > { %v4611_v27 = vadd.f32 %v1397_v62, %v6348_v19  ;;  %v1399_v8 = vpop.f32.mrb[5].mxu0  ;;  %v1442_v36 = vpop.f32.mrb[5].mxu1  ;;  %v4643_v17 = vadd.f32 %v1440_v7, %v6358_v25 }
 0x2f9   : > { %v4612_v9 = vadd.f32 %v1399_v8, %v6353_v21  ;;  %v1401_v12 = vpop.f32.mrb[6].mxu0  ;;  %v1444_v14 = vpop.f32.mrb[6].mxu1  ;;  %v4644_v44 = vadd.f32 %v1442_v36, %v6367_v10 }
 0x2fa   : > { %v1457_v13 = vmul.f32 0.5, %v4611_v27  ;;  %v4613_v23 = vadd.f32 %v1401_v12, %v6348_v19  ;;  %v1403_v26 = vpop.f32.mrb[7].mxu0  ;;  %v1446_v24 = vpop.f32.mrb[7].mxu1  ;;  %v4645_v33 = vadd.f32 %v1444_v14, %v6358_v25 }
 0x2fb   : > { %v1465_v29 = vmul.f32 0.5, %v4612_v9  ;;  %v4614_v31 = vadd.f32 %v1403_v26, %v6353_v21  ;;  %v4646_v62 = vadd.f32 %v1446_v24, %v6367_v10  ;;  %v1475_v12 = vmul.f32 0.5, %v4644_v44 }
 0x2fc   : > { %5206 = vtanh.f32 %v1457_v13  ;;  %v1458_v28 = vmul.f32 0.5, %v4613_v23 }
 0x2fd   : > { %5208 = vtanh.f32 %v1465_v29  ;;  %v1466_v32 = vmul.f32 0.5, %v4614_v31  ;;  %v1476_v26 = vmul.f32 0.5, %v4646_v62 }
 0x2fe   : > { %5210 = vtanh.f32 %v1458_v28 }
 0x2ff   : > { %5212 = vtanh.f32 %v4643_v17 }
 0x300   : > { %5214 = vtanh.f32 %v1466_v32 }
 0x301   : > { %5216 = vtanh.f32 %v4645_v33 }
 0x302   : > { %5218 = vtanh.f32 %v1475_v12 }
 0x303   : > { %5220 = vtanh.f32 %v1476_v26 }
 0x306   : > { %v5207_v27 = vpop.eup %5206 }
 0x307   : > { %v5209_v8 = vpop.eup %5208  ;;  %v1461_v9 = vmul.f32 0.5, %v5207_v27 }
 0x308   : > { %v1469_v13 = vmul.f32 0.5, %v5209_v8  ;;  %v5211_v7 = vpop.eup %5210 }
 0x309   : > { %v1463_v23 = vadd.f32 0.5, %v1461_v9  ;;  %v5213_v29 = vpop.eup %5212  ;;  %v1462_v28 = vmul.f32 0.5, %v5211_v7 }
 0x30a   : > { %v1471_v31 = vadd.f32 0.5, %v1469_v13  ;;  %v5215_v53 = vpop.eup %5214 }
 0x30b   : > { %v1485_v14 = vmul.f32 %v5213_v29, %v1463_v23  ;;  %v1464_v36 = vadd.f32 0.5, %v1462_v28  ;;  %v1470_v32 = vmul.f32 0.5, %v5215_v53  ;;  %v5217_v24 = vpop.eup %5216 }
 0x30c   : > { %v1483_v17 = vmul.f32 %v1471_v31, %v6372_v11  ;;  %v5219_v9 = vpop.eup %5218 }
 0x30d   : > { %v1472_v27 = vadd.f32 0.5, %v1470_v32  ;;  %v1486_v44 = vmul.f32 %v5217_v24, %v1464_v36  ;;  %v5221_v12 = vpop.eup %5220  ;;  %v1479_v13 = vmul.f32 0.5, %v5219_v9 }
 0x30e   : > { %v6425_v33 = vadd.f32 %v1485_v14, %v1483_v17  ;;  %v1480_v11 = vmul.f32 0.5, %v5221_v12 }
 0x30f   : > { %v1484_v62 = vmul.f32 %v1472_v27, %v6375_v22  ;;  %v1481_v53 = vadd.f32 0.5, %v1479_v13 }
 0x310   : > { %5222 = vtanh.f32 %v6425_v33  ;;  %v1482_v26 = vadd.f32 0.5, %v1480_v11 }
 0x311   : > { %v6429_v8 = vadd.f32 %v1486_v44, %v1484_v62 }
 0x313   : > { %5224 = vtanh.f32 %v6429_v8 }
 0x31a   : > { %v5223_v7 = vpop.eup %5222 }
 0x31b   : > { %v1491_v29 = vmul.f32 %v5223_v7, %v1481_v53 }
 0x31d   : > { %v5225_v23 = vpop.eup %5224 }
 0x31e   : > { %v1492_v31 = vmul.f32 %v5225_v23, %v1482_v26 }
 0x320   : > { %v6432_v28 = vpack.c.bf16 %v1492_v31, %v1491_v29 }
 0x322   : > { %1536 = vmatmul.mubr.bf16.vlgmr.msra.gmra.mrb[8].mxu0 %v6432_v28  ;;  %1579 = vmatmul.mubr.bf16.vlgmr.msra.gmra.mrb[8].mxu1 %v6432_v28 }
 0x323   : > { %1644 = vmatpush1.bf16.msra.mxu0 %v6188_v37  ;;  %1687 = vmatpush1.bf16.msra.mxu1 %v6194_v39 }
 0x324   : > { %1645 = vmatprep.subr.bf16.mxu0 %v6192_v38  ;;  %1688 = vmatprep.subr.bf16.mxu1 %v6196_v40 }
 0x325   : > { %1675 = vmatprep.mubr.bf16.mxu0 %v5853_v3  ;;  %1718 = vmatprep.mubr.bf16.mxu1 %v5853_v3 }
 0x327   : > { %1646 = vmatpush1.bf16.msra.mxu0 %v6200_v41  ;;  %1689 = vmatpush1.bf16.msra.mxu1 %v6207_v43 }
 0x328   : > { %1647 = vmatprep.subr.bf16.mxu0 %v6204_v42  ;;  %1690 = vmatprep.subr.bf16.mxu1 %v6215_v46 }
 0x32b   : > { %1648 = vmatpush1.bf16.msra.mxu0 %v6213_v45  ;;  %1691 = vmatpush1.bf16.msra.mxu1 %v6220_v48 }
 0x32c   : > { %1649 = vmatprep.subr.bf16.mxu0 %v6217_v47  ;;  %1692 = vmatprep.subr.bf16.mxu1 %v6222_v49 }
 0x32f   : > { %1650 = vmatpush1.bf16.msra.mxu0 %v6228_v50  ;;  %1693 = vmatpush1.bf16.msra.mxu1 %v6234_v52 }
 0x330   : > { %1651 = vmatprep.subr.bf16.mxu0 %v6230_v51  ;;  %1694 = vmatprep.subr.bf16.mxu1 %v6241_v55 }
 0x333   : > { %1652 = vmatpush1.bf16.msra.mxu0 %v6238_v54  ;;  %1695 = vmatpush1.bf16.msra.mxu1 %v6247_v57 }
 0x334   : > { %1653 = vmatprep.subr.bf16.mxu0 %v6245_v56  ;;  %1696 = vmatprep.subr.bf16.mxu1 %v6251_v59 }
 0x337   : > { %1654 = vmatpush1.bf16.msra.mxu0 %v6249_v58  ;;  %1697 = vmatpush1.bf16.msra.mxu1 %v6257_v61 }
 0x338   : > { %1655 = vmatprep.subr.bf16.mxu0 %v6255_v60  ;;  %1698 = vmatprep.subr.bf16.mxu1 %v6267_v0 }
 0x33b   : > { %1656 = vmatpush1.bf16.msra.mxu0 %v6265_v63  ;;  %1699 = vmatpush1.bf16.msra.mxu1 %v6271_v2 }
 0x33c   : > { %1657 = vmatprep.subr.bf16.mxu0 %v6269_v1  ;;  %1700 = vmatprep.subr.bf16.mxu1 %v6274_v4 }
 0x33f   : > { %1658 = vmatpush1.bf16.msra.mxu0 %v6278_v5  ;;  %1701 = vmatpush1.bf16.msra.mxu1 %v6282_v6 }
 0x340   : > { %1783 = vmatprep.subr.bf16.mxu0 %v6183_v34  ;;  %1826 = vmatprep.subr.bf16.mxu1 %v6185_v35 }
 0x3f5   : > { %v1537_v37 = vpop.f32.mrb[8].mxu0  ;;  %v1580_v22 = vpop.f32.mrb[8].mxu1 }
 0x3f6   : > { %v4615_v14 = vadd.f32 %v1537_v37, %v6348_v19  ;;  %v1539_v17 = vpop.f32.mrb[9].mxu0  ;;  %v1582_v36 = vpop.f32.mrb[9].mxu1  ;;  %v4647_v35 = vadd.f32 %v1580_v22, %v6358_v25 }
 0x3f7   : > { %v4616_v32 = vadd.f32 %v1539_v17, %v6353_v21  ;;  %v1541_v24 = vpop.f32.mrb[10].mxu0  ;;  %v1584_v27 = vpop.f32.mrb[10].mxu1  ;;  %v4648_v26 = vadd.f32 %v1582_v36, %v6367_v10 }
 0x3f8   : > { %v1597_v44 = vmul.f32 0.5, %v4615_v14  ;;  %v4617_v62 = vadd.f32 %v1541_v24, %v6348_v19  ;;  %v1543_v9 = vpop.f32.mrb[11].mxu0  ;;  %v1586_v12 = vpop.f32.mrb[11].mxu1  ;;  %v4649_v53 = vadd.f32 %v1584_v27, %v6358_v25 }
 0x3f9   : > { %v1605_v13 = vmul.f32 0.5, %v4616_v32  ;;  %v4618_v34 = vadd.f32 %v1543_v9, %v6353_v21  ;;  %v4650_v23 = vadd.f32 %v1586_v12, %v6367_v10  ;;  %v1615_v14 = vmul.f32 0.5, %v4648_v26 }
 0x3fa   : > { %5226 = vtanh.f32 %v1597_v44  ;;  %v1598_v11 = vmul.f32 0.5, %v4617_v62 }
 0x3fb   : > { %5228 = vtanh.f32 %v1605_v13  ;;  %v1606_v7 = vmul.f32 0.5, %v4618_v34  ;;  %v1616_v32 = vmul.f32 0.5, %v4650_v23 }
 0x3fc   : > { %5230 = vtanh.f32 %v1598_v11 }
 0x3fd   : > { %5232 = vtanh.f32 %v4647_v35 }
 0x3fe   : > { %5234 = vtanh.f32 %v1606_v7 }
 0x3ff   : > { %5236 = vtanh.f32 %v4649_v53 }
 0x400   : > { %5238 = vtanh.f32 %v1615_v14 }
 0x401   : > { %5240 = vtanh.f32 %v1616_v32 }
 0x404   : > { %v5227_v29 = vpop.eup %5226 }
 0x405   : > { %v5229_v31 = vpop.eup %5228  ;;  %v1601_v37 = vmul.f32 0.5, %v5227_v29 }
 0x406   : > { %v1609_v17 = vmul.f32 0.5, %v5229_v31  ;;  %v5231_v22 = vpop.eup %5230 }
 0x407   : > { %v1603_v24 = vadd.f32 0.5, %v1601_v37  ;;  %v5233_v44 = vpop.eup %5232  ;;  %v1602_v9 = vmul.f32 0.5, %v5231_v22 }
 0x408   : > { %v1611_v62 = vadd.f32 0.5, %v1609_v17  ;;  %v5235_v13 = vpop.eup %5234 }
 0x409   : > { %v1625_v27 = vmul.f32 %v5233_v44, %v1603_v24  ;;  %v1604_v36 = vadd.f32 0.5, %v1602_v9  ;;  %v1610_v35 = vmul.f32 0.5, %v5235_v13  ;;  %v5237_v12 = vpop.eup %5236 }
 0x40a   : > { %v1623_v34 = vmul.f32 %v1611_v62, %v6425_v33  ;;  %v5239_v29 = vpop.eup %5238 }
 0x40b   : > { %v1612_v7 = vadd.f32 0.5, %v1610_v35  ;;  %v1626_v53 = vmul.f32 %v5237_v12, %v1604_v36  ;;  %v5241_v31 = vpop.eup %5240  ;;  %v1619_v37 = vmul.f32 0.5, %v5239_v29 }
 0x40c   : > { %v6479_v11 = vadd.f32 %v1625_v27, %v1623_v34  ;;  %v1620_v33 = vmul.f32 0.5, %v5241_v31 }
 0x40d   : > { %v1624_v26 = vmul.f32 %v1612_v7, %v6429_v8  ;;  %v1621_v17 = vadd.f32 0.5, %v1619_v37  ;;  %v6490_v8 = vld [vmem:[#allocation13] ss:$16 sps:$4 sm:$0xff]  }
 0x40e   : > { %5242 = vtanh.f32 %v6479_v11  ;;  %v1622_v32 = vadd.f32 0.5, %v1620_v33 }
 0x40f   : > { %v6483_v23 = vadd.f32 %v1626_v53, %v1624_v26 }
 0x411   : > { %5244 = vtanh.f32 %v6483_v23 }
 0x418   : > { %v5243_v14 = vpop.eup %5242 }
 0x419   : > { %v1631_v24 = vmul.f32 %v5243_v14, %v1621_v17 }
 0x41b   : > { %v5245_v22 = vpop.eup %5244 }
 0x41c   : > { %v1632_v44 = vmul.f32 %v5245_v22, %v1622_v32 }
 0x41e   : > { %v6486_v62 = vpack.c.bf16 %v1632_v44, %v1631_v24 }
 0x420   : > { %1676 = vmatmul.mubr.bf16.vlgmr.msra.gmra.mrb[12].mxu0 %v6486_v62  ;;  %1719 = vmatmul.mubr.bf16.vlgmr.msra.gmra.mrb[12].mxu1 %v6486_v62 }
 0x421   : > { %1784 = vmatpush1.bf16.msra.mxu0 %v6490_v8  ;;  %1827 = vmatpush1.bf16.msra.mxu1 %v6194_v39  ;;  %v6527_v39 = vld [vmem:[#allocation13 + $0xc] ss:$16 sps:$4 sm:$0xff]  }
 0x422   : > { %1785 = vmatprep.subr.bf16.mxu0 %v6192_v38  ;;  %1828 = vmatprep.subr.bf16.mxu1 %v6196_v40  ;;  %v6524_v38 = vld [vmem:[#allocation13 + $0x4] ss:$16 sps:$4 sm:$0xff]  }
 0x423   : > { %1815 = vmatprep.mubr.bf16.mxu0 %v5853_v3  ;;  %1858 = vmatprep.mubr.bf16.mxu1 %v5853_v3 }
 0x425   : > { %1786 = vmatpush1.bf16.msra.mxu0 %v6200_v41  ;;  %1829 = vmatpush1.bf16.msra.mxu1 %v6207_v43 }
 0x426   : > { %1787 = vmatprep.subr.bf16.mxu0 %v6204_v42  ;;  %1830 = vmatprep.subr.bf16.mxu1 %v6215_v46 }
 0x429   : > { %1788 = vmatpush1.bf16.msra.mxu0 %v6213_v45  ;;  %1831 = vmatpush1.bf16.msra.mxu1 %v6220_v48 }
 0x42a   : > { %1789 = vmatprep.subr.bf16.mxu0 %v6217_v47  ;;  %1832 = vmatprep.subr.bf16.mxu1 %v6222_v49 }
 0x42d   : > { %1790 = vmatpush1.bf16.msra.mxu0 %v6228_v50  ;;  %1833 = vmatpush1.bf16.msra.mxu1 %v6234_v52 }
 0x42e   : > { %1791 = vmatprep.subr.bf16.mxu0 %v6230_v51  ;;  %1834 = vmatprep.subr.bf16.mxu1 %v6241_v55 }
 0x431   : > { %1792 = vmatpush1.bf16.msra.mxu0 %v6238_v54  ;;  %1835 = vmatpush1.bf16.msra.mxu1 %v6247_v57 }
 0x432   : > { %1793 = vmatprep.subr.bf16.mxu0 %v6245_v56  ;;  %1836 = vmatprep.subr.bf16.mxu1 %v6251_v59 }
 0x435   : > { %1794 = vmatpush1.bf16.msra.mxu0 %v6249_v58  ;;  %1837 = vmatpush1.bf16.msra.mxu1 %v6257_v61 }
 0x436   : > { %1795 = vmatprep.subr.bf16.mxu0 %v6255_v60  ;;  %1838 = vmatprep.subr.bf16.mxu1 %v6267_v0 }
 0x439   : > { %1796 = vmatpush1.bf16.msra.mxu0 %v6265_v63  ;;  %1839 = vmatpush1.bf16.msra.mxu1 %v6271_v2 }
 0x43a   : > { %1797 = vmatprep.subr.bf16.mxu0 %v6269_v1  ;;  %1840 = vmatprep.subr.bf16.mxu1 %v6274_v4 }
 0x43d   : > { %1798 = vmatpush1.bf16.msra.mxu0 %v6278_v5  ;;  %1841 = vmatpush1.bf16.msra.mxu1 %v6282_v6 }
 0x43e   : > { %1923 = vmatprep.subr.bf16.mxu0 %v6524_v38  ;;  %1966 = vmatprep.subr.bf16.mxu1 %v6527_v39 }
 0x4f3   : > { %v1677_v40 = vpop.f32.mrb[12].mxu0  ;;  %v1720_v41 = vpop.f32.mrb[12].mxu1 }
 0x4f4   : > { %v4619_v42 = vadd.f32 %v1677_v40, %v6348_v19  ;;  %v1679_v43 = vpop.f32.mrb[13].mxu0  ;;  %v1722_v45 = vpop.f32.mrb[13].mxu1  ;;  %v4651_v56 = vadd.f32 %v1720_v41, %v6358_v25 }
 0x4f5   : > { %v4620_v46 = vadd.f32 %v1679_v43, %v6353_v21  ;;  %v1681_v47 = vpop.f32.mrb[14].mxu0  ;;  %v1724_v48 = vpop.f32.mrb[14].mxu1  ;;  %v4652_v60 = vadd.f32 %v1722_v45, %v6367_v10 }
 0x4f6   : > { %v1737_v49 = vmul.f32 0.5, %v4619_v42  ;;  %v4621_v50 = vadd.f32 %v1681_v47, %v6348_v19  ;;  %v1683_v51 = vpop.f32.mrb[15].mxu0  ;;  %v1726_v52 = vpop.f32.mrb[15].mxu1  ;;  %v4653_v59 = vadd.f32 %v1724_v48, %v6358_v25  ;;  %v6557_v47 = vld [vmem:[#allocation13 + $0x2c] ss:$16 sps:$4 sm:$0xff]  }
 0x4f7   : > { %v1745_v54 = vmul.f32 0.5, %v4620_v46  ;;  %v4622_v55 = vadd.f32 %v1683_v51, %v6353_v21  ;;  %v4654_v61 = vadd.f32 %v1726_v52, %v6367_v10  ;;  %v1755_v2 = vmul.f32 0.5, %v4652_v60  ;;  %v6554_v46 = vld [vmem:[#allocation13 + $0x24] ss:$16 sps:$4 sm:$0xff]   ;;  %v6562_v48 = vld [vmem:[#allocation13 + $0x20] ss:$16 sps:$4 sm:$0xff]  }
 0x4f8   : > { %5246 = vtanh.f32 %v1737_v49  ;;  %v1738_v57 = vmul.f32 0.5, %v4621_v50  ;;  %v6565_v49 = vld [vmem:[#allocation13 + $0x28] ss:$16 sps:$4 sm:$0xff]   ;;  %v6568_v50 = vld [vmem:[#allocation13 + $0x44] ss:$16 sps:$4 sm:$0xff]  }
 0x4f9   : > { %5248 = vtanh.f32 %v1745_v54  ;;  %v1746_v58 = vmul.f32 0.5, %v4622_v55  ;;  %v1756_v5 = vmul.f32 0.5, %v4654_v61  ;;  %v6571_v51 = vld [vmem:[#allocation13 + $0x4c] ss:$16 sps:$4 sm:$0xff]   ;;  %v6574_v52 = vld [vmem:[#allocation13 + $0x40] ss:$16 sps:$4 sm:$0xff]  }
 0x4fa   : > { %5250 = vtanh.f32 %v1738_v57  ;;  %v6577_v54 = vld [vmem:[#allocation13 + $0x48] ss:$16 sps:$4 sm:$0xff]   ;;  %v6580_v55 = vld [vmem:[#allocation13 + $0x64] ss:$16 sps:$4 sm:$0xff]   ;;  %v6586_v57 = vld [vmem:[#allocation13 + $0x60] ss:$16 sps:$4 sm:$0xff]  }
 0x4fb   : > { %5252 = vtanh.f32 %v4651_v56  ;;  %v6583_v56 = vld [vmem:[#allocation13 + $0x6c] ss:$16 sps:$4 sm:$0xff]   ;;  %v6598_v61 = vld [vmem:[#allocation13 + $0x80] ss:$16 sps:$4 sm:$0xff]  }
 0x4fc   : > { %5254 = vtanh.f32 %v1746_v58  ;;  %v6589_v58 = vld [vmem:[#allocation13 + $0x68] ss:$16 sps:$4 sm:$0xff]   ;;  %v6595_v60 = vld [vmem:[#allocation13 + $0x8c] ss:$16 sps:$4 sm:$0xff]  }
 0x4fd   : > { %5256 = vtanh.f32 %v4653_v59  ;;  %v6592_v59 = vld [vmem:[#allocation13 + $0x84] ss:$16 sps:$4 sm:$0xff]  }
 0x4fe   : > { %5258 = vtanh.f32 %v1755_v2  ;;  %v6610_v2 = vld [vmem:[#allocation13 + $0xa0] ss:$16 sps:$4 sm:$0xff]  }
 0x4ff   : > { %5260 = vtanh.f32 %v1756_v5  ;;  %v6616_v5 = vld [vmem:[#allocation13 + $0xc4] ss:$16 sps:$4 sm:$0xff]  }
 0x502   : > { %v5247_v63 = vpop.eup %5246 }
 0x503   : > { %v5249_v0 = vpop.eup %5248  ;;  %v1741_v1 = vmul.f32 0.5, %v5247_v63  ;;  %v6601_v63 = vld [vmem:[#allocation13 + $0x88] ss:$16 sps:$4 sm:$0xff]  }
 0x504   : > { %v1749_v4 = vmul.f32 0.5, %v5249_v0  ;;  %v5251_v6 = vpop.eup %5250  ;;  %v6604_v0 = vld [vmem:[#allocation13 + $0xa4] ss:$16 sps:$4 sm:$0xff]  }
 0x505   : > { %v1743_v9 = vadd.f32 0.5, %v1741_v1  ;;  %v5253_v13 = vpop.eup %5252  ;;  %v1742_v34 = vmul.f32 0.5, %v5251_v6  ;;  %v6607_v1 = vld [vmem:[#allocation13 + $0xac] ss:$16 sps:$4 sm:$0xff]  }
 0x506   : > { %v1751_v27 = vadd.f32 0.5, %v1749_v4  ;;  %v5255_v36 = vpop.eup %5254  ;;  %v6613_v4 = vld [vmem:[#allocation13 + $0xa8] ss:$16 sps:$4 sm:$0xff]   ;;  %v6619_v6 = vld [vmem:[#allocation13 + $0xcc] ss:$16 sps:$4 sm:$0xff]  }
 0x507   : > { %v1765_v35 = vmul.f32 %v5253_v13, %v1743_v9  ;;  %v1744_v7 = vadd.f32 0.5, %v1742_v34  ;;  %v1750_v53 = vmul.f32 0.5, %v5255_v36  ;;  %v5257_v26 = vpop.eup %5256  ;;  %v6622_v9 = vld [vmem:[#allocation13 + $0xc0] ss:$16 sps:$4 sm:$0xff]   ;;  %v6625_v13 = vld [vmem:[#allocation13 + $0xc8] ss:$16 sps:$4 sm:$0xff]  }
 0x508   : > { %v1763_v12 = vmul.f32 %v1751_v27, %v6479_v11  ;;  %v5259_v17 = vpop.eup %5258  ;;  %v6628_v27 = vld [vmem:[#allocation13 + $0xe4] ss:$16 sps:$4 sm:$0xff]   ;;  %v6631_v34 = vld [vmem:[#allocation13 + $0xec] ss:$16 sps:$4 sm:$0xff]   ;;  %v6634_v36 = vld [vmem:[#allocation13 + $0xe0] ss:$16 sps:$4 sm:$0xff]  }
 0x509   : > { %v1752_v31 = vadd.f32 0.5, %v1750_v53  ;;  %v1766_v37 = vmul.f32 %v5257_v26, %v1744_v7  ;;  %v5261_v32 = vpop.eup %5260  ;;  %v1759_v22 = vmul.f32 0.5, %v5259_v17 }
 0x50a   : > { %v6539_v29 = vadd.f32 %v1765_v35, %v1763_v12  ;;  %v1760_v11 = vmul.f32 0.5, %v5261_v32  ;;  %v6637_v35 = vld [vmem:[#allocation13 + $0xe8] ss:$16 sps:$4 sm:$0xff]  }
 0x50b   : > { %v1764_v33 = vmul.f32 %v1752_v31, %v6483_v23  ;;  %v1761_v44 = vadd.f32 0.5, %v1759_v22  ;;  %v6551_v23 = vld [vmem:[#allocation13 + $0x8] ss:$16 sps:$4 sm:$0xff]  }
 0x50c   : > { %5262 = vtanh.f32 %v6539_v29  ;;  %v1762_v40 = vadd.f32 0.5, %v1760_v11 }
 0x50d   : > { %v6543_v14 = vadd.f32 %v1766_v37, %v1764_v33 }
 0x50f   : > { %5264 = vtanh.f32 %v6543_v14 }
 0x516   : > { %v5263_v24 = vpop.eup %5262 }
 0x517   : > { %v1771_v42 = vmul.f32 %v5263_v24, %v1761_v44 }
 0x519   : > { %v5265_v41 = vpop.eup %5264 }
 0x51a   : > { %v1772_v43 = vmul.f32 %v5265_v41, %v1762_v40 }
 0x51c   : > { %v6546_v45 = vpack.c.bf16 %v1772_v43, %v1771_v42 }
 0x51e   : > { %1816 = vmatmul.mubr.bf16.vlgmr.msra.gmra.mrb[16].mxu0 %v6546_v45  ;;  %1859 = vmatmul.mubr.bf16.vlgmr.msra.gmra.mrb[16].mxu1 %v6546_v45 }
 0x51f   : > { %1924 = vmatpush1.bf16.msra.mxu0 %v6490_v8  ;;  %1967 = vmatpush1.bf16.msra.mxu1 %v6551_v23 }
 0x520   : > { %1925 = vmatprep.subr.bf16.mxu0 %v6554_v46  ;;  %1968 = vmatprep.subr.bf16.mxu1 %v6557_v47 }
 0x521   : > { %1955 = vmatprep.mubr.bf16.mxu0 %v5853_v3  ;;  %1998 = vmatprep.mubr.bf16.mxu1 %v5853_v3 }
 0x523   : > { %1926 = vmatpush1.bf16.msra.mxu0 %v6562_v48  ;;  %1969 = vmatpush1.bf16.msra.mxu1 %v6565_v49 }
 0x524   : > { %1927 = vmatprep.subr.bf16.mxu0 %v6568_v50  ;;  %1970 = vmatprep.subr.bf16.mxu1 %v6571_v51 }
 0x527   : > { %1928 = vmatpush1.bf16.msra.mxu0 %v6574_v52  ;;  %1971 = vmatpush1.bf16.msra.mxu1 %v6577_v54 }
 0x528   : > { %1929 = vmatprep.subr.bf16.mxu0 %v6580_v55  ;;  %1972 = vmatprep.subr.bf16.mxu1 %v6583_v56 }
 0x52b   : > { %1930 = vmatpush1.bf16.msra.mxu0 %v6586_v57  ;;  %1973 = vmatpush1.bf16.msra.mxu1 %v6589_v58 }
 0x52c   : > { %1931 = vmatprep.subr.bf16.mxu0 %v6592_v59  ;;  %1974 = vmatprep.subr.bf16.mxu1 %v6595_v60 }
 0x52f   : > { %1932 = vmatpush1.bf16.msra.mxu0 %v6598_v61  ;;  %1975 = vmatpush1.bf16.msra.mxu1 %v6601_v63 }
 0x530   : > { %1933 = vmatprep.subr.bf16.mxu0 %v6604_v0  ;;  %1976 = vmatprep.subr.bf16.mxu1 %v6607_v1 }
 0x533   : > { %1934 = vmatpush1.bf16.msra.mxu0 %v6610_v2  ;;  %1977 = vmatpush1.bf16.msra.mxu1 %v6613_v4 }
 0x534   : > { %1935 = vmatprep.subr.bf16.mxu0 %v6616_v5  ;;  %1978 = vmatprep.subr.bf16.mxu1 %v6619_v6 }
 0x537   : > { %1936 = vmatpush1.bf16.msra.mxu0 %v6622_v9  ;;  %1979 = vmatpush1.bf16.msra.mxu1 %v6625_v13 }
 0x538   : > { %1937 = vmatprep.subr.bf16.mxu0 %v6628_v27  ;;  %1980 = vmatprep.subr.bf16.mxu1 %v6631_v34 }
 0x53b   : > { %1938 = vmatpush1.bf16.msra.mxu0 %v6634_v36  ;;  %1981 = vmatpush1.bf16.msra.mxu1 %v6637_v35 }
 0x53c   : > { %2063 = vmatprep.subr.bf16.mxu0 %v6524_v38  ;;  %2106 = vmatprep.subr.bf16.mxu1 %v6527_v39 }
 0x5f1   : > { %v1817_v12 = vpop.f32.mrb[16].mxu0  ;;  %v1860_v7 = vpop.f32.mrb[16].mxu1 }
 0x5f2   : > { %v4623_v53 = vadd.f32 %v1817_v12, %v6348_v19  ;;  %v1819_v26 = vpop.f32.mrb[17].mxu0  ;;  %v1862_v31 = vpop.f32.mrb[17].mxu1  ;;  %v4655_v41 = vadd.f32 %v1860_v7, %v6358_v25 }
 0x5f3   : > { %v4624_v37 = vadd.f32 %v1819_v26, %v6353_v21  ;;  %v1821_v33 = vpop.f32.mrb[18].mxu0  ;;  %v1864_v17 = vpop.f32.mrb[18].mxu1 }
 0x5f4   : > { %v1877_v32 = vmul.f32 0.5, %v4623_v53  ;;  %v4625_v22 = vadd.f32 %v1821_v33, %v6348_v19  ;;  %v1823_v11 = vpop.f32.mrb[19].mxu0  ;;  %v1866_v24 = vpop.f32.mrb[19].mxu1  ;;  %v4657_v12 = vadd.f32 %v1864_v17, %v6358_v25  ;;  %v4656_v53 = vadd.f32 %v1862_v31, %v6367_v10 }
 0x5f5   : > { %v1885_v44 = vmul.f32 0.5, %v4624_v37  ;;  %v4626_v40 = vadd.f32 %v1823_v11, %v6353_v21  ;;  %v4658_v26 = vadd.f32 %v1866_v24, %v6367_v10 }
 0x5f6   : > { %5266 = vtanh.f32 %v1877_v32  ;;  %v1878_v42 = vmul.f32 0.5, %v4625_v22  ;;  %v1895_v11 = vmul.f32 0.5, %v4656_v53 }
 0x5f7   : > { %5268 = vtanh.f32 %v1885_v44  ;;  %v1886_v43 = vmul.f32 0.5, %v4626_v40  ;;  %v1896_v18 = vmul.f32 0.5, %v4658_v26 }
 0x5f8   : > { %5270 = vtanh.f32 %v1878_v42 }
 0x5f9   : > { %5272 = vtanh.f32 %v4655_v41 }
 0x5fa   : > { %5274 = vtanh.f32 %v1886_v43 }
 0x5fb   : > { %5276 = vtanh.f32 %v4657_v12 }
 0x5fc   : > { %5278 = vtanh.f32 %v1895_v11 }
 0x5fd   : > { %5280 = vtanh.f32 %v1896_v18 }
 0x600   : > { %v5267_v33 = vpop.eup %5266 }
 0x601   : > { %v5269_v37 = vpop.eup %5268  ;;  %v1881_v20 = vmul.f32 0.5, %v5267_v33 }
 0x602   : > { %v1889_v32 = vmul.f32 0.5, %v5269_v37  ;;  %v5271_v7 = vpop.eup %5270 }
 0x603   : > { %v1883_v22 = vadd.f32 0.5, %v1881_v20  ;;  %v5273_v44 = vpop.eup %5272  ;;  %v1882_v42 = vmul.f32 0.5, %v5271_v7 }
 0x604   : > { %v1891_v40 = vadd.f32 0.5, %v1889_v32  ;;  %v5275_v16 = vpop.eup %5274 }
 0x605   : > { %v1905_v17 = vmul.f32 %v5273_v44, %v1883_v22  ;;  %v1884_v31 = vadd.f32 0.5, %v1882_v42  ;;  %v1890_v43 = vmul.f32 0.5, %v5275_v16  ;;  %v5277_v24 = vpop.eup %5276 }
 0x606   : > { %v1903_v41 = vmul.f32 %v1891_v40, %v6539_v29  ;;  %v5279_v37 = vpop.eup %5278 }
 0x607   : > { %v1892_v33 = vadd.f32 0.5, %v1890_v43  ;;  %v1906_v53 = vmul.f32 %v5277_v24, %v1884_v31  ;;  %v5281_v11 = vpop.eup %5280  ;;  %v1899_v32 = vmul.f32 0.5, %v5279_v37 }
 0x608   : > { %v6651_v12 = vadd.f32 %v1905_v17, %v1903_v41  ;;  %v1900_v29 = vmul.f32 0.5, %v5281_v11 }
 0x609   : > { %v1904_v26 = vmul.f32 %v1892_v33, %v6543_v14  ;;  %v1901_v16 = vadd.f32 0.5, %v1899_v32 }
 0x60a   : > { %5282 = vtanh.f32 %v6651_v12  ;;  %v1902_v18 = vadd.f32 0.5, %v1900_v29 }
 0x60b   : > { %v6655_v20 = vadd.f32 %v1906_v53, %v1904_v26 }
 0x60d   : > { %5284 = vtanh.f32 %v6655_v20 }
 0x614   : > { %v5283_v7 = vpop.eup %5282 }
 0x615   : > { %v1911_v44 = vmul.f32 %v5283_v7, %v1901_v16 }
 0x617   : > { %v5285_v22 = vpop.eup %5284 }
 0x618   : > { %v1912_v40 = vmul.f32 %v5285_v22, %v1902_v18 }
 0x61a   : > { %v6658_v42 = vpack.c.bf16 %v1912_v40, %v1911_v44 }
 0x61c   : > { %1956 = vmatmul.mubr.bf16.vlgmr.msra.gmra.mrb[20].mxu0 %v6658_v42  ;;  %1999 = vmatmul.mubr.bf16.vlgmr.msra.gmra.mrb[20].mxu1 %v6658_v42 }
 0x61d   : > { %2064 = vmatpush1.bf16.msra.mxu0 %v6490_v8  ;;  %2107 = vmatpush1.bf16.msra.mxu1 %v6551_v23 }
 0x61e   : > { %2065 = vmatprep.subr.bf16.mxu0 %v6554_v46  ;;  %2108 = vmatprep.subr.bf16.mxu1 %v6557_v47 }
 0x61f   : > { %2095 = vmatprep.mubr.bf16.mxu0 %v5853_v3  ;;  %2138 = vmatprep.mubr.bf16.mxu1 %v5853_v3 }
 0x621   : > { %2066 = vmatpush1.bf16.msra.mxu0 %v6562_v48  ;;  %2109 = vmatpush1.bf16.msra.mxu1 %v6565_v49 }
 0x622   : > { %2067 = vmatprep.subr.bf16.mxu0 %v6568_v50  ;;  %2110 = vmatprep.subr.bf16.mxu1 %v6571_v51 }
 0x625   : > { %2068 = vmatpush1.bf16.msra.mxu0 %v6574_v52  ;;  %2111 = vmatpush1.bf16.msra.mxu1 %v6577_v54 }
 0x626   : > { %2069 = vmatprep.subr.bf16.mxu0 %v6580_v55  ;;  %2112 = vmatprep.subr.bf16.mxu1 %v6583_v56 }
 0x629   : > { %2070 = vmatpush1.bf16.msra.mxu0 %v6586_v57  ;;  %2113 = vmatpush1.bf16.msra.mxu1 %v6589_v58 }
 0x62a   : > { %2071 = vmatprep.subr.bf16.mxu0 %v6592_v59  ;;  %2114 = vmatprep.subr.bf16.mxu1 %v6595_v60 }
 0x62d   : > { %2072 = vmatpush1.bf16.msra.mxu0 %v6598_v61  ;;  %2115 = vmatpush1.bf16.msra.mxu1 %v6601_v63 }
 0x62e   : > { %2073 = vmatprep.subr.bf16.mxu0 %v6604_v0  ;;  %2116 = vmatprep.subr.bf16.mxu1 %v6607_v1 }
 0x631   : > { %2074 = vmatpush1.bf16.msra.mxu0 %v6610_v2  ;;  %2117 = vmatpush1.bf16.msra.mxu1 %v6613_v4 }
 0x632   : > { %2075 = vmatprep.subr.bf16.mxu0 %v6616_v5  ;;  %2118 = vmatprep.subr.bf16.mxu1 %v6619_v6 }
 0x635   : > { %2076 = vmatpush1.bf16.msra.mxu0 %v6622_v9  ;;  %2119 = vmatpush1.bf16.msra.mxu1 %v6625_v13 }
 0x636   : > { %2077 = vmatprep.subr.bf16.mxu0 %v6628_v27  ;;  %2120 = vmatprep.subr.bf16.mxu1 %v6631_v34 }
 0x639   : > { %2078 = vmatpush1.bf16.msra.mxu0 %v6634_v36  ;;  %2121 = vmatpush1.bf16.msra.mxu1 %v6637_v35 }
 0x63a   : > { %2203 = vmatprep.subr.bf16.mxu0 %v6524_v38  ;;  %2246 = vmatprep.subr.bf16.mxu1 %v6527_v39 }
 0x6ef   : > { %v1957_v14 = vpop.f32.mrb[20].mxu0  ;;  %v2000_v17 = vpop.f32.mrb[20].mxu1 }
 0x6f0   : > { %v4627_v41 = vadd.f32 %v1957_v14, %v6348_v19  ;;  %v1959_v31 = vpop.f32.mrb[21].mxu0  ;;  %v2002_v43 = vpop.f32.mrb[21].mxu1  ;;  %v4659_v39 = vadd.f32 %v2000_v17, %v6358_v25 }
 0x6f1   : > { %v4628_v24 = vadd.f32 %v1959_v31, %v6353_v21  ;;  %v1961_v33 = vpop.f32.mrb[22].mxu0  ;;  %v2004_v53 = vpop.f32.mrb[22].mxu1  ;;  %v4660_v22 = vadd.f32 %v2002_v43, %v6367_v10 }
 0x6f2   : > { %v2017_v26 = vmul.f32 0.5, %v4627_v41  ;;  %v4629_v37 = vadd.f32 %v1961_v33, %v6348_v19  ;;  %v1963_v11 = vpop.f32.mrb[23].mxu0  ;;  %v2006_v32 = vpop.f32.mrb[23].mxu1  ;;  %v4661_v18 = vadd.f32 %v2004_v53, %v6358_v25 }
 0x6f3   : > { %v2025_v29 = vmul.f32 0.5, %v4628_v24  ;;  %v4630_v38 = vadd.f32 %v1963_v11, %v6353_v21  ;;  %v4662_v44 = vadd.f32 %v2006_v32, %v6367_v10  ;;  %v2035_v31 = vmul.f32 0.5, %v4660_v22 }
 0x6f4   : > { %5286 = vtanh.f32 %v2017_v26  ;;  %v2018_v7 = vmul.f32 0.5, %v4629_v37 }
 0x6f5   : > { %5288 = vtanh.f32 %v2025_v29  ;;  %v2026_v16 = vmul.f32 0.5, %v4630_v38  ;;  %v2036_v33 = vmul.f32 0.5, %v4662_v44 }
 0x6f6   : > { %5290 = vtanh.f32 %v2018_v7 }
 0x6f7   : > { %5292 = vtanh.f32 %v4659_v39 }
 0x6f8   : > { %5294 = vtanh.f32 %v2026_v16 }
 0x6f9   : > { %5296 = vtanh.f32 %v4661_v18 }
 0x6fa   : > { %5298 = vtanh.f32 %v2035_v31 }
 0x6fb   : > { %5300 = vtanh.f32 %v2036_v33 }
 0x6fe   : > { %v5287_v40 = vpop.eup %5286 }
 0x6ff   : > { %v5289_v14 = vpop.eup %5288  ;;  %v2021_v41 = vmul.f32 0.5, %v5287_v40 }
 0x700   : > { %v2029_v24 = vmul.f32 0.5, %v5289_v14  ;;  %v5291_v17 = vpop.eup %5290 }
 0x701   : > { %v2023_v26 = vadd.f32 0.5, %v2021_v41  ;;  %v5293_v37 = vpop.eup %5292  ;;  %v2022_v29 = vmul.f32 0.5, %v5291_v17 }
 0x702   : > { %v2031_v11 = vadd.f32 0.5, %v2029_v24  ;;  %v5295_v38 = vpop.eup %5294 }
 0x703   : > { %v2045_v53 = vmul.f32 %v5293_v37, %v2023_v26  ;;  %v2024_v43 = vadd.f32 0.5, %v2022_v29  ;;  %v2030_v7 = vmul.f32 0.5, %v5295_v38  ;;  %v5297_v32 = vpop.eup %5296 }
 0x704   : > { %v2043_v39 = vmul.f32 %v2031_v11, %v6651_v12  ;;  %v5299_v14 = vpop.eup %5298 }
 0x705   : > { %v2032_v18 = vadd.f32 0.5, %v2030_v7  ;;  %v2046_v22 = vmul.f32 %v5297_v32, %v2024_v43  ;;  %v5301_v41 = vpop.eup %5300  ;;  %v2039_v31 = vmul.f32 0.5, %v5299_v14 }
 0x706   : > { %v6705_v16 = vadd.f32 %v2045_v53, %v2043_v39  ;;  %v2040_v12 = vmul.f32 0.5, %v5301_v41 }
 0x707   : > { %v2044_v44 = vmul.f32 %v2032_v18, %v6655_v20  ;;  %v2041_v17 = vadd.f32 0.5, %v2039_v31 }
 0x708   : > { %5302 = vtanh.f32 %v6705_v16  ;;  %v2042_v33 = vadd.f32 0.5, %v2040_v12 }
 0x709   : > { %v6709_v40 = vadd.f32 %v2046_v22, %v2044_v44 }
 0x70b   : > { %5304 = vtanh.f32 %v6709_v40 }
 0x712   : > { %v5303_v24 = vpop.eup %5302 }
 0x713   : > { %v2051_v37 = vmul.f32 %v5303_v24, %v2041_v17 }
 0x715   : > { %v5305_v26 = vpop.eup %5304 }
 0x716   : > { %v2052_v11 = vmul.f32 %v5305_v26, %v2042_v33 }
 0x718   : > { %v6712_v29 = vpack.c.bf16 %v2052_v11, %v2051_v37 }
 0x71a   : > { %2096 = vmatmul.mubr.bf16.vlgmr.msra.gmra.mrb[24].mxu0 %v6712_v29  ;;  %2139 = vmatmul.mubr.bf16.vlgmr.msra.gmra.mrb[24].mxu1 %v6712_v29 }
 0x71b   : > { %2204 = vmatpush1.bf16.msra.mxu0 %v6490_v8  ;;  %2247 = vmatpush1.bf16.msra.mxu1 %v6551_v23  ;;  %v5092_v8 = vld [vmem:[#allocation14 + $0x4] ss:$16 sps:$4 sm:$0xff]   ;;  %v5095_v23 = vld [vmem:[#allocation14 + $0xc] ss:$16 sps:$4 sm:$0xff]  }
 0x71c   : > { %2205 = vmatprep.subr.bf16.mxu0 %v6554_v46  ;;  %2248 = vmatprep.subr.bf16.mxu1 %v6557_v47 }
 0x71d   : > { %2235 = vmatprep.mubr.bf16.mxu0 %v5853_v3  ;;  %2278 = vmatprep.mubr.bf16.mxu1 %v5853_v3 }
 0x71f   : > { %2206 = vmatpush1.bf16.msra.mxu0 %v6562_v48  ;;  %2249 = vmatpush1.bf16.msra.mxu1 %v6565_v49 }
 0x720   : > { %2207 = vmatprep.subr.bf16.mxu0 %v6568_v50  ;;  %2250 = vmatprep.subr.bf16.mxu1 %v6571_v51 }
 0x723   : > { %2208 = vmatpush1.bf16.msra.mxu0 %v6574_v52  ;;  %2251 = vmatpush1.bf16.msra.mxu1 %v6577_v54 }
 0x724   : > { %2209 = vmatprep.subr.bf16.mxu0 %v6580_v55  ;;  %2252 = vmatprep.subr.bf16.mxu1 %v6583_v56 }
 0x727   : > { %2210 = vmatpush1.bf16.msra.mxu0 %v6586_v57  ;;  %2253 = vmatpush1.bf16.msra.mxu1 %v6589_v58 }
 0x728   : > { %2211 = vmatprep.subr.bf16.mxu0 %v6592_v59  ;;  %2254 = vmatprep.subr.bf16.mxu1 %v6595_v60 }
 0x72b   : > { %2212 = vmatpush1.bf16.msra.mxu0 %v6598_v61  ;;  %2255 = vmatpush1.bf16.msra.mxu1 %v6601_v63 }
 0x72c   : > { %2213 = vmatprep.subr.bf16.mxu0 %v6604_v0  ;;  %2256 = vmatprep.subr.bf16.mxu1 %v6607_v1 }
 0x72f   : > { %2214 = vmatpush1.bf16.msra.mxu0 %v6610_v2  ;;  %2257 = vmatpush1.bf16.msra.mxu1 %v6613_v4 }
 0x730   : > { %2215 = vmatprep.subr.bf16.mxu0 %v6616_v5  ;;  %2258 = vmatprep.subr.bf16.mxu1 %v6619_v6 }
 0x733   : > { %2216 = vmatpush1.bf16.msra.mxu0 %v6622_v9  ;;  %2259 = vmatpush1.bf16.msra.mxu1 %v6625_v13 }
 0x734   : > { %2217 = vmatprep.subr.bf16.mxu0 %v6628_v27  ;;  %2260 = vmatprep.subr.bf16.mxu1 %v6631_v34 }
 0x737   : > { %2218 = vmatpush1.bf16.msra.mxu0 %v6634_v36  ;;  %2261 = vmatpush1.bf16.msra.mxu1 %v6637_v35 }
 0x738   : > { %2561 = vmatprep.subr.bf16.mxu0 %v5092_v8  ;;  %2674 = vmatprep.subr.bf16.mxu1 %v5095_v23 }
 0x7ed   : > { %v2097_v46 = vpop.f32.mrb[24].mxu0  ;;  %v2140_v47 = vpop.f32.mrb[24].mxu1 }
 0x7ee   : > { %v4631_v48 = vadd.f32 %v2097_v46, %v6348_v19  ;;  %v2099_v49 = vpop.f32.mrb[25].mxu0  ;;  %v2142_v50 = vpop.f32.mrb[25].mxu1  ;;  %v4663_v61 = vadd.f32 %v2140_v47, %v6358_v25  ;;  %v5090_v47 = vld [vmem:[#allocation14] ss:$16 sps:$4 sm:$0xff]  }
 0x7ef   : > { %v4632_v51 = vadd.f32 %v2099_v49, %v6353_v21  ;;  %v2101_v52 = vpop.f32.mrb[26].mxu0  ;;  %v2144_v54 = vpop.f32.mrb[26].mxu1  ;;  %v4664_v2 = vadd.f32 %v2142_v50, %v6367_v10  ;;  %v5101_v50 = vld [vmem:[#allocation14 + $0x2c] ss:$16 sps:$4 sm:$0xff]  }
 0x7f0   : > { %v2157_v55 = vmul.f32 0.5, %v4631_v48  ;;  %v4633_v56 = vadd.f32 %v2101_v52, %v6348_v19  ;;  %v2103_v57 = vpop.f32.mrb[27].mxu0  ;;  %v2146_v58 = vpop.f32.mrb[27].mxu1  ;;  %v4665_v1 = vadd.f32 %v2144_v54, %v6358_v25  ;;  %v5093_v48 = vld [vmem:[#allocation14 + $0x8] ss:$16 sps:$4 sm:$0xff]  }
 0x7f1   : > { %v2165_v59 = vmul.f32 0.5, %v4632_v51  ;;  %v4634_v60 = vadd.f32 %v2103_v57, %v6353_v21  ;;  %v4666_v4 = vadd.f32 %v2146_v58, %v6367_v10  ;;  %v2175_v13 = vmul.f32 0.5, %v4664_v2  ;;  %v5096_v51 = vld [vmem:[#allocation14 + $0x20] ss:$16 sps:$4 sm:$0xff]   ;;  %v5099_v52 = vld [vmem:[#allocation14 + $0x28] ss:$16 sps:$4 sm:$0xff]  }
 0x7f2   : > { %5306 = vtanh.f32 %v2157_v55  ;;  %v2158_v63 = vmul.f32 0.5, %v4633_v56  ;;  %v5104_v54 = vld [vmem:[#allocation14 + $0x44] ss:$16 sps:$4 sm:$0xff]   ;;  %v5107_v55 = vld [vmem:[#allocation14 + $0x4c] ss:$16 sps:$4 sm:$0xff]  }
 0x7f3   : > { %5308 = vtanh.f32 %v2165_v59  ;;  %v2166_v0 = vmul.f32 0.5, %v4634_v60  ;;  %v2176_v34 = vmul.f32 0.5, %v4666_v4  ;;  %v5102_v56 = vld [vmem:[#allocation14 + $0x40] ss:$16 sps:$4 sm:$0xff]   ;;  %v5105_v57 = vld [vmem:[#allocation14 + $0x48] ss:$16 sps:$4 sm:$0xff]  }
 0x7f4   : > { %5310 = vtanh.f32 %v2158_v63  ;;  %v5110_v58 = vld [vmem:[#allocation14 + $0x64] ss:$16 sps:$4 sm:$0xff]   ;;  %v5113_v59 = vld [vmem:[#allocation14 + $0x6c] ss:$16 sps:$4 sm:$0xff]   ;;  %v5108_v60 = vld [vmem:[#allocation14 + $0x60] ss:$16 sps:$4 sm:$0xff]  }
 0x7f5   : > { %5312 = vtanh.f32 %v4663_v61  ;;  %v5111_v61 = vld [vmem:[#allocation14 + $0x68] ss:$16 sps:$4 sm:$0xff]   ;;  %v5116_v63 = vld [vmem:[#allocation14 + $0x84] ss:$16 sps:$4 sm:$0xff]  }
 0x7f6   : > { %5314 = vtanh.f32 %v2166_v0  ;;  %v5119_v0 = vld [vmem:[#allocation14 + $0x8c] ss:$16 sps:$4 sm:$0xff]   ;;  %v5117_v2 = vld [vmem:[#allocation14 + $0x88] ss:$16 sps:$4 sm:$0xff]   ;;  %v5122_v4 = vld [vmem:[#allocation14 + $0xa4] ss:$16 sps:$4 sm:$0xff]  }
 0x7f7   : > { %5316 = vtanh.f32 %v4665_v1  ;;  %v5114_v1 = vld [vmem:[#allocation14 + $0x80] ss:$16 sps:$4 sm:$0xff]  }
 0x7f8   : > { %5318 = vtanh.f32 %v2175_v13  ;;  %v5128_v13 = vld [vmem:[#allocation14 + $0xc4] ss:$16 sps:$4 sm:$0xff]  }
 0x7f9   : > { %5320 = vtanh.f32 %v2176_v34  ;;  %v5126_v34 = vld [vmem:[#allocation14 + $0xc0] ss:$16 sps:$4 sm:$0xff]  }
 0x7fc   : > { %v5307_v5 = vpop.eup %5306 }
 0x7fd   : > { %v5309_v6 = vpop.eup %5308  ;;  %v2161_v9 = vmul.f32 0.5, %v5307_v5  ;;  %v5125_v5 = vld [vmem:[#allocation14 + $0xac] ss:$16 sps:$4 sm:$0xff]  }
 0x7fe   : > { %v2169_v27 = vmul.f32 0.5, %v5309_v6  ;;  %v5311_v36 = vpop.eup %5310  ;;  %v5120_v6 = vld [vmem:[#allocation14 + $0xa0] ss:$16 sps:$4 sm:$0xff]  }
 0x7ff   : > { %v2163_v35 = vadd.f32 0.5, %v2161_v9  ;;  %v5313_v20 = vpop.eup %5312  ;;  %v2162_v53 = vmul.f32 0.5, %v5311_v36  ;;  %v5123_v9 = vld [vmem:[#allocation14 + $0xa8] ss:$16 sps:$4 sm:$0xff]  }
 0x800   : > { %v2171_v38 = vadd.f32 0.5, %v2169_v27  ;;  %v5315_v39 = vpop.eup %5314  ;;  %v5131_v27 = vld [vmem:[#allocation14 + $0xcc] ss:$16 sps:$4 sm:$0xff]   ;;  %v5129_v36 = vld [vmem:[#allocation14 + $0xc8] ss:$16 sps:$4 sm:$0xff]  }
 0x801   : > { %v2185_v43 = vmul.f32 %v5313_v20, %v2163_v35  ;;  %v2164_v32 = vadd.f32 0.5, %v2162_v53  ;;  %v2170_v18 = vmul.f32 0.5, %v5315_v39  ;;  %v5317_v22 = vpop.eup %5316  ;;  %v5134_v35 = vld [vmem:[#allocation14 + $0xe4] ss:$16 sps:$4 sm:$0xff]   ;;  %v5137_v20 = vld [vmem:[#allocation14 + $0xec] ss:$16 sps:$4 sm:$0xff]  }
 0x802   : > { %v2183_v7 = vmul.f32 %v2171_v38, %v6705_v16  ;;  %v5319_v24 = vpop.eup %5318  ;;  %v5132_v38 = vld [vmem:[#allocation14 + $0xe0] ss:$16 sps:$4 sm:$0xff]   ;;  %v5135_v53 = vld [vmem:[#allocation14 + $0xe8] ss:$16 sps:$4 sm:$0xff]   ;;  %v6770_v39 = vld [vmem:[#allocation16 + $0x4] ss:$16 sps:$4 sm:$0xff]  }
 0x803   : > { %v2172_v14 = vadd.f32 0.5, %v2170_v18  ;;  %v2186_v41 = vmul.f32 %v5317_v22, %v2164_v32  ;;  %v5321_v17 = vpop.eup %5320  ;;  %v2179_v33 = vmul.f32 0.5, %v5319_v24  ;;  %v6778_v32 = vld [vmem:[#allocation16 + $0x8] ss:$16 sps:$4 sm:$0xff]   ;;  %v6780_v18 = vld [vmem:[#allocation16 + $0x24] ss:$16 sps:$4 sm:$0xff]  }
 0x804   : > { %v6757_v44 = vadd.f32 %v2185_v43, %v2183_v7  ;;  %v2180_v16 = vmul.f32 0.5, %v5321_v17  ;;  %v6772_v43 = vld [vmem:[#allocation16 + $0xc] ss:$16 sps:$4 sm:$0xff]   ;;  %v6775_v7 = vld [vmem:[#allocation16] ss:$16 sps:$4 sm:$0xff]  }
 0x805   : > { %v2184_v31 = vmul.f32 %v2172_v14, %v6709_v40  ;;  %v2181_v37 = vadd.f32 0.5, %v2179_v33  ;;  %v5098_v40 = vld [vmem:[#allocation14 + $0x24] ss:$16 sps:$4 sm:$0xff]   ;;  %v6788_v22 = vld [vmem:[#allocation16 + $0x20] ss:$16 sps:$4 sm:$0xff]  }
 0x806   : > { %5322 = vtanh.f32 %v6757_v44  ;;  %v2182_v11 = vadd.f32 0.5, %v2180_v16  ;;  %v6831_v14 = vld [vmem:[#allocation16 + $0x48] ss:$16 sps:$4 sm:$0xff]   ;;  %v6844_v17 = vld [vmem:[#allocation16 + $0x84] ss:$16 sps:$4 sm:$0xff]  }
 0x807   : > { %v6761_v12 = vadd.f32 %v2186_v41, %v2184_v31  ;;  %v6834_v41 = vld [vmem:[#allocation16 + $0x6c] ss:$16 sps:$4 sm:$0xff]   ;;  %v6838_v31 = vld [vmem:[#allocation16 + $0x60] ss:$16 sps:$4 sm:$0xff]   ;;  %v6840_v24 = vld [vmem:[#allocation16 + $0x68] ss:$16 sps:$4 sm:$0xff]  }
 0x808   : > { %v6846_v33 = vld [vmem:[#allocation16 + $0x8c] ss:$16 sps:$4 sm:$0xff]   ;;  %v6850_v16 = vld [vmem:[#allocation16 + $0x80] ss:$16 sps:$4 sm:$0xff]  }
 0x809   : > { %5324 = vtanh.f32 %v6761_v12 }
 0x810   : > { %v5323_v26 = vpop.eup %5322 }
 0x811   : > { %v2191_v23 = vmul.f32 %v5323_v26, %v2181_v37  ;;  %v6852_v26 = vld [vmem:[#allocation16 + $0x88] ss:$16 sps:$4 sm:$0xff]   ;;  %v6856_v37 = vld [vmem:[#allocation16 + $0xa4] ss:$16 sps:$4 sm:$0xff]  }
 0x813   : > { %v5325_v8 = vpop.eup %5324 }
 0x814   : > { %v2192_v46 = vmul.f32 %v5325_v8, %v2182_v11  ;;  %v6858_v11 = vld [vmem:[#allocation16 + $0xac] ss:$16 sps:$4 sm:$0xff]   ;;  %v6862_v8 = vld [vmem:[#allocation16 + $0xa0] ss:$16 sps:$4 sm:$0xff]  }
 0x816   : > { %v6764_v49 = vpack.c.bf16 %v2192_v46, %v2191_v23  ;;  %v6864_v23 = vld [vmem:[#allocation16 + $0xa8] ss:$16 sps:$4 sm:$0xff]   ;;  %v6868_v46 = vld [vmem:[#allocation16 + $0xc4] ss:$16 sps:$4 sm:$0xff]  }
 0x818   : > { %2236 = vmatmul.mubr.bf16.vlgmr.msra.gmra.mrb[28].mxu0 %v6764_v49  ;;  %2279 = vmatmul.mubr.bf16.vlgmr.msra.gmra.mrb[28].mxu1 %v6764_v49 }
 0x819   : > { %2562 = vmatpush1.bf16.msra.mxu0 %v5090_v47  ;;  %2675 = vmatpush1.bf16.msra.mxu1 %v5093_v48  ;;  %v6870_v47 = vld [vmem:[#allocation16 + $0xcc] ss:$16 sps:$4 sm:$0xff]   ;;  %v6874_v48 = vld [vmem:[#allocation16 + $0xc0] ss:$16 sps:$4 sm:$0xff]  }
 0x81a   : > { %2563 = vmatprep.subr.bf16.mxu0 %v5098_v40  ;;  %2676 = vmatprep.subr.bf16.mxu1 %v5101_v50  ;;  %v6880_v40 = vld [vmem:[#allocation16 + $0xc8] ss:$16 sps:$4 sm:$0xff]   ;;  %v6882_v50 = vld [vmem:[#allocation16 + $0xec] ss:$16 sps:$4 sm:$0xff]  }
 0x81b   : > { %2593 = vmatprep.mubr.bf16.mxu0 %v5853_v3  ;;  %2706 = vmatprep.mubr.bf16.mxu1 %v5853_v3 }
 0x81d   : > { %2564 = vmatpush1.bf16.msra.mxu0 %v5096_v51  ;;  %2677 = vmatpush1.bf16.msra.mxu1 %v5099_v52  ;;  %v6886_v51 = vld [vmem:[#allocation16 + $0xe0] ss:$16 sps:$4 sm:$0xff]   ;;  %v6888_v52 = vld [vmem:[#allocation16 + $0xe8] ss:$16 sps:$4 sm:$0xff]  }
 0x81e   : > { %2565 = vmatprep.subr.bf16.mxu0 %v5104_v54  ;;  %2678 = vmatprep.subr.bf16.mxu1 %v5107_v55 }
 0x821   : > { %2566 = vmatpush1.bf16.msra.mxu0 %v5102_v56  ;;  %2679 = vmatpush1.bf16.msra.mxu1 %v5105_v57 }
 0x822   : > { %2567 = vmatprep.subr.bf16.mxu0 %v5110_v58  ;;  %2680 = vmatprep.subr.bf16.mxu1 %v5113_v59 }
 0x825   : > { %2568 = vmatpush1.bf16.msra.mxu0 %v5108_v60  ;;  %2681 = vmatpush1.bf16.msra.mxu1 %v5111_v61 }
 0x826   : > { %2569 = vmatprep.subr.bf16.mxu0 %v5116_v63  ;;  %2682 = vmatprep.subr.bf16.mxu1 %v5119_v0 }
 0x829   : > { %2570 = vmatpush1.bf16.msra.mxu0 %v5114_v1  ;;  %2683 = vmatpush1.bf16.msra.mxu1 %v5117_v2 }
 0x82a   : > { %2571 = vmatprep.subr.bf16.mxu0 %v5122_v4  ;;  %2684 = vmatprep.subr.bf16.mxu1 %v5125_v5 }
 0x82d   : > { %2572 = vmatpush1.bf16.msra.mxu0 %v5120_v6  ;;  %2685 = vmatpush1.bf16.msra.mxu1 %v5123_v9 }
 0x82e   : > { %2573 = vmatprep.subr.bf16.mxu0 %v5128_v13  ;;  %2686 = vmatprep.subr.bf16.mxu1 %v5131_v27 }
 0x831   : > { %2574 = vmatpush1.bf16.msra.mxu0 %v5126_v34  ;;  %2687 = vmatpush1.bf16.msra.mxu1 %v5129_v36 }
 0x832   : > { %2575 = vmatprep.subr.bf16.mxu0 %v5134_v35  ;;  %2688 = vmatprep.subr.bf16.mxu1 %v5137_v20 }
 0x835   : > { %2576 = vmatpush1.bf16.msra.mxu0 %v5132_v38  ;;  %2689 = vmatpush1.bf16.msra.mxu1 %v5135_v53 }
 0x836   : > { %3056 = vmatprep.subr.bf16.mxu0 %v6770_v39  ;;  %3099 = vmatprep.subr.bf16.mxu1 %v6772_v43 }
 0x838   : > { %2594 = vmatmul.mubr.bf16.vlgmr.msra.gmra.mrb[32].mxu0 %v6378_v30  ;;  %2707 = vmatmul.mubr.bf16.vlgmr.msra.gmra.mrb[32].mxu1 %v6378_v30  ;;  %v6816_v30 = vld [vmem:[#allocation16 + $0x2c] ss:$16 sps:$4 sm:$0xff]  }
 0x839   : > { %2603 = vmatprep.mubr.bf16.mxu0 %v5853_v3  ;;  %2716 = vmatprep.mubr.bf16.mxu1 %v5853_v3 }
 0x83a   : > { %3057 = vmatpush1.bf16.msra.mxu0 %v6775_v7  ;;  %3100 = vmatpush1.bf16.msra.mxu1 %v6778_v32 }
 0x83b   : > { %3058 = vmatprep.subr.bf16.mxu0 %v6780_v18  ;;  %3101 = vmatprep.subr.bf16.mxu1 %v6816_v30 }
 0x83e   : > { %3059 = vmatpush1.bf16.msra.mxu0 %v6788_v22 }
 0x840   : > { %2604 = vmatmul.mubr.bf16.gmra.mrb[36].mxu0 %v6432_v28  ;;  %2717 = vmatmul.mubr.bf16.gmra.mrb[36].mxu1 %v6432_v28  ;;  %v6819_v28 = vld [vmem:[#allocation16 + $0x44] ss:$16 sps:$4 sm:$0xff]  }
 0x841   : > { %2613 = vmatprep.mubr.bf16.mxu0 %v5853_v3  ;;  %2726 = vmatprep.mubr.bf16.mxu1 %v5853_v3 }
 0x842   : > { %3060 = vmatprep.subr.bf16.mxu0 %v6819_v28 }
 0x848   : > { %2614 = vmatmul.mubr.bf16.gmra.mrb[40].mxu0 %v6486_v62  ;;  %2727 = vmatmul.mubr.bf16.gmra.mrb[40].mxu1 %v6486_v62  ;;  %v6821_v62 = vld [vmem:[#allocation16 + $0x28] ss:$16 sps:$4 sm:$0xff]  }
 0x849   : > { %2623 = vmatprep.mubr.bf16.mxu0 %v5853_v3  ;;  %2736 = vmatprep.mubr.bf16.mxu1 %v5853_v3 }
 0x84a   : > { %3102 = vmatpush1.bf16.msra.mxu1 %v6821_v62 }
 0x850   : > { %2624 = vmatmul.mubr.bf16.gmra.mrb[44].mxu0 %v6546_v45  ;;  %2737 = vmatmul.mubr.bf16.gmra.mrb[44].mxu1 %v6546_v45  ;;  %v6825_v45 = vld [vmem:[#allocation16 + $0x4c] ss:$16 sps:$4 sm:$0xff]  }
 0x851   : > { %2633 = vmatprep.mubr.bf16.mxu0 %v5853_v3  ;;  %2746 = vmatprep.mubr.bf16.mxu1 %v5853_v3 }
 0x852   : > { %3103 = vmatprep.subr.bf16.mxu1 %v6825_v45 }
 0x853   : > { %3104 = vmatpush1.bf16.msra.mxu1 %v6831_v14 }
 0x854   : > { %3105 = vmatprep.subr.bf16.mxu1 %v6834_v41 }
 0x857   : > { %3106 = vmatpush1.bf16.msra.mxu1 %v6840_v24 }
 0x858   : > { %2634 = vmatmul.mubr.bf16.gmra.mrb[48].mxu0 %v6658_v42  ;;  %2747 = vmatmul.mubr.bf16.gmra.mrb[48].mxu1 %v6658_v42  ;;  %v6827_v42 = vld [vmem:[#allocation16 + $0x40] ss:$16 sps:$4 sm:$0xff]  }
 0x859   : > { %2643 = vmatprep.mubr.bf16.mxu0 %v5853_v3  ;;  %2756 = vmatprep.mubr.bf16.mxu1 %v5853_v3 }
 0x85a   : > { %3061 = vmatpush1.bf16.msra.mxu0 %v6827_v42  ;;  %3107 = vmatprep.subr.bf16.mxu1 %v6846_v33 }
 0x85b   : > { %3108 = vmatpush1.bf16.msra.mxu1 %v6852_v26 }
 0x85c   : > { %3109 = vmatprep.subr.bf16.mxu1 %v6858_v11 }
 0x85f   : > { %3110 = vmatpush1.bf16.msra.mxu1 %v6864_v23 }
 0x860   : > { %2644 = vmatmul.mubr.bf16.gmra.mrb[52].mxu0 %v6712_v29  ;;  %2757 = vmatmul.mubr.bf16.gmra.mrb[52].mxu1 %v6712_v29  ;;  %v6829_v29 = vld [vmem:[#allocation16 + $0x64] ss:$16 sps:$4 sm:$0xff]  }
 0x861   : > { %2653 = vmatprep.mubr.bf16.mxu0 %v5853_v3  ;;  %2766 = vmatprep.mubr.bf16.mxu1 %v5853_v3 }
 0x862   : > { %3062 = vmatprep.subr.bf16.mxu0 %v6829_v29  ;;  %3111 = vmatprep.subr.bf16.mxu1 %v6870_v47 }
 0x863   : > { %3063 = vmatpush1.bf16.msra.mxu0 %v6838_v31  ;;  %3112 = vmatpush1.bf16.msra.mxu1 %v6880_v40 }
 0x864   : > { %3064 = vmatprep.subr.bf16.mxu0 %v6844_v17  ;;  %3113 = vmatprep.subr.bf16.mxu1 %v6882_v50 }
 0x867   : > { %3065 = vmatpush1.bf16.msra.mxu0 %v6850_v16  ;;  %3114 = vmatpush1.bf16.msra.mxu1 %v6888_v52 }
 0x868   : > { %2654 = vmatmul.mubr.bf16.gmra.mrb[56].mxu0 %v6764_v49  ;;  %2767 = vmatmul.mubr.bf16.gmra.mrb[56].mxu1 %v6764_v49  ;;  %v6878_v49 = vld [vmem:[#allocation16 + $0xe4] ss:$16 sps:$4 sm:$0xff]  }
 0x869   : > { %2663 = vmatprep.mubr.bf16.mxu0 %v5853_v3  ;;  %2776 = vmatprep.mubr.bf16.mxu1 %v5853_v3 }
 0x86a   : > { %3066 = vmatprep.subr.bf16.mxu0 %v6856_v37  ;;  %3238 = vmatprep.subr.bf16.mxu1 %v6772_v43 }
 0x86b   : > { %3067 = vmatpush1.bf16.msra.mxu0 %v6862_v8 }
 0x86c   : > { %3068 = vmatprep.subr.bf16.mxu0 %v6868_v46 }
 0x86f   : > { %3069 = vmatpush1.bf16.msra.mxu0 %v6874_v48 }
 0x870   : > { %3070 = vmatprep.subr.bf16.mxu0 %v6878_v49 }
 0x873   : > { %3071 = vmatpush1.bf16.msra.mxu0 %v6886_v51 }
 0x874   : > { %3195 = vmatprep.subr.bf16.mxu0 %v6770_v39 }
 0x8eb   : > { %v2237_v54 = vpop.f32.mrb[28].mxu0  ;;  %v2280_v55 = vpop.f32.mrb[28].mxu1 }
 0x8ec   : > { %v4635_v56 = vadd.f32 %v2237_v54, %v6348_v19  ;;  %v2239_v57 = vpop.f32.mrb[29].mxu0  ;;  %v2282_v58 = vpop.f32.mrb[29].mxu1  ;;  %v4667_v6 = vadd.f32 %v2280_v55, %v6358_v25 }
 0x8ed   : > { %v4636_v59 = vadd.f32 %v2239_v57, %v6353_v21  ;;  %v2241_v60 = vpop.f32.mrb[30].mxu0  ;;  %v2284_v61 = vpop.f32.mrb[30].mxu1  ;;  %v4668_v34 = vadd.f32 %v2282_v58, %v6367_v10 }
 0x8ee   : > { %v2297_v63 = vmul.f32 0.5, %v4635_v56  ;;  %v4637_v0 = vadd.f32 %v2241_v60, %v6348_v19  ;;  %v2243_v1 = vpop.f32.mrb[31].mxu0  ;;  %v2286_v2 = vpop.f32.mrb[31].mxu1  ;;  %v4669_v27 = vadd.f32 %v2284_v61, %v6358_v25 }
 0x8ef   : > { %v2305_v4 = vmul.f32 0.5, %v4636_v59  ;;  %v4638_v5 = vadd.f32 %v2243_v1, %v6353_v21  ;;  %v2315_v19 = vmul.f32 0.5, %v4668_v34  ;;  %v4670_v36 = vadd.f32 %v2286_v2, %v6367_v10 }
 0x8f0   : > { %5326 = vtanh.f32 %v2297_v63  ;;  %v2298_v9 = vmul.f32 0.5, %v4637_v0 }
 0x8f1   : > { %5328 = vtanh.f32 %v2305_v4  ;;  %v2306_v13 = vmul.f32 0.5, %v4638_v5  ;;  %v2316_v53 = vmul.f32 0.5, %v4670_v36 }
 0x8f2   : > { %5330 = vtanh.f32 %v2298_v9 }
 0x8f3   : > { %5332 = vtanh.f32 %v4667_v6 }
 0x8f4   : > { %5334 = vtanh.f32 %v2306_v13 }
 0x8f5   : > { %5336 = vtanh.f32 %v4669_v27 }
 0x8f6   : > { %5338 = vtanh.f32 %v2315_v19 }
 0x8f7   : > { %5340 = vtanh.f32 %v2316_v53 }
 0x8fa   : > { %v5327_v35 = vpop.eup %5326 }
 0x8fb   : > { %v5329_v20 = vpop.eup %5328  ;;  %v2301_v21 = vmul.f32 0.5, %v5327_v35 }
 0x8fc   : > { %v2309_v38 = vmul.f32 0.5, %v5329_v20  ;;  %v5331_v54 = vpop.eup %5330 }
 0x8fd   : > { %v2303_v55 = vadd.f32 0.5, %v2301_v21  ;;  %v5333_v56 = vpop.eup %5332  ;;  %v2302_v59 = vmul.f32 0.5, %v5331_v54  ;;  %v2379_v54 = vld [vmem:[%s7427_s28] sm:$0xf] }
 0x8fe   : > { %v2311_v57 = vadd.f32 0.5, %v2309_v38  ;;  %v5335_v25 = vpop.eup %5334  ;;  %v2884_v38 = vld [vmem:[#allocation4 + $0x8] sm:$0xff] }
 0x8ff   : > { %v2325_v60 = vmul.f32 %v5333_v56, %v2303_v55  ;;  %v2304_v61 = vadd.f32 0.5, %v2302_v59  ;;  %v2310_v63 = vmul.f32 0.5, %v5335_v25  ;;  %v5337_v0 = vpop.eup %5336  ;;  %v7428_v55 = vsub.s32 0, %v6339_v15 }
 0x900   : > { %v2323_v58 = vmul.f32 %v2311_v57, %v6757_v44  ;;  %v5339_v5 = vpop.eup %5338  ;;  %v7429_v57 = vsub.s32 1, %v6339_v15 }
 0x901   : > { %v2312_v1 = vadd.f32 0.5, %v2310_v63  ;;  %v2326_v2 = vmul.f32 %v5337_v0, %v2304_v61  ;;  %v2319_v9 = vmul.f32 0.5, %v5339_v5  ;;  %v5341_v13 = vpop.eup %5340  ;;  %v6947_v56 = vrot.slane %v2379_v54, %v7428_v55 }
 0x902   : > { %v2327_v10 = vadd.f32 %v2325_v60, %v2323_v58  ;;  %v2320_v34 = vmul.f32 0.5, %v5341_v13  ;;  %v6951_v59 = vrot.slane %v2379_v54, %v7429_v57  ;;  %v7430_v61 = vsub.s32 2, %v6339_v15 }
 0x903   : > { %v2324_v4 = vmul.f32 %v2312_v1, %v6761_v12  ;;  %v2321_v27 = vadd.f32 0.5, %v2319_v9  ;;  %v2883_v12 = vld [vmem:[#allocation4] sm:$0xff] }
 0x904   : > { %5342 = vtanh.f32 %v2327_v10  ;;  %2337 = vst [vmem:[#allocation3] sm:$0xff] %v2327_v10  ;;  %v2322_v36 = vadd.f32 0.5, %v2320_v34  ;;  %v2895_v53 = vpack.c.bf16 %v2884_v38, %v2883_v12  ;;  %v6956_v63 = vrot.slane %v2379_v54, %v7430_v61 }
 0x905   : > { %v2328_v6 = vadd.f32 %v2326_v2, %v2324_v4 }
 0x907   : > { %5344 = vtanh.f32 %v2328_v6  ;;  %2338 = vst [vmem:[#allocation3 + $0x8] sm:$0xff] %v2328_v6 }
 0x90e   : > { %v5343_v44 = vpop.eup %5342 }
 0x90f   : > { %v2331_v19 = vmul.f32 %v5343_v44, %v2321_v27 }
 0x911   : > { %2335 = vst [vmem:[#allocation2] sm:$0xff] %v2331_v19  ;;  %v5345_v35 = vpop.eup %5344 }
 0x912   : > { %v2332_v20 = vmul.f32 %v5345_v35, %v2322_v36  ;;  %v7431_v35 = vsub.s32 3, %v6339_v15 }
 0x914   : > { %v2333_v21 = vpack.c.bf16 %v2332_v20, %v2331_v19  ;;  %2336 = vst [vmem:[#allocation2 + $0x8] sm:$0xff] %v2332_v20  ;;  %v6964_v20 = vrot.slane %v2379_v54, %v7431_v35  ;;  %v2885_v54 = vld [vmem:[#allocation5] sm:$0xff] }
 0x916   : > { %2664 = vmatmul.mubr.bf16.gmra.mrb[60].mxu0 %v2333_v21  ;;  %2777 = vmatmul.mubr.bf16.gmra.mrb[60].mxu1 %v2333_v21 }
 0x917   : > { %3088 = vmatprep.mubr.bf16.mxu0 %v5853_v3  ;;  %3131 = vmatprep.mubr.bf16.mxu1 %v5853_v3 }
 0x91e   : > { %3089 = vmatmul.mubr.bf16.vlgmr.msra.gmra.mrb[32].mxu0 %v2895_v53  ;;  %3132 = vmatmul.mubr.bf16.vlgmr.msra.gmra.mrb[32].mxu1 %v2895_v53 }
 0x91f   : > { %3196 = vmatpush1.bf16.msra.mxu0 %v6775_v7  ;;  %3239 = vmatpush1.bf16.msra.mxu1 %v6778_v32 }
 0x920   : > { %3197 = vmatprep.subr.bf16.mxu0 %v6780_v18  ;;  %3240 = vmatprep.subr.bf16.mxu1 %v6816_v30 }
 0x921   : > { %3227 = vmatprep.mubr.bf16.mxu0 %v5853_v3  ;;  %3270 = vmatprep.mubr.bf16.mxu1 %v5853_v3 }
 0x923   : > { %3198 = vmatpush1.bf16.msra.mxu0 %v6788_v22  ;;  %3241 = vmatpush1.bf16.msra.mxu1 %v6821_v62 }
 0x924   : > { %3199 = vmatprep.subr.bf16.mxu0 %v6819_v28  ;;  %3242 = vmatprep.subr.bf16.mxu1 %v6825_v45 }
 0x927   : > { %3200 = vmatpush1.bf16.msra.mxu0 %v6827_v42  ;;  %3243 = vmatpush1.bf16.msra.mxu1 %v6831_v14 }
 0x928   : > { %3201 = vmatprep.subr.bf16.mxu0 %v6829_v29  ;;  %3244 = vmatprep.subr.bf16.mxu1 %v6834_v41 }
 0x92b   : > { %3202 = vmatpush1.bf16.msra.mxu0 %v6838_v31  ;;  %3245 = vmatpush1.bf16.msra.mxu1 %v6840_v24 }
 0x92c   : > { %3203 = vmatprep.subr.bf16.mxu0 %v6844_v17  ;;  %3246 = vmatprep.subr.bf16.mxu1 %v6846_v33 }
 0x92f   : > { %3204 = vmatpush1.bf16.msra.mxu0 %v6850_v16  ;;  %3247 = vmatpush1.bf16.msra.mxu1 %v6852_v26 }
 0x930   : > { %3205 = vmatprep.subr.bf16.mxu0 %v6856_v37  ;;  %3248 = vmatprep.subr.bf16.mxu1 %v6858_v11 }
 0x933   : > { %3206 = vmatpush1.bf16.msra.mxu0 %v6862_v8  ;;  %3249 = vmatpush1.bf16.msra.mxu1 %v6864_v23 }
 0x934   : > { %3207 = vmatprep.subr.bf16.mxu0 %v6868_v46  ;;  %3250 = vmatprep.subr.bf16.mxu1 %v6870_v47 }
 0x937   : > { %3208 = vmatpush1.bf16.msra.mxu0 %v6874_v48  ;;  %3251 = vmatpush1.bf16.msra.mxu1 %v6880_v40 }
 0x938   : > { %3209 = vmatprep.subr.bf16.mxu0 %v6878_v49  ;;  %3252 = vmatprep.subr.bf16.mxu1 %v6882_v50 }
 0x93b   : > { %3210 = vmatpush1.bf16.msra.mxu0 %v6886_v51  ;;  %3253 = vmatpush1.bf16.msra.mxu1 %v6888_v52 }
 0x93c   : > { %3334 = vmatprep.subr.bf16.mxu0 %v6770_v39  ;;  %3377 = vmatprep.subr.bf16.mxu1 %v6772_v43 }
 0x9f1   : > { %v3090_v25 = vpop.f32.mrb[32].mxu0  ;;  %v3133_v60 = vpop.f32.mrb[32].mxu1 }
 0x9f2   : > { %v4671_v58 = vadd.f32 %v3090_v25, %v6947_v56  ;;  %v3092_v0 = vpop.f32.mrb[33].mxu0  ;;  %v3135_v10 = vpop.f32.mrb[33].mxu1  ;;  %v4703_v44 = vadd.f32 %v3133_v60, %v6956_v63 }
 0x9f3   : > { %v4672_v1 = vadd.f32 %v3092_v0, %v6951_v59  ;;  %v3094_v2 = vpop.f32.mrb[34].mxu0  ;;  %v3137_v4 = vpop.f32.mrb[34].mxu1  ;;  %v4704_v12 = vadd.f32 %v3135_v10, %v6964_v20 }
 0x9f4   : > { %v3150_v5 = vmul.f32 0.5, %v4671_v58  ;;  %v4673_v6 = vadd.f32 %v3094_v2, %v6947_v56  ;;  %v3096_v9 = vpop.f32.mrb[35].mxu0  ;;  %v3139_v13 = vpop.f32.mrb[35].mxu1  ;;  %v4705_v21 = vadd.f32 %v3137_v4, %v6956_v63 }
 0x9f5   : > { %v3158_v27 = vmul.f32 0.5, %v4672_v1  ;;  %v4674_v34 = vadd.f32 %v3096_v9, %v6951_v59  ;;  %v4706_v38 = vadd.f32 %v3139_v13, %v6964_v20  ;;  %v3168_v25 = vmul.f32 0.5, %v4704_v12 }
 0x9f6   : > { %5346 = vtanh.f32 %v3150_v5  ;;  %v3151_v19 = vmul.f32 0.5, %v4673_v6 }
 0x9f7   : > { %5348 = vtanh.f32 %v3158_v27  ;;  %v3159_v36 = vmul.f32 0.5, %v4674_v34  ;;  %v3169_v58 = vmul.f32 0.5, %v4706_v38  ;;  %v2886_v27 = vld [vmem:[#allocation5 + $0x8] sm:$0xff] }
 0x9f8   : > { %5350 = vtanh.f32 %v3151_v19 }
 0x9f9   : > { %5352 = vtanh.f32 %v4703_v44 }
 0x9fa   : > { %5354 = vtanh.f32 %v3159_v36 }
 0x9fb   : > { %5356 = vtanh.f32 %v4705_v21 }
 0x9fc   : > { %5358 = vtanh.f32 %v3168_v25 }
 0x9fd   : > { %5360 = vtanh.f32 %v3169_v58 }
 0xa00   : > { %v5347_v53 = vpop.eup %5346 }
 0xa01   : > { %v5349_v55 = vpop.eup %5348  ;;  %v3154_v57 = vmul.f32 0.5, %v5347_v53 }
 0xa02   : > { %v3162_v60 = vmul.f32 0.5, %v5349_v55  ;;  %v5351_v61 = vpop.eup %5350 }
 0xa03   : > { %v3156_v15 = vadd.f32 0.5, %v3154_v57  ;;  %v5353_v0 = vpop.eup %5352  ;;  %v3155_v2 = vmul.f32 0.5, %v5351_v61 }
 0xa04   : > { %v3164_v1 = vadd.f32 0.5, %v3162_v60  ;;  %v5355_v4 = vpop.eup %5354 }
 0xa05   : > { %v3178_v5 = vmul.f32 %v5353_v0, %v3156_v15  ;;  %v3157_v10 = vadd.f32 0.5, %v3155_v2  ;;  %v3163_v9 = vmul.f32 0.5, %v5355_v4  ;;  %v5357_v13 = vpop.eup %5356 }
 0xa06   : > { %v3176_v6 = vmul.f32 %v3164_v1, %v2885_v54  ;;  %v5359_v21 = vpop.eup %5358 }
 0xa07   : > { %v3165_v44 = vadd.f32 0.5, %v3163_v9  ;;  %v3179_v19 = vmul.f32 %v5357_v13, %v3157_v10  ;;  %v5361_v12 = vpop.eup %5360  ;;  %v3172_v38 = vmul.f32 0.5, %v5359_v21 }
 0xa08   : > { %v6969_v34 = vadd.f32 %v3178_v5, %v3176_v6  ;;  %v3173_v53 = vmul.f32 0.5, %v5361_v12 }
 0xa09   : > { %v3177_v36 = vmul.f32 %v3165_v44, %v2886_v27  ;;  %v3174_v57 = vadd.f32 0.5, %v3172_v38 }
 0xa0a   : > { %5362 = vtanh.f32 %v6969_v34  ;;  %v3175_v25 = vadd.f32 0.5, %v3173_v53 }
 0xa0b   : > { %v6972_v35 = vadd.f32 %v3179_v19, %v3177_v36 }
 0xa0d   : > { %5364 = vtanh.f32 %v6972_v35 }
 0xa14   : > { %v5363_v55 = vpop.eup %5362 }
 0xa15   : > { %v3184_v58 = vmul.f32 %v5363_v55, %v3174_v57 }
 0xa17   : > { %v5365_v60 = vpop.eup %5364 }
 0xa18   : > { %v3185_v61 = vmul.f32 %v5365_v60, %v3175_v25 }
 0xa1a   : > { %v3194_v15 = vpack.c.bf16 %v3185_v61, %v3184_v58 }
 0xa1c   : > { %3228 = vmatmul.mubr.bf16.vlgmr.msra.gmra.mrb[36].mxu0 %v3194_v15  ;;  %3271 = vmatmul.mubr.bf16.vlgmr.msra.gmra.mrb[36].mxu1 %v3194_v15 }
 0xa1d   : > { %3335 = vmatpush1.bf16.msra.mxu0 %v6775_v7  ;;  %3378 = vmatpush1.bf16.msra.mxu1 %v6778_v32 }
 0xa1e   : > { %3336 = vmatprep.subr.bf16.mxu0 %v6780_v18  ;;  %3379 = vmatprep.subr.bf16.mxu1 %v6816_v30 }
 0xa1f   : > { %3366 = vmatprep.mubr.bf16.mxu0 %v5853_v3  ;;  %3409 = vmatprep.mubr.bf16.mxu1 %v5853_v3 }
 0xa21   : > { %3337 = vmatpush1.bf16.msra.mxu0 %v6788_v22  ;;  %3380 = vmatpush1.bf16.msra.mxu1 %v6821_v62 }
 0xa22   : > { %3338 = vmatprep.subr.bf16.mxu0 %v6819_v28  ;;  %3381 = vmatprep.subr.bf16.mxu1 %v6825_v45 }
 0xa25   : > { %3339 = vmatpush1.bf16.msra.mxu0 %v6827_v42  ;;  %3382 = vmatpush1.bf16.msra.mxu1 %v6831_v14 }
 0xa26   : > { %3340 = vmatprep.subr.bf16.mxu0 %v6829_v29  ;;  %3383 = vmatprep.subr.bf16.mxu1 %v6834_v41 }
 0xa29   : > { %3341 = vmatpush1.bf16.msra.mxu0 %v6838_v31  ;;  %3384 = vmatpush1.bf16.msra.mxu1 %v6840_v24 }
 0xa2a   : > { %3342 = vmatprep.subr.bf16.mxu0 %v6844_v17  ;;  %3385 = vmatprep.subr.bf16.mxu1 %v6846_v33 }
 0xa2d   : > { %3343 = vmatpush1.bf16.msra.mxu0 %v6850_v16  ;;  %3386 = vmatpush1.bf16.msra.mxu1 %v6852_v26 }
 0xa2e   : > { %3344 = vmatprep.subr.bf16.mxu0 %v6856_v37  ;;  %3387 = vmatprep.subr.bf16.mxu1 %v6858_v11 }
 0xa31   : > { %3345 = vmatpush1.bf16.msra.mxu0 %v6862_v8  ;;  %3388 = vmatpush1.bf16.msra.mxu1 %v6864_v23 }
 0xa32   : > { %3346 = vmatprep.subr.bf16.mxu0 %v6868_v46  ;;  %3389 = vmatprep.subr.bf16.mxu1 %v6870_v47 }
 0xa35   : > { %3347 = vmatpush1.bf16.msra.mxu0 %v6874_v48  ;;  %3390 = vmatpush1.bf16.msra.mxu1 %v6880_v40 }
 0xa36   : > { %3348 = vmatprep.subr.bf16.mxu0 %v6878_v49  ;;  %3391 = vmatprep.subr.bf16.mxu1 %v6882_v50 }
 0xa39   : > { %3349 = vmatpush1.bf16.msra.mxu0 %v6886_v51  ;;  %3392 = vmatpush1.bf16.msra.mxu1 %v6888_v52 }
 0xa3a   : > { %3473 = vmatprep.subr.bf16.mxu0 %v6770_v39  ;;  %3516 = vmatprep.subr.bf16.mxu1 %v6772_v43 }
 0xaef   : > { %v3229_v54 = vpop.f32.mrb[36].mxu0  ;;  %v3272_v0 = vpop.f32.mrb[36].mxu1 }
 0xaf0   : > { %v4675_v1 = vadd.f32 %v3229_v54, %v6947_v56  ;;  %v3231_v2 = vpop.f32.mrb[37].mxu0  ;;  %v3274_v4 = vpop.f32.mrb[37].mxu1  ;;  %v4707_v21 = vadd.f32 %v3272_v0, %v6956_v63 }
 0xaf1   : > { %v4676_v5 = vadd.f32 %v3231_v2, %v6951_v59  ;;  %v3233_v6 = vpop.f32.mrb[38].mxu0  ;;  %v3276_v10 = vpop.f32.mrb[38].mxu1  ;;  %v4708_v55 = vadd.f32 %v3274_v4, %v6964_v20 }
 0xaf2   : > { %v3289_v9 = vmul.f32 0.5, %v4675_v1  ;;  %v4677_v13 = vadd.f32 %v3233_v6, %v6947_v56  ;;  %v3235_v27 = vpop.f32.mrb[39].mxu0  ;;  %v3278_v44 = vpop.f32.mrb[39].mxu1  ;;  %v4709_v53 = vadd.f32 %v3276_v10, %v6956_v63 }
 0xaf3   : > { %v3297_v19 = vmul.f32 0.5, %v4676_v5  ;;  %v4678_v36 = vadd.f32 %v3235_v27, %v6951_v59  ;;  %v4710_v57 = vadd.f32 %v3278_v44, %v6964_v20  ;;  %v3307_v61 = vmul.f32 0.5, %v4708_v55 }
 0xaf4   : > { %5366 = vtanh.f32 %v3289_v9  ;;  %v3290_v12 = vmul.f32 0.5, %v4677_v13 }
 0xaf5   : > { %5368 = vtanh.f32 %v3297_v19  ;;  %v3298_v38 = vmul.f32 0.5, %v4678_v36  ;;  %v3308_v54 = vmul.f32 0.5, %v4710_v57 }
 0xaf6   : > { %5370 = vtanh.f32 %v3290_v12 }
 0xaf7   : > { %5372 = vtanh.f32 %v4707_v21 }
 0xaf8   : > { %5374 = vtanh.f32 %v3298_v38 }
 0xaf9   : > { %5376 = vtanh.f32 %v4709_v53 }
 0xafa   : > { %5378 = vtanh.f32 %v3307_v61 }
 0xafb   : > { %5380 = vtanh.f32 %v3308_v54 }
 0xafe   : > { %v5367_v25 = vpop.eup %5366 }
 0xaff   : > { %v5369_v60 = vpop.eup %5368  ;;  %v3293_v58 = vmul.f32 0.5, %v5367_v25 }
 0xb00   : > { %v3301_v15 = vmul.f32 0.5, %v5369_v60  ;;  %v5371_v0 = vpop.eup %5370 }
 0xb01   : > { %v3295_v1 = vadd.f32 0.5, %v3293_v58  ;;  %v5373_v2 = vpop.eup %5372  ;;  %v3294_v6 = vmul.f32 0.5, %v5371_v0 }
 0xb02   : > { %v3303_v5 = vadd.f32 0.5, %v3301_v15  ;;  %v5375_v9 = vpop.eup %5374 }
 0xb03   : > { %v3317_v10 = vmul.f32 %v5373_v2, %v3295_v1  ;;  %v3296_v4 = vadd.f32 0.5, %v3294_v6  ;;  %v3302_v27 = vmul.f32 0.5, %v5375_v9  ;;  %v5377_v44 = vpop.eup %5376 }
 0xb04   : > { %v3315_v13 = vmul.f32 %v3303_v5, %v6969_v34  ;;  %v5379_v53 = vpop.eup %5378 }
 0xb05   : > { %v3304_v36 = vadd.f32 0.5, %v3302_v27  ;;  %v3318_v21 = vmul.f32 %v5377_v44, %v3296_v4  ;;  %v5381_v55 = vpop.eup %5380  ;;  %v3311_v57 = vmul.f32 0.5, %v5379_v53 }
 0xb06   : > { %v7018_v19 = vadd.f32 %v3317_v10, %v3315_v13  ;;  %v3312_v34 = vmul.f32 0.5, %v5381_v55 }
 0xb07   : > { %v3316_v12 = vmul.f32 %v3304_v36, %v6972_v35  ;;  %v3313_v60 = vadd.f32 0.5, %v3311_v57 }
 0xb08   : > { %5382 = vtanh.f32 %v7018_v19  ;;  %v3314_v58 = vadd.f32 0.5, %v3312_v34 }
 0xb09   : > { %v7022_v38 = vadd.f32 %v3318_v21, %v3316_v12 }
 0xb0b   : > { %5384 = vtanh.f32 %v7022_v38 }
 0xb12   : > { %v5383_v25 = vpop.eup %5382 }
 0xb13   : > { %v3323_v15 = vmul.f32 %v5383_v25, %v3313_v60 }
 0xb15   : > { %v5385_v61 = vpop.eup %5384 }
 0xb16   : > { %v3324_v54 = vmul.f32 %v5385_v61, %v3314_v58 }
 0xb18   : > { %v3333_v0 = vpack.c.bf16 %v3324_v54, %v3323_v15 }
 0xb1a   : > { %3367 = vmatmul.mubr.bf16.vlgmr.msra.gmra.mrb[40].mxu0 %v3333_v0  ;;  %3410 = vmatmul.mubr.bf16.vlgmr.msra.gmra.mrb[40].mxu1 %v3333_v0 }
 0xb1b   : > { %3474 = vmatpush1.bf16.msra.mxu0 %v6775_v7  ;;  %3517 = vmatpush1.bf16.msra.mxu1 %v6778_v32 }
 0xb1c   : > { %3475 = vmatprep.subr.bf16.mxu0 %v6780_v18  ;;  %3518 = vmatprep.subr.bf16.mxu1 %v6816_v30 }
 0xb1d   : > { %3505 = vmatprep.mubr.bf16.mxu0 %v5853_v3  ;;  %3548 = vmatprep.mubr.bf16.mxu1 %v5853_v3 }
 0xb1f   : > { %3476 = vmatpush1.bf16.msra.mxu0 %v6788_v22  ;;  %3519 = vmatpush1.bf16.msra.mxu1 %v6821_v62 }
 0xb20   : > { %3477 = vmatprep.subr.bf16.mxu0 %v6819_v28  ;;  %3520 = vmatprep.subr.bf16.mxu1 %v6825_v45 }
 0xb23   : > { %3478 = vmatpush1.bf16.msra.mxu0 %v6827_v42  ;;  %3521 = vmatpush1.bf16.msra.mxu1 %v6831_v14 }
 0xb24   : > { %3479 = vmatprep.subr.bf16.mxu0 %v6829_v29  ;;  %3522 = vmatprep.subr.bf16.mxu1 %v6834_v41 }
 0xb27   : > { %3480 = vmatpush1.bf16.msra.mxu0 %v6838_v31  ;;  %3523 = vmatpush1.bf16.msra.mxu1 %v6840_v24 }
 0xb28   : > { %3481 = vmatprep.subr.bf16.mxu0 %v6844_v17  ;;  %3524 = vmatprep.subr.bf16.mxu1 %v6846_v33 }
 0xb2b   : > { %3482 = vmatpush1.bf16.msra.mxu0 %v6850_v16  ;;  %3525 = vmatpush1.bf16.msra.mxu1 %v6852_v26 }
 0xb2c   : > { %3483 = vmatprep.subr.bf16.mxu0 %v6856_v37  ;;  %3526 = vmatprep.subr.bf16.mxu1 %v6858_v11 }
 0xb2f   : > { %3484 = vmatpush1.bf16.msra.mxu0 %v6862_v8  ;;  %3527 = vmatpush1.bf16.msra.mxu1 %v6864_v23 }
 0xb30   : > { %3485 = vmatprep.subr.bf16.mxu0 %v6868_v46  ;;  %3528 = vmatprep.subr.bf16.mxu1 %v6870_v47 }
 0xb33   : > { %3486 = vmatpush1.bf16.msra.mxu0 %v6874_v48  ;;  %3529 = vmatpush1.bf16.msra.mxu1 %v6880_v40 }
 0xb34   : > { %3487 = vmatprep.subr.bf16.mxu0 %v6878_v49  ;;  %3530 = vmatprep.subr.bf16.mxu1 %v6882_v50 }
 0xb37   : > { %3488 = vmatpush1.bf16.msra.mxu0 %v6886_v51  ;;  %3531 = vmatpush1.bf16.msra.mxu1 %v6888_v52 }
 0xb38   : > { %3612 = vmatprep.subr.bf16.mxu0 %v6770_v39  ;;  %3655 = vmatprep.subr.bf16.mxu1 %v6772_v43 }
 0xbed   : > { %v3368_v35 = vpop.f32.mrb[40].mxu0  ;;  %v3411_v1 = vpop.f32.mrb[40].mxu1 }
 0xbee   : > { %v4679_v2 = vadd.f32 %v3368_v35, %v6947_v56  ;;  %v3370_v5 = vpop.f32.mrb[41].mxu0  ;;  %v3413_v6 = vpop.f32.mrb[41].mxu1  ;;  %v4711_v53 = vadd.f32 %v3411_v1, %v6956_v63 }
 0xbef   : > { %v4680_v9 = vadd.f32 %v3370_v5, %v6951_v59  ;;  %v3372_v10 = vpop.f32.mrb[42].mxu0  ;;  %v3415_v13 = vpop.f32.mrb[42].mxu1  ;;  %v4712_v25 = vadd.f32 %v3413_v6, %v6964_v20 }
 0xbf0   : > { %v3428_v4 = vmul.f32 0.5, %v4679_v2  ;;  %v4681_v27 = vadd.f32 %v3372_v10, %v6947_v56  ;;  %v3374_v44 = vpop.f32.mrb[43].mxu0  ;;  %v3417_v36 = vpop.f32.mrb[43].mxu1  ;;  %v4713_v34 = vadd.f32 %v3415_v13, %v6956_v63 }
 0xbf1   : > { %v3436_v21 = vmul.f32 0.5, %v4680_v9  ;;  %v4682_v12 = vadd.f32 %v3374_v44, %v6951_v59  ;;  %v4714_v60 = vadd.f32 %v3417_v36, %v6964_v20  ;;  %v3446_v54 = vmul.f32 0.5, %v4712_v25 }
 0xbf2   : > { %5386 = vtanh.f32 %v3428_v4  ;;  %v3429_v55 = vmul.f32 0.5, %v4681_v27 }
 0xbf3   : > { %5388 = vtanh.f32 %v3436_v21  ;;  %v3437_v57 = vmul.f32 0.5, %v4682_v12  ;;  %v3447_v35 = vmul.f32 0.5, %v4714_v60 }
 0xbf4   : > { %5390 = vtanh.f32 %v3429_v55 }
 0xbf5   : > { %5392 = vtanh.f32 %v4711_v53 }
 0xbf6   : > { %5394 = vtanh.f32 %v3437_v57 }
 0xbf7   : > { %5396 = vtanh.f32 %v4713_v34 }
 0xbf8   : > { %5398 = vtanh.f32 %v3446_v54 }
 0xbf9   : > { %5400 = vtanh.f32 %v3447_v35 }
 0xbfc   : > { %v5387_v58 = vpop.eup %5386 }
 0xbfd   : > { %v5389_v61 = vpop.eup %5388  ;;  %v3432_v15 = vmul.f32 0.5, %v5387_v58 }
 0xbfe   : > { %v3440_v0 = vmul.f32 0.5, %v5389_v61  ;;  %v5391_v1 = vpop.eup %5390 }
 0xbff   : > { %v3434_v2 = vadd.f32 0.5, %v3432_v15  ;;  %v5393_v5 = vpop.eup %5392  ;;  %v3433_v10 = vmul.f32 0.5, %v5391_v1 }
 0xc00   : > { %v3442_v9 = vadd.f32 0.5, %v3440_v0  ;;  %v5395_v4 = vpop.eup %5394 }
 0xc01   : > { %v3456_v13 = vmul.f32 %v5393_v5, %v3434_v2  ;;  %v3435_v6 = vadd.f32 0.5, %v3433_v10  ;;  %v3441_v44 = vmul.f32 0.5, %v5395_v4  ;;  %v5397_v36 = vpop.eup %5396 }
 0xc02   : > { %v3454_v27 = vmul.f32 %v3442_v9, %v7018_v19  ;;  %v5399_v34 = vpop.eup %5398 }
 0xc03   : > { %v3443_v12 = vadd.f32 0.5, %v3441_v44  ;;  %v3457_v53 = vmul.f32 %v5397_v36, %v3435_v6  ;;  %v5401_v25 = vpop.eup %5400  ;;  %v3450_v60 = vmul.f32 0.5, %v5399_v34 }
 0xc04   : > { %v7068_v21 = vadd.f32 %v3456_v13, %v3454_v27  ;;  %v3451_v19 = vmul.f32 0.5, %v5401_v25 }
 0xc05   : > { %v3455_v55 = vmul.f32 %v3443_v12, %v7022_v38  ;;  %v3452_v61 = vadd.f32 0.5, %v3450_v60 }
 0xc06   : > { %5402 = vtanh.f32 %v7068_v21  ;;  %v3453_v15 = vadd.f32 0.5, %v3451_v19 }
 0xc07   : > { %v7072_v57 = vadd.f32 %v3457_v53, %v3455_v55 }
 0xc09   : > { %5404 = vtanh.f32 %v7072_v57 }
 0xc10   : > { %v5403_v58 = vpop.eup %5402 }
 0xc11   : > { %v3462_v0 = vmul.f32 %v5403_v58, %v3452_v61 }
 0xc13   : > { %v5405_v54 = vpop.eup %5404 }
 0xc14   : > { %v3463_v35 = vmul.f32 %v5405_v54, %v3453_v15  ;;  %v7128_v15 = vld [vmem:[#allocation16 + $0x8] ss:$16 sps:$4 sm:$0xff]   ;;  %v7131_v54 = vld [vmem:[#allocation16 + $0x24] ss:$16 sps:$4 sm:$0xff]  }
 0xc16   : > { %v3472_v1 = vpack.c.bf16 %v3463_v35, %v3462_v0  ;;  %v7134_v0 = vld [vmem:[#allocation16 + $0x2c] ss:$16 sps:$4 sm:$0xff]   ;;  %v7139_v35 = vld [vmem:[#allocation16 + $0x20] ss:$16 sps:$4 sm:$0xff]  }
 0xc18   : > { %3506 = vmatmul.mubr.bf16.vlgmr.msra.gmra.mrb[44].mxu0 %v3472_v1  ;;  %3549 = vmatmul.mubr.bf16.vlgmr.msra.gmra.mrb[44].mxu1 %v3472_v1  ;;  %v7142_v1 = vld [vmem:[#allocation16 + $0x28] ss:$16 sps:$4 sm:$0xff]  }
 0xc19   : > { %3613 = vmatpush1.bf16.msra.mxu0 %v6775_v7  ;;  %3656 = vmatpush1.bf16.msra.mxu1 %v6778_v32 }
 0xc1a   : > { %3614 = vmatprep.subr.bf16.mxu0 %v6780_v18  ;;  %3657 = vmatprep.subr.bf16.mxu1 %v6816_v30 }
 0xc1b   : > { %3644 = vmatprep.mubr.bf16.mxu0 %v5853_v3  ;;  %3687 = vmatprep.mubr.bf16.mxu1 %v5853_v3 }
 0xc1d   : > { %3615 = vmatpush1.bf16.msra.mxu0 %v6788_v22  ;;  %3658 = vmatpush1.bf16.msra.mxu1 %v6821_v62 }
 0xc1e   : > { %3616 = vmatprep.subr.bf16.mxu0 %v6819_v28  ;;  %3659 = vmatprep.subr.bf16.mxu1 %v6825_v45 }
 0xc21   : > { %3617 = vmatpush1.bf16.msra.mxu0 %v6827_v42  ;;  %3660 = vmatpush1.bf16.msra.mxu1 %v6831_v14 }
 0xc22   : > { %3618 = vmatprep.subr.bf16.mxu0 %v6829_v29  ;;  %3661 = vmatprep.subr.bf16.mxu1 %v6834_v41 }
 0xc25   : > { %3619 = vmatpush1.bf16.msra.mxu0 %v6838_v31  ;;  %3662 = vmatpush1.bf16.msra.mxu1 %v6840_v24 }
 0xc26   : > { %3620 = vmatprep.subr.bf16.mxu0 %v6844_v17  ;;  %3663 = vmatprep.subr.bf16.mxu1 %v6846_v33 }
 0xc29   : > { %3621 = vmatpush1.bf16.msra.mxu0 %v6850_v16  ;;  %3664 = vmatpush1.bf16.msra.mxu1 %v6852_v26 }
 0xc2a   : > { %3622 = vmatprep.subr.bf16.mxu0 %v6856_v37  ;;  %3665 = vmatprep.subr.bf16.mxu1 %v6858_v11 }
 0xc2d   : > { %3623 = vmatpush1.bf16.msra.mxu0 %v6862_v8  ;;  %3666 = vmatpush1.bf16.msra.mxu1 %v6864_v23 }
 0xc2e   : > { %3624 = vmatprep.subr.bf16.mxu0 %v6868_v46  ;;  %3667 = vmatprep.subr.bf16.mxu1 %v6870_v47 }
 0xc31   : > { %3625 = vmatpush1.bf16.msra.mxu0 %v6874_v48  ;;  %3668 = vmatpush1.bf16.msra.mxu1 %v6880_v40 }
 0xc32   : > { %3626 = vmatprep.subr.bf16.mxu0 %v6878_v49  ;;  %3669 = vmatprep.subr.bf16.mxu1 %v6882_v50 }
 0xc35   : > { %3627 = vmatpush1.bf16.msra.mxu0 %v6886_v51  ;;  %3670 = vmatpush1.bf16.msra.mxu1 %v6888_v52 }
 0xc36   : > { %3751 = vmatprep.subr.bf16.mxu0 %v6770_v39  ;;  %3794 = vmatprep.subr.bf16.mxu1 %v6772_v43 }
 0xceb   : > { %v3507_v7 = vpop.f32.mrb[44].mxu0  ;;  %v3550_v32 = vpop.f32.mrb[44].mxu1 }
 0xcec   : > { %v4683_v18 = vadd.f32 %v3507_v7, %v6947_v56  ;;  %v3509_v22 = vpop.f32.mrb[45].mxu0  ;;  %v3552_v30 = vpop.f32.mrb[45].mxu1  ;;  %v4715_v43 = vadd.f32 %v3550_v32, %v6956_v63  ;;  %v7145_v7 = vld [vmem:[#allocation16 + $0x44] ss:$16 sps:$4 sm:$0xff]   ;;  %v7148_v32 = vld [vmem:[#allocation16 + $0x4c] ss:$16 sps:$4 sm:$0xff]  }
 0xced   : > { %v4684_v28 = vadd.f32 %v3509_v22, %v6951_v59  ;;  %v3511_v62 = vpop.f32.mrb[46].mxu0  ;;  %v3554_v45 = vpop.f32.mrb[46].mxu1  ;;  %v4716_v16 = vadd.f32 %v3552_v30, %v6964_v20  ;;  %v7154_v22 = vld [vmem:[#allocation16 + $0x48] ss:$16 sps:$4 sm:$0xff]   ;;  %v7157_v30 = vld [vmem:[#allocation16 + $0x64] ss:$16 sps:$4 sm:$0xff]  }
 0xcee   : > { %v3567_v42 = vmul.f32 0.5, %v4683_v18  ;;  %v4685_v29 = vadd.f32 %v3511_v62, %v6947_v56  ;;  %v3513_v14 = vpop.f32.mrb[47].mxu0  ;;  %v3556_v41 = vpop.f32.mrb[47].mxu1  ;;  %v4717_v33 = vadd.f32 %v3554_v45, %v6956_v63  ;;  %v7151_v18 = vld [vmem:[#allocation16 + $0x40] ss:$16 sps:$4 sm:$0xff]  }
 0xcef   : > { %v3575_v31 = vmul.f32 0.5, %v4684_v28  ;;  %v4686_v39 = vadd.f32 %v3513_v14, %v6951_v59  ;;  %v4718_v26 = vadd.f32 %v3556_v41, %v6964_v20  ;;  %v3585_v23 = vmul.f32 0.5, %v4716_v16  ;;  %v7160_v28 = vld [vmem:[#allocation16 + $0x6c] ss:$16 sps:$4 sm:$0xff]   ;;  %v7163_v62 = vld [vmem:[#allocation16 + $0x60] ss:$16 sps:$4 sm:$0xff]  }
 0xcf0   : > { %5406 = vtanh.f32 %v3567_v42  ;;  %v3568_v24 = vmul.f32 0.5, %v4685_v29  ;;  %v7166_v45 = vld [vmem:[#allocation16 + $0x68] ss:$16 sps:$4 sm:$0xff]   ;;  %v7169_v42 = vld [vmem:[#allocation16 + $0x84] ss:$16 sps:$4 sm:$0xff]  }
 0xcf1   : > { %5408 = vtanh.f32 %v3575_v31  ;;  %v3576_v17 = vmul.f32 0.5, %v4686_v39  ;;  %v3586_v47 = vmul.f32 0.5, %v4718_v26  ;;  %v7172_v29 = vld [vmem:[#allocation16 + $0x8c] ss:$16 sps:$4 sm:$0xff]   ;;  %v7175_v14 = vld [vmem:[#allocation16 + $0x80] ss:$16 sps:$4 sm:$0xff]  }
 0xcf2   : > { %5410 = vtanh.f32 %v3568_v24  ;;  %v7178_v41 = vld [vmem:[#allocation16 + $0x88] ss:$16 sps:$4 sm:$0xff]   ;;  %v7181_v31 = vld [vmem:[#allocation16 + $0xa4] ss:$16 sps:$4 sm:$0xff]   ;;  %v7184_v39 = vld [vmem:[#allocation16 + $0xac] ss:$16 sps:$4 sm:$0xff]  }
 0xcf3   : > { %5412 = vtanh.f32 %v4715_v43  ;;  %v7187_v43 = vld [vmem:[#allocation16 + $0xa0] ss:$16 sps:$4 sm:$0xff]   ;;  %v7190_v24 = vld [vmem:[#allocation16 + $0xa8] ss:$16 sps:$4 sm:$0xff]  }
 0xcf4   : > { %5414 = vtanh.f32 %v3576_v17  ;;  %v7193_v17 = vld [vmem:[#allocation16 + $0xc4] ss:$16 sps:$4 sm:$0xff]   ;;  %v7199_v16 = vld [vmem:[#allocation16 + $0xc0] ss:$16 sps:$4 sm:$0xff]   ;;  %v7202_v26 = vld [vmem:[#allocation16 + $0xc8] ss:$16 sps:$4 sm:$0xff]  }
 0xcf5   : > { %5416 = vtanh.f32 %v4717_v33  ;;  %v7196_v33 = vld [vmem:[#allocation16 + $0xcc] ss:$16 sps:$4 sm:$0xff]  }
 0xcf6   : > { %5418 = vtanh.f32 %v3585_v23  ;;  %v7214_v23 = vld [vmem:[#allocation16 + $0xe8] ss:$16 sps:$4 sm:$0xff]  }
 0xcf7   : > { %5420 = vtanh.f32 %v3586_v47  ;;  %v7220_v47 = vld [vmem:[#allocation16 + $0xc] ss:$16 sps:$4 sm:$0xff]  }
 0xcfa   : > { %v5407_v37 = vpop.eup %5406 }
 0xcfb   : > { %v5409_v11 = vpop.eup %5408  ;;  %v3571_v8 = vmul.f32 0.5, %v5407_v37  ;;  %v7205_v37 = vld [vmem:[#allocation16 + $0xe4] ss:$16 sps:$4 sm:$0xff]  }
 0xcfc   : > { %v3579_v46 = vmul.f32 0.5, %v5409_v11  ;;  %v5411_v48 = vpop.eup %5410  ;;  %v7208_v11 = vld [vmem:[#allocation16 + $0xec] ss:$16 sps:$4 sm:$0xff]  }
 0xcfd   : > { %v3573_v49 = vadd.f32 0.5, %v3571_v8  ;;  %v5413_v40 = vpop.eup %5412  ;;  %v3572_v51 = vmul.f32 0.5, %v5411_v48  ;;  %v7211_v8 = vld [vmem:[#allocation16 + $0xe0] ss:$16 sps:$4 sm:$0xff]  }
 0xcfe   : > { %v3581_v50 = vadd.f32 0.5, %v3579_v46  ;;  %v5415_v52 = vpop.eup %5414  ;;  %v7217_v46 = vld [vmem:[#allocation16 + $0x4] ss:$16 sps:$4 sm:$0xff]  }
 0xcff   : > { %v3595_v38 = vmul.f32 %v5413_v40, %v3573_v49  ;;  %v3574_v5 = vadd.f32 0.5, %v3572_v51  ;;  %v3580_v9 = vmul.f32 0.5, %v5415_v52  ;;  %v5417_v10 = vpop.eup %5416 }
 0xd00   : > { %v3593_v2 = vmul.f32 %v3581_v50, %v7068_v21  ;;  %v5419_v36 = vpop.eup %5418 }
 0xd01   : > { %v3582_v13 = vadd.f32 0.5, %v3580_v9  ;;  %v3596_v27 = vmul.f32 %v5417_v10, %v3574_v5  ;;  %v5421_v12 = vpop.eup %5420  ;;  %v3589_v53 = vmul.f32 0.5, %v5419_v36 }
 0xd02   : > { %v7118_v4 = vadd.f32 %v3595_v38, %v3593_v2  ;;  %v3590_v21 = vmul.f32 0.5, %v5421_v12 }
 0xd03   : > { %v3594_v6 = vmul.f32 %v3582_v13, %v7072_v57  ;;  %v3591_v34 = vadd.f32 0.5, %v3589_v53  ;;  %v7125_v57 = vld [vmem:[#allocation16] ss:$16 sps:$4 sm:$0xff]  }
 0xd04   : > { %5422 = vtanh.f32 %v7118_v4  ;;  %v3592_v25 = vadd.f32 0.5, %v3590_v21 }
 0xd05   : > { %v7122_v44 = vadd.f32 %v3596_v27, %v3594_v6 }
 0xd07   : > { %5424 = vtanh.f32 %v7122_v44 }
 0xd0e   : > { %v5423_v55 = vpop.eup %5422 }
 0xd0f   : > { %v3601_v19 = vmul.f32 %v5423_v55, %v3591_v34 }
 0xd11   : > { %v5425_v60 = vpop.eup %5424 }
 0xd12   : > { %v3602_v58 = vmul.f32 %v5425_v60, %v3592_v25 }
 0xd14   : > { %v3611_v61 = vpack.c.bf16 %v3602_v58, %v3601_v19 }
 0xd16   : > { %3645 = vmatmul.mubr.bf16.vlgmr.msra.gmra.mrb[48].mxu0 %v3611_v61  ;;  %3688 = vmatmul.mubr.bf16.vlgmr.msra.gmra.mrb[48].mxu1 %v3611_v61 }
 0xd17   : > { %3752 = vmatpush1.bf16.msra.mxu0 %v7125_v57  ;;  %3795 = vmatpush1.bf16.msra.mxu1 %v7128_v15 }
 0xd18   : > { %3753 = vmatprep.subr.bf16.mxu0 %v7131_v54  ;;  %3796 = vmatprep.subr.bf16.mxu1 %v7134_v0 }
 0xd19   : > { %3783 = vmatprep.mubr.bf16.mxu0 %v5853_v3  ;;  %3826 = vmatprep.mubr.bf16.mxu1 %v5853_v3 }
 0xd1b   : > { %3754 = vmatpush1.bf16.msra.mxu0 %v7139_v35  ;;  %3797 = vmatpush1.bf16.msra.mxu1 %v7142_v1 }
 0xd1c   : > { %3755 = vmatprep.subr.bf16.mxu0 %v7145_v7  ;;  %3798 = vmatprep.subr.bf16.mxu1 %v7148_v32 }
 0xd1f   : > { %3756 = vmatpush1.bf16.msra.mxu0 %v7151_v18  ;;  %3799 = vmatpush1.bf16.msra.mxu1 %v7154_v22 }
 0xd20   : > { %3757 = vmatprep.subr.bf16.mxu0 %v7157_v30  ;;  %3800 = vmatprep.subr.bf16.mxu1 %v7160_v28 }
 0xd23   : > { %3758 = vmatpush1.bf16.msra.mxu0 %v7163_v62  ;;  %3801 = vmatpush1.bf16.msra.mxu1 %v7166_v45 }
 0xd24   : > { %3759 = vmatprep.subr.bf16.mxu0 %v7169_v42  ;;  %3802 = vmatprep.subr.bf16.mxu1 %v7172_v29 }
 0xd27   : > { %3760 = vmatpush1.bf16.msra.mxu0 %v7175_v14  ;;  %3803 = vmatpush1.bf16.msra.mxu1 %v7178_v41 }
 0xd28   : > { %3761 = vmatprep.subr.bf16.mxu0 %v7181_v31  ;;  %3804 = vmatprep.subr.bf16.mxu1 %v7184_v39 }
 0xd2b   : > { %3762 = vmatpush1.bf16.msra.mxu0 %v7187_v43  ;;  %3805 = vmatpush1.bf16.msra.mxu1 %v7190_v24 }
 0xd2c   : > { %3763 = vmatprep.subr.bf16.mxu0 %v7193_v17  ;;  %3806 = vmatprep.subr.bf16.mxu1 %v7196_v33 }
 0xd2f   : > { %3764 = vmatpush1.bf16.msra.mxu0 %v7199_v16  ;;  %3807 = vmatpush1.bf16.msra.mxu1 %v7202_v26 }
 0xd30   : > { %3765 = vmatprep.subr.bf16.mxu0 %v7205_v37  ;;  %3808 = vmatprep.subr.bf16.mxu1 %v7208_v11 }
 0xd33   : > { %3766 = vmatpush1.bf16.msra.mxu0 %v7211_v8  ;;  %3809 = vmatpush1.bf16.msra.mxu1 %v7214_v23 }
 0xd34   : > { %3890 = vmatprep.subr.bf16.mxu0 %v7217_v46  ;;  %3933 = vmatprep.subr.bf16.mxu1 %v7220_v47 }
 0xde9   : > { %v3646_v48 = vpop.f32.mrb[48].mxu0  ;;  %v3689_v49 = vpop.f32.mrb[48].mxu1 }
 0xdea   : > { %v4687_v40 = vadd.f32 %v3646_v48, %v6947_v56  ;;  %v3648_v50 = vpop.f32.mrb[49].mxu0  ;;  %v3691_v51 = vpop.f32.mrb[49].mxu1  ;;  %v4719_v36 = vadd.f32 %v3689_v49, %v6956_v63 }
 0xdeb   : > { %v4688_v52 = vadd.f32 %v3648_v50, %v6951_v59  ;;  %v3650_v38 = vpop.f32.mrb[50].mxu0  ;;  %v3693_v2 = vpop.f32.mrb[50].mxu1  ;;  %v4720_v55 = vadd.f32 %v3691_v51, %v6964_v20 }
 0xdec   : > { %v3706_v5 = vmul.f32 0.5, %v4687_v40  ;;  %v4689_v9 = vadd.f32 %v3650_v38, %v6947_v56  ;;  %v3652_v10 = vpop.f32.mrb[51].mxu0  ;;  %v3695_v13 = vpop.f32.mrb[51].mxu1  ;;  %v4721_v21 = vadd.f32 %v3693_v2, %v6956_v63 }
 0xded   : > { %v3714_v27 = vmul.f32 0.5, %v4688_v52  ;;  %v4690_v6 = vadd.f32 %v3652_v10, %v6951_v59  ;;  %v4722_v34 = vadd.f32 %v3695_v13, %v6964_v20  ;;  %v3724_v58 = vmul.f32 0.5, %v4720_v55 }
 0xdee   : > { %5426 = vtanh.f32 %v3706_v5  ;;  %v3707_v12 = vmul.f32 0.5, %v4689_v9 }
 0xdef   : > { %5428 = vtanh.f32 %v3714_v27  ;;  %v3715_v53 = vmul.f32 0.5, %v4690_v6  ;;  %v3725_v48 = vmul.f32 0.5, %v4722_v34 }
 0xdf0   : > { %5430 = vtanh.f32 %v3707_v12 }
 0xdf1   : > { %5432 = vtanh.f32 %v4719_v36 }
 0xdf2   : > { %5434 = vtanh.f32 %v3715_v53 }
 0xdf3   : > { %5436 = vtanh.f32 %v4721_v21 }
 0xdf4   : > { %5438 = vtanh.f32 %v3724_v58 }
 0xdf5   : > { %5440 = vtanh.f32 %v3725_v48 }
 0xdf8   : > { %v5427_v25 = vpop.eup %5426 }
 0xdf9   : > { %v5429_v60 = vpop.eup %5428  ;;  %v3710_v19 = vmul.f32 0.5, %v5427_v25 }
 0xdfa   : > { %v3718_v61 = vmul.f32 0.5, %v5429_v60  ;;  %v5431_v49 = vpop.eup %5430 }
 0xdfb   : > { %v3712_v40 = vadd.f32 0.5, %v3710_v19  ;;  %v5433_v50 = vpop.eup %5432  ;;  %v3711_v38 = vmul.f32 0.5, %v5431_v49 }
 0xdfc   : > { %v3720_v52 = vadd.f32 0.5, %v3718_v61  ;;  %v5435_v5 = vpop.eup %5434 }
 0xdfd   : > { %v3734_v2 = vmul.f32 %v5433_v50, %v3712_v40  ;;  %v3713_v51 = vadd.f32 0.5, %v3711_v38  ;;  %v3719_v10 = vmul.f32 0.5, %v5435_v5  ;;  %v5437_v13 = vpop.eup %5436 }
 0xdfe   : > { %v3732_v9 = vmul.f32 %v3720_v52, %v7118_v4  ;;  %v5439_v21 = vpop.eup %5438 }
 0xdff   : > { %v3721_v6 = vadd.f32 0.5, %v3719_v10  ;;  %v3735_v36 = vmul.f32 %v5437_v13, %v3713_v51  ;;  %v5441_v55 = vpop.eup %5440  ;;  %v3728_v34 = vmul.f32 0.5, %v5439_v21 }
 0xe00   : > { %v7232_v27 = vadd.f32 %v3734_v2, %v3732_v9  ;;  %v3729_v4 = vmul.f32 0.5, %v5441_v55 }
 0xe01   : > { %v3733_v12 = vmul.f32 %v3721_v6, %v7122_v44  ;;  %v3730_v60 = vadd.f32 0.5, %v3728_v34 }
 0xe02   : > { %5442 = vtanh.f32 %v7232_v27  ;;  %v3731_v19 = vadd.f32 0.5, %v3729_v4 }
 0xe03   : > { %v7236_v53 = vadd.f32 %v3735_v36, %v3733_v12 }
 0xe05   : > { %5444 = vtanh.f32 %v7236_v53 }
 0xe0c   : > { %v5443_v25 = vpop.eup %5442 }
 0xe0d   : > { %v3740_v61 = vmul.f32 %v5443_v25, %v3730_v60 }
 0xe0f   : > { %v5445_v58 = vpop.eup %5444 }
 0xe10   : > { %v3741_v48 = vmul.f32 %v5445_v58, %v3731_v19 }
 0xe12   : > { %v3750_v49 = vpack.c.bf16 %v3741_v48, %v3740_v61 }
 0xe14   : > { %3784 = vmatmul.mubr.bf16.vlgmr.msra.gmra.mrb[52].mxu0 %v3750_v49  ;;  %3827 = vmatmul.mubr.bf16.vlgmr.msra.gmra.mrb[52].mxu1 %v3750_v49 }
 0xe15   : > { %3891 = vmatpush1.bf16.msra.mxu0 %v7125_v57  ;;  %3934 = vmatpush1.bf16.msra.mxu1 %v7128_v15 }
 0xe16   : > { %3892 = vmatprep.subr.bf16.mxu0 %v7131_v54  ;;  %3935 = vmatprep.subr.bf16.mxu1 %v7134_v0 }
 0xe17   : > { %3922 = vmatprep.mubr.bf16.mxu0 %v5853_v3  ;;  %3965 = vmatprep.mubr.bf16.mxu1 %v5853_v3 }
 0xe19   : > { %3893 = vmatpush1.bf16.msra.mxu0 %v7139_v35  ;;  %3936 = vmatpush1.bf16.msra.mxu1 %v7142_v1 }
 0xe1a   : > { %3894 = vmatprep.subr.bf16.mxu0 %v7145_v7  ;;  %3937 = vmatprep.subr.bf16.mxu1 %v7148_v32 }
 0xe1d   : > { %3895 = vmatpush1.bf16.msra.mxu0 %v7151_v18  ;;  %3938 = vmatpush1.bf16.msra.mxu1 %v7154_v22 }
 0xe1e   : > { %3896 = vmatprep.subr.bf16.mxu0 %v7157_v30  ;;  %3939 = vmatprep.subr.bf16.mxu1 %v7160_v28 }
 0xe21   : > { %3897 = vmatpush1.bf16.msra.mxu0 %v7163_v62  ;;  %3940 = vmatpush1.bf16.msra.mxu1 %v7166_v45 }
 0xe22   : > { %3898 = vmatprep.subr.bf16.mxu0 %v7169_v42  ;;  %3941 = vmatprep.subr.bf16.mxu1 %v7172_v29 }
 0xe25   : > { %3899 = vmatpush1.bf16.msra.mxu0 %v7175_v14  ;;  %3942 = vmatpush1.bf16.msra.mxu1 %v7178_v41 }
 0xe26   : > { %3900 = vmatprep.subr.bf16.mxu0 %v7181_v31  ;;  %3943 = vmatprep.subr.bf16.mxu1 %v7184_v39 }
 0xe29   : > { %3901 = vmatpush1.bf16.msra.mxu0 %v7187_v43  ;;  %3944 = vmatpush1.bf16.msra.mxu1 %v7190_v24 }
 0xe2a   : > { %3902 = vmatprep.subr.bf16.mxu0 %v7193_v17  ;;  %3945 = vmatprep.subr.bf16.mxu1 %v7196_v33 }
 0xe2d   : > { %3903 = vmatpush1.bf16.msra.mxu0 %v7199_v16  ;;  %3946 = vmatpush1.bf16.msra.mxu1 %v7202_v26 }
 0xe2e   : > { %3904 = vmatprep.subr.bf16.mxu0 %v7205_v37  ;;  %3947 = vmatprep.subr.bf16.mxu1 %v7208_v11 }
 0xe31   : > { %3905 = vmatpush1.bf16.msra.mxu0 %v7211_v8  ;;  %3948 = vmatpush1.bf16.msra.mxu1 %v7214_v23 }
 0xe32   : > { %4029 = vmatprep.subr.bf16.mxu0 %v7217_v46  ;;  %4072 = vmatprep.subr.bf16.mxu1 %v7220_v47 }
 0xee7   : > { %v3785_v44 = vpop.f32.mrb[52].mxu0  ;;  %v3828_v40 = vpop.f32.mrb[52].mxu1 }
 0xee8   : > { %v4691_v50 = vadd.f32 %v3785_v44, %v6947_v56  ;;  %v3787_v52 = vpop.f32.mrb[53].mxu0  ;;  %v3830_v38 = vpop.f32.mrb[53].mxu1  ;;  %v4723_v47 = vadd.f32 %v3828_v40, %v6956_v63 }
 0xee9   : > { %v4692_v5 = vadd.f32 %v3787_v52, %v6951_v59  ;;  %v3789_v2 = vpop.f32.mrb[54].mxu0  ;;  %v3832_v9 = vpop.f32.mrb[54].mxu1  ;;  %v4724_v34 = vadd.f32 %v3830_v38, %v6964_v20 }
 0xeea   : > { %v3845_v51 = vmul.f32 0.5, %v4691_v50  ;;  %v4693_v10 = vadd.f32 %v3789_v2, %v6947_v56  ;;  %v3791_v13 = vpop.f32.mrb[55].mxu0  ;;  %v3834_v6 = vpop.f32.mrb[55].mxu1  ;;  %v4725_v55 = vadd.f32 %v3832_v9, %v6956_v63 }
 0xeeb   : > { %v3853_v36 = vmul.f32 0.5, %v4692_v5  ;;  %v4694_v46 = vadd.f32 %v3791_v13, %v6951_v59  ;;  %v4726_v4 = vadd.f32 %v3834_v6, %v6964_v20  ;;  %v3863_v58 = vmul.f32 0.5, %v4724_v34 }
 0xeec   : > { %5446 = vtanh.f32 %v3845_v51  ;;  %v3846_v12 = vmul.f32 0.5, %v4693_v10 }
 0xeed   : > { %5448 = vtanh.f32 %v3853_v36  ;;  %v3854_v21 = vmul.f32 0.5, %v4694_v46  ;;  %v3864_v48 = vmul.f32 0.5, %v4726_v4 }
 0xeee   : > { %5450 = vtanh.f32 %v3846_v12 }
 0xeef   : > { %5452 = vtanh.f32 %v4723_v47 }
 0xef0   : > { %5454 = vtanh.f32 %v3854_v21 }
 0xef1   : > { %5456 = vtanh.f32 %v4725_v55 }
 0xef2   : > { %5458 = vtanh.f32 %v3863_v58 }
 0xef3   : > { %5460 = vtanh.f32 %v3864_v48 }
 0xef6   : > { %v5447_v25 = vpop.eup %5446 }
 0xef7   : > { %v5449_v60 = vpop.eup %5448  ;;  %v3849_v19 = vmul.f32 0.5, %v5447_v25 }
 0xef8   : > { %v3857_v61 = vmul.f32 0.5, %v5449_v60  ;;  %v5451_v49 = vpop.eup %5450 }
 0xef9   : > { %v3851_v44 = vadd.f32 0.5, %v3849_v19  ;;  %v5453_v40 = vpop.eup %5452  ;;  %v3850_v52 = vmul.f32 0.5, %v5451_v49 }
 0xefa   : > { %v3859_v50 = vadd.f32 0.5, %v3857_v61  ;;  %v5455_v5 = vpop.eup %5454 }
 0xefb   : > { %v3873_v2 = vmul.f32 %v5453_v40, %v3851_v44  ;;  %v3852_v38 = vadd.f32 0.5, %v3850_v52  ;;  %v3858_v51 = vmul.f32 0.5, %v5455_v5  ;;  %v5457_v10 = vpop.eup %5456 }
 0xefc   : > { %v3871_v9 = vmul.f32 %v3859_v50, %v7232_v27  ;;  %v5459_v12 = vpop.eup %5458 }
 0xefd   : > { %v3860_v6 = vadd.f32 0.5, %v3858_v51  ;;  %v3874_v36 = vmul.f32 %v5457_v10, %v3852_v38  ;;  %v5461_v21 = vpop.eup %5460  ;;  %v3867_v55 = vmul.f32 0.5, %v5459_v12 }
 0xefe   : > { %v7282_v13 = vadd.f32 %v3873_v2, %v3871_v9  ;;  %v3868_v27 = vmul.f32 0.5, %v5461_v21 }
 0xeff   : > { %v3872_v46 = vmul.f32 %v3860_v6, %v7236_v53  ;;  %v3869_v4 = vadd.f32 0.5, %v3867_v55 }
 0xf00   : > { %5462 = vtanh.f32 %v7282_v13  ;;  %v3870_v25 = vadd.f32 0.5, %v3868_v27 }
 0xf01   : > { %v7286_v47 = vadd.f32 %v3874_v36, %v3872_v46 }
 0xf03   : > { %5464 = vtanh.f32 %v7286_v47 }
 0xf0a   : > { %v5463_v34 = vpop.eup %5462 }
 0xf0b   : > { %v3879_v19 = vmul.f32 %v5463_v34, %v3869_v4 }
 0xf0d   : > { %v5465_v60 = vpop.eup %5464 }
 0xf0e   : > { %v3880_v58 = vmul.f32 %v5465_v60, %v3870_v25 }
 0xf10   : > { %v3889_v61 = vpack.c.bf16 %v3880_v58, %v3879_v19 }
 0xf12   : > { %3923 = vmatmul.mubr.bf16.vlgmr.msra.gmra.mrb[56].mxu0 %v3889_v61  ;;  %3966 = vmatmul.mubr.bf16.vlgmr.msra.gmra.mrb[56].mxu1 %v3889_v61 }
 0xf13   : > { %4030 = vmatpush1.bf16.msra.mxu0 %v7125_v57  ;;  %4073 = vmatpush1.bf16.msra.mxu1 %v7128_v15 }
 0xf14   : > { %4031 = vmatprep.subr.bf16.mxu0 %v7131_v54  ;;  %4074 = vmatprep.subr.bf16.mxu1 %v7134_v0 }
 0xf15   : > { %4061 = vmatprep.mubr.bf16.mxu0 %v5853_v3  ;;  %4104 = vmatprep.mubr.bf16.mxu1 %v5853_v3 }
 0xf17   : > { %4032 = vmatpush1.bf16.msra.mxu0 %v7139_v35  ;;  %4075 = vmatpush1.bf16.msra.mxu1 %v7142_v1 }
 0xf18   : > { %4033 = vmatprep.subr.bf16.mxu0 %v7145_v7  ;;  %4076 = vmatprep.subr.bf16.mxu1 %v7148_v32 }
 0xf1b   : > { %4034 = vmatpush1.bf16.msra.mxu0 %v7151_v18  ;;  %4077 = vmatpush1.bf16.msra.mxu1 %v7154_v22 }
 0xf1c   : > { %4035 = vmatprep.subr.bf16.mxu0 %v7157_v30  ;;  %4078 = vmatprep.subr.bf16.mxu1 %v7160_v28 }
 0xf1f   : > { %4036 = vmatpush1.bf16.msra.mxu0 %v7163_v62  ;;  %4079 = vmatpush1.bf16.msra.mxu1 %v7166_v45 }
 0xf20   : > { %4037 = vmatprep.subr.bf16.mxu0 %v7169_v42  ;;  %4080 = vmatprep.subr.bf16.mxu1 %v7172_v29 }
 0xf23   : > { %4038 = vmatpush1.bf16.msra.mxu0 %v7175_v14  ;;  %4081 = vmatpush1.bf16.msra.mxu1 %v7178_v41 }
 0xf24   : > { %4039 = vmatprep.subr.bf16.mxu0 %v7181_v31  ;;  %4082 = vmatprep.subr.bf16.mxu1 %v7184_v39 }
 0xf27   : > { %4040 = vmatpush1.bf16.msra.mxu0 %v7187_v43  ;;  %4083 = vmatpush1.bf16.msra.mxu1 %v7190_v24 }
 0xf28   : > { %4041 = vmatprep.subr.bf16.mxu0 %v7193_v17  ;;  %4084 = vmatprep.subr.bf16.mxu1 %v7196_v33 }
 0xf2b   : > { %4042 = vmatpush1.bf16.msra.mxu0 %v7199_v16  ;;  %4085 = vmatpush1.bf16.msra.mxu1 %v7202_v26 }
 0xf2c   : > { %4043 = vmatprep.subr.bf16.mxu0 %v7205_v37  ;;  %4086 = vmatprep.subr.bf16.mxu1 %v7208_v11 }
 0xf2f   : > { %4044 = vmatpush1.bf16.msra.mxu0 %v7211_v8  ;;  %4087 = vmatpush1.bf16.msra.mxu1 %v7214_v23 }
 0xfe5   : > { %v3924_v3 = vpop.f32.mrb[56].mxu0  ;;  %v3967_v57 = vpop.f32.mrb[56].mxu1 }
 0xfe6   : > { %v4695_v15 = vadd.f32 %v3924_v3, %v6947_v56  ;;  %v3926_v54 = vpop.f32.mrb[57].mxu0  ;;  %v3969_v0 = vpop.f32.mrb[57].mxu1  ;;  %v4727_v45 = vadd.f32 %v3967_v57, %v6956_v63 }
 0xfe7   : > { %v4696_v35 = vadd.f32 %v3926_v54, %v6951_v59  ;;  %v3928_v1 = vpop.f32.mrb[58].mxu0  ;;  %v3971_v7 = vpop.f32.mrb[58].mxu1  ;;  %v4728_v41 = vadd.f32 %v3969_v0, %v6964_v20 }
 0xfe8   : > { %v3984_v32 = vmul.f32 0.5, %v4695_v15  ;;  %v4697_v18 = vadd.f32 %v3928_v1, %v6947_v56  ;;  %v3930_v22 = vpop.f32.mrb[59].mxu0  ;;  %v3973_v30 = vpop.f32.mrb[59].mxu1  ;;  %v4729_v14 = vadd.f32 %v3971_v7, %v6956_v63 }
 0xfe9   : > { %v3992_v28 = vmul.f32 0.5, %v4696_v35  ;;  %v4698_v62 = vadd.f32 %v3930_v22, %v6951_v59  ;;  %v4730_v31 = vadd.f32 %v3973_v30, %v6964_v20  ;;  %v4002_v17 = vmul.f32 0.5, %v4728_v41 }
 0xfea   : > { %5466 = vtanh.f32 %v3984_v32  ;;  %v3985_v42 = vmul.f32 0.5, %v4697_v18 }
 0xfeb   : > { %5468 = vtanh.f32 %v3992_v28  ;;  %v3993_v29 = vmul.f32 0.5, %v4698_v62  ;;  %v4003_v16 = vmul.f32 0.5, %v4730_v31 }
 0xfec   : > { %5470 = vtanh.f32 %v3985_v42 }
 0xfed   : > { %5472 = vtanh.f32 %v4727_v45 }
 0xfee   : > { %5474 = vtanh.f32 %v3993_v29 }
 0xfef   : > { %5476 = vtanh.f32 %v4729_v14 }
 0xff0   : > { %5478 = vtanh.f32 %v4002_v17 }
 0xff1   : > { %5480 = vtanh.f32 %v4003_v16 }
 0xff4   : > { %v5467_v39 = vpop.eup %5466 }
 0xff5   : > { %v5469_v43 = vpop.eup %5468  ;;  %v3988_v24 = vmul.f32 0.5, %v5467_v39 }
 0xff6   : > { %v3996_v33 = vmul.f32 0.5, %v5469_v43  ;;  %v5471_v26 = vpop.eup %5470 }
 0xff7   : > { %v3990_v37 = vadd.f32 0.5, %v3988_v24  ;;  %v5473_v11 = vpop.eup %5472  ;;  %v3989_v23 = vmul.f32 0.5, %v5471_v26 }
 0xff8   : > { %v3998_v8 = vadd.f32 0.5, %v3996_v33  ;;  %v5475_v53 = vpop.eup %5474 }
 0xff9   : > { %v4012_v48 = vmul.f32 %v5473_v11, %v3990_v37  ;;  %v3991_v44 = vadd.f32 0.5, %v3989_v23  ;;  %v3997_v40 = vmul.f32 0.5, %v5475_v53  ;;  %v5477_v50 = vpop.eup %5476 }
 0xffa   : > { %v4010_v49 = vmul.f32 %v3998_v8, %v7282_v13  ;;  %v5479_v51 = vpop.eup %5478 }
 0xffb   : > { %v3999_v5 = vadd.f32 0.5, %v3997_v40  ;;  %v4013_v2 = vmul.f32 %v5477_v50, %v3991_v44  ;;  %v5481_v10 = vpop.eup %5480  ;;  %v4006_v6 = vmul.f32 0.5, %v5479_v51  ;;  %v5570_v51 = vld [vmem:[#allocation17] sm:$0xff] (!%p4562_p5)  }
 0xffc   : > { %v4014_v52 = vadd.f32 %v4012_v48, %v4010_v49  ;;  %v4007_v36 = vmul.f32 0.5, %v5481_v10  ;;  %v5571_v10 = vld [vmem:[#allocation17 + $0x8] sm:$0xff] (!%p4562_p5)  }
 0xffd   : > { %v4011_v9 = vmul.f32 %v3999_v5, %v7286_v47  ;;  %v4008_v13 = vadd.f32 0.5, %v4006_v6  ;;  %v5572_v6 = vld [vmem:[#allocation17 + $0x10] sm:$0xff] (!%p4562_p5)  }
 0xffe   : > { %5482 = vtanh.f32 %v4014_v52  ;;  %v4009_v12 = vadd.f32 0.5, %v4007_v36  ;;  %v5573_v36 = vld [vmem:[#allocation17 + $0x18] sm:$0xff] (!%p4562_p5)  }
 0xfff   : > { %v7331_v38 = vadd.f32 %v4013_v2, %v4011_v9 }
0x1001   : > { %5484 = vtanh.f32 %v7331_v38 }
0x1008   : > { %v5483_v46 = vpop.eup %5482 }
0x1009   : > { %v4018_v55 = vmul.f32 %v5483_v46, %v4008_v13  ;;  %v5574_v46 = vld [vmem:[#allocation17 + $0x20] sm:$0xff] (!%p4562_p5)   ;;  %v5575_v13 = vld [vmem:[#allocation17 + $0x28] sm:$0xff] (!%p4562_p5)  }
0x100b   : > { %v5485_v21 = vpop.eup %5484 }
0x100c   : > { %v4019_v27 = vmul.f32 %v5485_v21, %v4009_v12  ;;  %v5576_v12 = vld [vmem:[#allocation17 + $0x30] sm:$0xff] (!%p4562_p5)   ;;  %v5577_v21 = vld [vmem:[#allocation17 + $0x38] sm:$0xff] (!%p4562_p5)  }
0x100e   : > { %v4028_v34 = vpack.c.bf16 %v4019_v27, %v4018_v55  ;;  %v4563_v27 = vld [vmem:[%s7432_s22] ss:$0 sm:$0xff] (!%p4562_p5) }
0x1010   : > { %4062 = vmatmul.mubr.bf16.vlgmr.msra.gmra.mrb[60].mxu0 %v4028_v34  ;;  %4105 = vmatmul.mubr.bf16.vlgmr.msra.gmra.mrb[60].mxu1 %v4028_v34 }
0x10e3   : > { %v4063_v4 = vpop.f32.mrb[60].mxu0  ;;  %v4106_v47 = vpop.f32.mrb[60].mxu1 }
0x10e4   : > { %v4699_v25 = vadd.f32 %v4063_v4, %v6947_v56  ;;  %v4065_v60 = vpop.f32.mrb[61].mxu0  ;;  %v4108_v19 = vpop.f32.mrb[61].mxu1  ;;  %v4731_v7 = vadd.f32 %v4106_v47, %v6956_v63 }
0x10e5   : > { %v4700_v58 = vadd.f32 %v4065_v60, %v6951_v59  ;;  %v4067_v61 = vpop.f32.mrb[62].mxu0  ;;  %v4110_v3 = vpop.f32.mrb[62].mxu1  ;;  %v4732_v30 = vadd.f32 %v4108_v19, %v6964_v20 }
0x10e6   : > { %v4123_v57 = vmul.f32 0.5, %v4699_v25  ;;  %v4701_v15 = vadd.f32 %v4067_v61, %v6947_v56  ;;  %v4069_v54 = vpop.f32.mrb[63].mxu0  ;;  %v4112_v0 = vpop.f32.mrb[63].mxu1  ;;  %v4733_v22 = vadd.f32 %v4110_v3, %v6956_v63 }
0x10e7   : > { %v4131_v35 = vmul.f32 0.5, %v4700_v58  ;;  %v4702_v1 = vadd.f32 %v4069_v54, %v6951_v59  ;;  %v4141_v56 = vmul.f32 0.5, %v4732_v30  ;;  %v4734_v28 = vadd.f32 %v4112_v0, %v6964_v20 }
0x10e8   : > { %5486 = vtanh.f32 %v4123_v57  ;;  %v4124_v32 = vmul.f32 0.5, %v4701_v15 }
0x10e9   : > { %5488 = vtanh.f32 %v4131_v35  ;;  %v4132_v18 = vmul.f32 0.5, %v4702_v1  ;;  %v4142_v29 = vmul.f32 0.5, %v4734_v28 }
0x10ea   : > { %5490 = vtanh.f32 %v4124_v32 }
0x10eb   : > { %5492 = vtanh.f32 %v4731_v7 }
0x10ec   : > { %5494 = vtanh.f32 %v4132_v18 }
0x10ed   : > { %5496 = vtanh.f32 %v4733_v22 }
0x10ee   : > { %5498 = vtanh.f32 %v4141_v56 }
0x10ef   : > { %5500 = vtanh.f32 %v4142_v29 }
0x10f2   : > { %v5487_v62 = vpop.eup %5486 }
0x10f3   : > { %v5489_v45 = vpop.eup %5488  ;;  %v4127_v59 = vmul.f32 0.5, %v5487_v62 }
0x10f4   : > { %v4135_v42 = vmul.f32 0.5, %v5489_v45  ;;  %v5491_v14 = vpop.eup %5490 }
0x10f5   : > { %v4129_v41 = vadd.f32 0.5, %v4127_v59  ;;  %v5493_v31 = vpop.eup %5492  ;;  %v4128_v43 = vmul.f32 0.5, %v5491_v14 }
0x10f6   : > { %v4137_v39 = vadd.f32 0.5, %v4135_v42  ;;  %v5495_v63 = vpop.eup %5494 }
0x10f7   : > { %v4151_v24 = vmul.f32 %v5493_v31, %v4129_v41  ;;  %v4130_v33 = vadd.f32 0.5, %v4128_v43  ;;  %v4136_v16 = vmul.f32 0.5, %v5495_v63  ;;  %v5497_v26 = vpop.eup %5496 }
0x10f8   : > { %v4149_v17 = vmul.f32 %v4137_v39, %v4014_v52  ;;  %v5499_v23 = vpop.eup %5498 }
0x10f9   : > { %v4138_v20 = vadd.f32 0.5, %v4136_v16  ;;  %v4152_v11 = vmul.f32 %v5497_v26, %v4130_v33  ;;  %v4145_v48 = vmul.f32 0.5, %v5499_v23  ;;  %v5501_v49 = vpop.eup %5500 }
0x10fa   : > { %v4153_v37 = vadd.f32 %v4151_v24, %v4149_v17  ;;  %v4146_v40 = vmul.f32 0.5, %v5501_v49 }
0x10fb   : > { %v4150_v8 = vmul.f32 %v4138_v20, %v7331_v38  ;;  %v4147_v44 = vadd.f32 0.5, %v4145_v48  ;;  %v5854_v38 = vmov (!%p4562_p5), 0.0  }
0x10fc   : > { %5502 = vtanh.f32 %v4153_v37  ;;  %4161 = vst [vmem:[#allocation5] sm:$0xff] %v4153_v37  ;;  %v4148_v5 = vadd.f32 0.5, %v4146_v40  ;;  %4587 = vmatprep.subr.bf16.mxu0 (!%p4562_p5), %v5854_v38  ;;  %4603 = vmatprep.mubr.msk.bf16.mxu0 (!%p4562_p5), %vm5855_vm0, %v5854_v38 }
0x10fd   : > { %v4154_v53 = vadd.f32 %v4152_v11, %v4150_v8  ;;  %4588 = vmatpush3.bf16.msra.mxu0 (!%p4562_p5), %v5570_v51 }
0x10fe   : > { %4589 = vmatprep.subr.bf16.mxu0 (!%p4562_p5), %v5854_v38 }
0x10ff   : > { %5504 = vtanh.f32 %v4154_v53  ;;  %4162 = vst [vmem:[#allocation5 + $0x8] sm:$0xff] %v4154_v53 }
0x1101   : > { %4590 = vmatpush3.bf16.msra.mxu0 (!%p4562_p5), %v5571_v10 }
0x1102   : > { %4591 = vmatprep.subr.bf16.mxu0 (!%p4562_p5), %v5854_v38 }
0x1105   : > { %4592 = vmatpush3.bf16.msra.mxu0 (!%p4562_p5), %v5572_v6 }
0x1106   : > { %v5503_v50 = vpop.eup %5502  ;;  %4166 = sbr.rel (%p4562_p5) target bundleno = 4597 (0x11f5), region = 88  ;;  %4593 = vmatprep.subr.bf16.mxu0 (!%p4562_p5), %v5854_v38 }
0x1107   : > { %v4157_v52 = vmul.f32 %v5503_v50, %v4147_v44 }
0x1109   : > { %4159 = vst [vmem:[#allocation4] sm:$0xff] %v4157_v52  ;;  %v5505_v2 = vpop.eup %5504  ;;  %4594 = vmatpush3.bf16.msra.mxu0 (!%p4562_p5), %v5573_v36 }
0x110a   : > { %v4158_v9 = vmul.f32 %v5505_v2, %v4148_v5  ;;  %4595 = vmatprep.subr.bf16.mxu0 (!%p4562_p5), %v5854_v38 }
0x110c   : > { %4160 = vst [vmem:[#allocation4 + $0x8] sm:$0xff] %v4158_v9  ;;  %v4167_v55 = vpack.c.bf16 (!%p4562_p5), %v4158_v9, %v4157_v52 }
0x110d   : > { %4596 = vmatpush3.bf16.msra.mxu0 %v5574_v46 }
0x110e   : > { %4597 = vmatprep.subr.bf16.mxu0 %v5854_v38 }
0x1111   : > { %4598 = vmatpush3.bf16.msra.mxu0 %v5575_v13 }
0x1112   : > { %4599 = vmatprep.subr.bf16.mxu0 %v5854_v38 }
0x1115   : > { %4600 = vmatpush3.bf16.msra.mxu0 %v5576_v12 }
0x1116   : > { %4601 = vmatprep.subr.bf16.mxu0 %v5854_v38 }
0x1119   : > { %4602 = vmatpush3.bf16.msra.mxu0 %v5577_v21 }
0x111c   : > { %4604 = vmatmul.mubr.bf16.vlgmr.msra.gmra.mrb[0].mxu0 %v4167_v55 }
0x11ef   : > { %v4273_v34 = vpop.f32.mrb[0].mxu0 }
0x11f0   : > { %v4274_v4 = vadd.f32 %v4563_v27, %v4273_v34  ;;  %v4605_v47 = vpop.f32.mrb[1].mxu0 }
0x11f1   : > { %v4276_v25 = vpop.f32.mrb[2].mxu0 }
0x11f2   : > { %4280 = vst [vmem:[#allocation19] sm:$0xff] %v4274_v4  ;;  %v4277_v60 = vadd.f32 %v4563_v27, %v4276_v25  ;;  %v4606_v19 = vpop.f32.mrb[3].mxu0 }
0x11f4   : > { %4281 = vst [vmem:[#allocation19 + $0x8] sm:$0xff] %v4277_v60 }
0x11f5 PF: > { %s7433_s27 = sadd.s32 4294967295, %s5840_s14   ;;  %s5856_s23 = smov [#allocation19]  }
0x11f6   : > { %p7349_p11 = scmp.eq.s32.totalorder %s7433_s27, 1  ;;  %s4291_s8 = sshll.u32 %s5856_s23, 4  ;;  %s4292_s8 = int_to_ptr.vmem [resolvable:$true] %s4291_s8 }
0x11f7   : > { %s5748_s25 = scalar_lea.vmem %s4292_s8, 256  ;;  %p5755_p2 = scmp.lt.s32.totalorder %s4292_s8, %s4292_s8 }
0x11f8   : > { %p5749_p12 = scmp.ne.s32.totalorder %s4292_s8, %s5748_s25  ;;  %p5756_p6 = scmp.lt.s32.totalorder %s5748_s25, %s5748_s25 }
0x11fa   : > { %p5750_p13 = pnand %p5749_p12, %p7349_p11  ;;  %p5757_p9 = por %p5756_p6, %p5755_p2 }
0x11fc   : > { %p5751_p0 = pneg %p5750_p13 }
0x11fe   : > { %p5758_p7 = pnand %p5757_p9, %p5751_p0 }
0x1200   : > { %5761 = shalt.err (!%p5758_p7)
}
0x1201   : > { %s7435_s1 = sld [smem:[#allocation28_spill]] }
0x1207   : > { %s5762_s6 = scalar_lea.hbm %s7435_s1, 256 }
0x1208   : > { %p5763_p1 = scmp.ne.s32.totalorder %s7435_s1, %s5762_s6  ;;  %p5768_p10 = scmp.lt.u32.totalorder %s5762_s6, %s7435_s1 }
0x120a   : > { %p5764_p3 = pnand %p5763_p1, %p7349_p11 }
0x120c   : > { %p5765_p8 = pneg %p5764_p3 }
0x120e   : > { %p5770_p4 = pnand %p5768_p10, %p5765_p8 }
0x1210   : > { %5773 = shalt.err (!%p5770_p4)
}
0x1211   : > { %s5857_s26 = smov 128   ;;  %s5858_s18 = smov 8  }
0x1212   : > { %4886 = dma.vmem_to_hbm [thread:$0]  (%p7349_p11), %s4292_s8, 256, %s7435_s1, [#allocation10], %s5857_s26, %s5857_s26, %s5858_s18  }
0x1213   : > { %5815 = dma.done.wait (%p7349_p11), [#allocation10], 256  }
0x1214   : > { %5817 = vsyncadd (%p7349_p11), [#allocation10], 4294967040 }
0x1215 PF: > { %s26_s14 = sadd.s32 1, %s5840_s14   ;;  %s7436_s30 = smov %s5824_s10 }
0x1216   : > { %p23_p5 = scmp.ge.s32.totalorder %s26_s14, 4   ;;  %s7437_s10 = smov %s5828_s11 }
0x1217   : > { %s7438_s11 = smov %s6113_s29  ;;  %s7439_s12 = smov %s5836_s13 }
0x1218   : > { %s7440_s13 = smov %s7442_s24  ;;  %25 = sbr.rel (!%p23_p5) target bundleno = 13 (0xd), region = 122 }
0x121f   :  { %4307 = vsyncpa [#allocation9], 1 }
0x1220   :  { %4309 = vsyncpa [#allocation9 + $0x1], 1 }
0x1221   :  { %4310 = vsyncpa [#allocation12], 1 }
0x1222   :  { %4311 = vsyncpa [#allocation15], 1 }
0x1223   :  { %4312 = vsyncpa [#allocation18], 1 }
0x1224   :  { %4313 = vsyncpa [#allocation10], 1 }
0x1225   :  { %4315 = vsyncpa [#allocation10 + $0x1], 1 }

</bundles_post_ra>
